<compile_context>
chip_gen: v5e
topology: v5e:2x2
jax: 0.10.0
libtpu: 0.0.40
codegen_flags: <defaults>
</compile_context>

<pallas_src>
import jax
import jax.numpy as jnp
from jax.experimental import pallas as pl
from jax.experimental.pallas import tpu as pltpu

# ----------------------------- static model dimensions -----------------------------
N0, N1, N2 = 64, 32, 16          # nodes per level
F_IN, HID, LAT = 8, 32, 16       # input features, hidden width, latent width
N_LEVELS = 3

# ----------------------------- graph-slab row offsets ------------------------------
G_A0 = 0
G_A1 = G_A0 + N0        # 64
G_A2 = G_A1 + N1        # 96
G_P1 = G_A2 + N2        # 112
G_P2 = G_P1 + N1        # 144
G_U1 = G_P2 + N2        # 160
G_U2 = G_U1 + N0        # 224
G_ROWS = G_U2 + N1      # 256   (all offsets are multiples of 8)

# ----------------------------- weight-slab row offsets -----------------------------
def _build_w_offsets():
    off, r = {}, 0

    def add(name, rows):
        nonlocal r
        off[name] = (r, r + rows)
        r += rows

    add("enc_w1", F_IN)
    add("enc_w2", HID)
    for l in range(N_LEVELS):
        add(f"enc_wm{l}", HID)
        add(f"enc_ws{l}", HID)
    add("w_mu", HID)
    add("w_lv", HID)
    add("dec_w1", HID)          # slot padded to HID rows (real matrix has LAT rows)
    add("dec_w2", HID)
    for l in range(N_LEVELS):
        add(f"dec_wm{l}", HID)
        add(f"dec_ws{l}", HID)
    add("out_w1", HID)
    add("out_w2", HID)
    return off, r


W_OFF, W_ROWS = _build_w_offsets()   # W_ROWS = 616 (multiple of 8)

# ---------------------------- bias/gamma/beta slab rows -----------------------------
def _build_v_idx():
    names = (["enc_b1", "enc_b2", "enc_g", "enc_be"]
             + [f"enc_m{t}{l}" for l in range(N_LEVELS) for t in ("b", "g", "be")]
             + ["b_mu", "b_lv", "dec_b1", "dec_b2", "dec_g", "dec_be"]
             + [f"dec_m{t}{l}" for l in range(N_LEVELS) for t in ("b", "g", "be")]
             + ["out_b1", "out_b2"])
    return {n: i for i, n in enumerate(names)}, len(names)


V_IDX, V_ROWS = _build_v_idx()       # 30 rows


# ------------------------------ in-kernel building blocks ---------------------------
def _ln(h, gamma, beta, eps=1e-5):
    mu = jnp.mean(h, axis=-1, keepdims=True)
    var = jnp.mean((h - mu) ** 2, axis=-1, keepdims=True)
    return (h - mu) * jax.lax.rsqrt(var + eps) * gamma + beta


def _mlp(x, w1, b1, w2, b2, gamma, beta):
    # 2-layer MLP: LN(ReLU(x@W1 + b1) @ W2 + b2)
    h = jnp.maximum(jnp.dot(x, w1, preferred_element_type=jnp.float32) + b1, 0.0)
    h = jnp.dot(h, w2, preferred_element_type=jnp.float32) + b2
    return _ln(h, gamma, beta)


def _mpl(adj, x, wm, ws, b, gamma, beta):
    # Message passing layer: LN(ReLU((A@x)@Wm + x@Ws + b))  (two tiny matmuls, VPU add)
    m = jnp.dot(adj, x, preferred_element_type=jnp.float32)
    h = (jnp.dot(m, wm, preferred_element_type=jnp.float32)
         + jnp.dot(x, ws, preferred_element_type=jnp.float32) + b)
    return _ln(jnp.maximum(h, 0.0), gamma, beta)


# --------------------------------- fused forward kernel -----------------------------
def _msae_kernel(x_ref, g_ref, w_ref, v_ref, xrec_ref, kl_ref):
    def W(name):
        r0, r1 = W_OFF[name]
        return w_ref[r0:r1, :]

    def V(name):
        i = V_IDX[name]
        return v_ref[i:i + 1, :]

    x = x_ref[0]                                   # [N0, F_IN]

    # graph matrices (static slices of one slab; row offsets are 8-aligned)
    a0 = g_ref[G_A0:G_A0 + N0, 0:N0]
    a1 = g_ref[G_A1:G_A1 + N1, 0:N1]
    a2 = g_ref[G_A2:G_A2 + N2, 0:N2]
    p1 = g_ref[G_P1:G_P1 + N1, 0:N0]
    p2 = g_ref[G_P2:G_P2 + N2, 0:N1]
    u1 = g_ref[G_U1:G_U1 + N0, 0:N1]
    u2 = g_ref[G_U2:G_U2 + N1, 0:N2]

    # ------------------------------------ encoder ------------------------------------
    h = _mlp(x, W("enc_w1"), V("enc_b1"), W("enc_w2"), V("enc_b2"),
             V("enc_g"), V("enc_be"))
    h = _mpl(a0, h, W("enc_wm0"), W("enc_ws0"),
             V("enc_mb0"), V("enc_mg0"), V("enc_mbe0"))
    h = jnp.dot(p1, h, preferred_element_type=jnp.float32)      # pool level 0 -> 1
    h = _mpl(a1, h, W("enc_wm1"), W("enc_ws1"),
             V("enc_mb1"), V("enc_mg1"), V("enc_mbe1"))
    h = jnp.dot(p2, h, preferred_element_type=jnp.float32)      # pool level 1 -> 2
    h = _mpl(a2, h, W("enc_wm2"), W("enc_ws2"),
             V("enc_mb2"), V("enc_mg2"), V("enc_mbe2"))

    # latent head: mu / logvar in padded HID lanes (cols >= LAT are exactly zero)
    mu = jnp.dot(h, W("w_mu"), preferred_element_type=jnp.float32) + V("b_mu")
    lv = jnp.dot(h, W("w_lv"), preferred_element_type=jnp.float32) + V("b_lv")
    kl = jnp.sum(-0.5 * (1.0 + lv - mu * mu - jnp.exp(lv)))     # padded cols add 0
    kl_ref[...] = jnp.full(kl_ref.shape, kl, dtype=jnp.float32)
    z = mu  # TODO(synk): reparameterization noise (Train=True) omitted -> deterministic latent

    # ------------------------------------ decoder ------------------------------------
    g = _mlp(z, W("dec_w1"), V("dec_b1"), W("dec_w2"), V("dec_b2"),
             V("dec_g"), V("dec_be"))
    g = _mpl(a2, g, W("dec_wm2"), W("dec_ws2"),
             V("dec_mb2"), V("dec_mg2"), V("dec_mbe2"))
    g = jnp.dot(u2, g, preferred_element_type=jnp.float32)      # unpool 2 -> 1
    g = _mpl(a1, g, W("dec_wm1"), W("dec_ws1"),
             V("dec_mb1"), V("dec_mg1"), V("dec_mbe1"))
    g = jnp.dot(u1, g, preferred_element_type=jnp.float32)      # unpool 1 -> 0
    g = _mpl(a0, g, W("dec_wm0"), W("dec_ws0"),
             V("dec_mb0"), V("dec_mg0"), V("dec_mbe0"))

    # output MLP; out_w2 / out_b2 are zero-padded past F_IN so padded lanes stay 0
    o = jnp.maximum(jnp.dot(g, W("out_w1"), preferred_element_type=jnp.float32)
                    + V("out_b1"), 0.0)
    xrec_ref[0] = (jnp.dot(o, W("out_w2"), preferred_element_type=jnp.float32)
                   + V("out_b2")).astype(xrec_ref.dtype)


# ---------------------------------- pallas_call wrapper -----------------------------
def msae_forward(x, g_slab, w_slab, v_slab):
    """x: [B, N0, F_IN] -> (x_rec [B, N0, F_IN], kl [B])."""
    b = x.shape[0]
    x_rec, kl = pl.pallas_call(
        _msae_kernel,
        out_shape=(jax.ShapeDtypeStruct((b, N0, HID), jnp.float32),
                   jax.ShapeDtypeStruct((b, 1, 128), jnp.float32)),
        grid=(b,),
        in_specs=[
            pl.BlockSpec((1, N0, F_IN), lambda i: (i, 0, 0)),
            pl.BlockSpec((G_ROWS, N0), lambda i: (0, 0)),
            pl.BlockSpec((W_ROWS, HID), lambda i: (0, 0)),
            pl.BlockSpec((V_ROWS, HID), lambda i: (0, 0)),
        ],
        out_specs=(
            pl.BlockSpec((1, N0, HID), lambda i: (i, 0, 0)),
            pl.BlockSpec((1, 1, 128), lambda i: (i, 0, 0)),
        ),
        compiler_params=pltpu.CompilerParams(dimension_semantics=("parallel",)),
    )(x, g_slab, w_slab, v_slab)
    return x_rec[:, :, :F_IN], kl[:, 0, 0]


# ------------------------------------- parameter init -------------------------------
def _uni(key, shape, fin):
    s = 1.0 / jnp.sqrt(jnp.float32(fin))
    return jax.random.uniform(key, shape, jnp.float32, -s, s)


def init_params(key):
    ks = iter(jax.random.split(key, 64))
    nk = lambda: next(ks)
    w, v = {}, {}

    w["enc_w1"] = _uni(nk(), (F_IN, HID), F_IN)
    w["enc_w2"] = _uni(nk(), (HID, HID), HID)
    for l in range(N_LEVELS):
        w[f"enc_wm{l}"] = _uni(nk(), (HID, HID), HID)
        w[f"enc_ws{l}"] = _uni(nk(), (HID, HID), HID)
    w["w_mu"] = _uni(nk(), (HID, LAT), HID)
    w["w_lv"] = _uni(nk(), (HID, LAT), HID)
    w["dec_w1"] = _uni(nk(), (LAT, HID), LAT)
    w["dec_w2"] = _uni(nk(), (HID, HID), HID)
    for l in range(N_LEVELS):
        w[f"dec_wm{l}"] = _uni(nk(), (HID, HID), HID)
        w[f"dec_ws{l}"] = _uni(nk(), (HID, HID), HID)
    w["out_w1"] = _uni(nk(), (HID, HID), HID)
    w["out_w2"] = _uni(nk(), (HID, F_IN), HID)

    ones, zeros = jnp.ones((1, HID), jnp.float32), jnp.zeros((1, HID), jnp.float32)
    v["enc_b1"] = _uni(nk(), (1, HID), F_IN)
    v["enc_b2"] = _uni(nk(), (1, HID), HID)
    v["enc_g"], v["enc_be"] = ones, zeros
    for l in range(N_LEVELS):
        v[f"enc_mb{l}"] = _uni(nk(), (1, HID), HID)
        v[f"enc_mg{l}"], v[f"enc_mbe{l}"] = ones, zeros
    v["b_mu"] = _uni(nk(), (1, LAT), HID)
    v["b_lv"] = _uni(nk(), (1, LAT), HID)
    v["dec_b1"] = _uni(nk(), (1, HID), LAT)
    v["dec_b2"] = _uni(nk(), (1, HID), HID)
    v["dec_g"], v["dec_be"] = ones, zeros
    for l in range(N_LEVELS):
        v[f"dec_mb{l}"] = _uni(nk(), (1, HID), HID)
        v[f"dec_mg{l}"], v[f"dec_mbe{l}"] = ones, zeros
    v["out_b1"] = _uni(nk(), (1, HID), HID)
    v["out_b2"] = _uni(nk(), (1, F_IN), HID)
    return w, v


def pack_weights(w):
    slab = jnp.zeros((W_ROWS, HID), jnp.float32)
    for name, (r0, _) in W_OFF.items():
        m = w[name]
        slab = slab.at[r0:r0 + m.shape[0], :m.shape[1]].set(m)
    return slab


def pack_vectors(v):
    slab = jnp.zeros((V_ROWS, HID), jnp.float32)
    for name, i in V_IDX.items():
        vec = v[name]
        slab = slab.at[i:i + 1, :vec.shape[1]].set(vec)
    return slab


def pack_graph(adjs, pools, unpools):
    mats = [adjs[0], adjs[1], adjs[2], pools[0], pools[1], unpools[0], unpools[1]]
    slab = jnp.zeros((G_ROWS, N0), jnp.float32)
    r = 0
    for m in mats:
        slab = slab.at[r:r + m.shape[0], :m.shape[1]].set(m)
        r += m.shape[0]
    return slab


# ---------------------------------------- graph glue --------------------------------
def ring_adj(n):
    i = jnp.arange(n)
    a = jnp.zeros((n, n), jnp.float32)
    a = a.at[i, (i + 1) % n].set(1.0)
    a = a.at[i, (i - 1) % n].set(1.0)
    return a


def normalize_adj(a):
    a = a + jnp.eye(a.shape[0], dtype=jnp.float32)
    deg = jnp.maximum(jnp.sum(a, axis=1, keepdims=True), 1.0)
    return a / deg


def selection_matrix(ids, n_src):
    # rows are one-hot: P @ h == h[ids]; P.T @ h == zeros(n_src).at[ids].set(h)
    m = jnp.zeros((ids.shape[0], n_src), jnp.float32)
    return m.at[jnp.arange(ids.shape[0]), ids].set(1.0)


# ------------------------------------------- main -----------------------------------
if __name__ == "__main__":
    B = 4
    key = jax.random.PRNGKey(0)
    k_params, k_x = jax.random.split(key)

    # precomputed multiscale node id lists (the module's m_ids) -- deterministic strided
    # TODO(synk): data-dependent TopK pooling scores not implemented; fixed ids stand in.
    ids1 = jnp.arange(0, N0, 2, dtype=jnp.int32)     # 64 -> 32
    ids2 = jnp.arange(0, N1, 2, dtype=jnp.int32)     # 32 -> 16

    # multiscale adjacency (m_gs analogue): ring graph, coarsened by node selection
    a0u = ring_adj(N0)
    a1u = a0u[ids1][:, ids1]
    a2u = a1u[ids2][:, ids2]
    adjs = (normalize_adj(a0u), normalize_adj(a1u), normalize_adj(a2u))
    pools = (selection_matrix(ids1, N0), selection_matrix(ids2, N1))
    unpools = (pools[0].T, pools[1].T)

    g_slab = pack_graph(adjs, pools, unpools)
    w_raw, v_raw = init_params(k_params)
    w_slab = pack_weights(w_raw)
    v_slab = pack_vectors(v_raw)

    x = jax.random.normal(k_x, (B, N0, F_IN), jnp.float32)

    fwd = jax.jit(msae_forward)
    x_rec, kl = fwd(x, g_slab, w_slab, v_slab)
    jax.block_until_ready((x_rec, kl))

    assert x_rec.shape == (B, N0, F_IN)
    assert kl.shape == (B,)
    # mirrors the module's NaN assertions on encoder/decoder outputs
    assert not bool(jnp.any(jnp.isnan(x_rec))), "something is nan after decoder"
    assert not bool(jnp.any(jnp.isnan(kl))), "kl is nan"

    print("KERNEL_OK")
</pallas_src>

<mosaic_0001>
module attributes {stable_mosaic.version = 11 : i64} {
  func.func @_msae_kernel(%arg0: i32, %arg1: memref<1x64x8xf32, #tpu.memory_space<vmem>>, %arg2: memref<256x64xf32, #tpu.memory_space<vmem>>, %arg3: memref<616x32xf32, #tpu.memory_space<vmem>>, %arg4: memref<30x32xf32, #tpu.memory_space<vmem>>, %arg5: memref<1x64x32xf32, #tpu.memory_space<vmem>>, %arg6: memref<1x1x128xf32, #tpu.memory_space<vmem>>) attributes {dimension_semantics = [#tpu.dimension_semantics<parallel>], iteration_bounds = array<i64: 4>, scalar_prefetch = 0 : i64, scratch_operands = 0 : i64, tpu.core_type = #tpu.core_type<tc>, window_params = [{transform_indices = @transform_0, window_bounds = array<i64: 1, 64, 8>}, {pipeline_mode = #tpu.pipeline_mode<synchronous>, transform_indices = @transform_1, window_bounds = array<i64: 256, 64>}, {pipeline_mode = #tpu.pipeline_mode<synchronous>, transform_indices = @transform_2, window_bounds = array<i64: 616, 32>}, {pipeline_mode = #tpu.pipeline_mode<synchronous>, transform_indices = @transform_3, window_bounds = array<i64: 30, 32>}, {transform_indices = @transform_4, window_bounds = array<i64: 1, 64, 32>}, {transform_indices = @transform_5, window_bounds = array<i64: 1, 1, 128>}]} {
    %c0 = arith.constant 0 : index
    %c0_0 = arith.constant 0 : index
    %c0_1 = arith.constant 0 : index
    %0 = vector.load %arg1[%c0, %c0_0, %c0_1] : memref<1x64x8xf32, #tpu.memory_space<vmem>>, vector<1x64x8xf32>
    %1 = vector.shape_cast %0 : vector<1x64x8xf32> to vector<64x8xf32>
    %c0_2 = arith.constant 0 : index
    %c0_3 = arith.constant 0 : index
    %2 = vector.load %arg2[%c0_2, %c0_3] : memref<256x64xf32, #tpu.memory_space<vmem>>, vector<64x64xf32>
    %c64 = arith.constant 64 : index
    %c0_4 = arith.constant 0 : index
    %3 = vector.load %arg2[%c64, %c0_4] : memref<256x64xf32, #tpu.memory_space<vmem>>, vector<32x32xf32>
    %c96 = arith.constant 96 : index
    %c0_5 = arith.constant 0 : index
    %4 = vector.load %arg2[%c96, %c0_5] : memref<256x64xf32, #tpu.memory_space<vmem>>, vector<16x16xf32>
    %c112 = arith.constant 112 : index
    %c0_6 = arith.constant 0 : index
    %5 = vector.load %arg2[%c112, %c0_6] : memref<256x64xf32, #tpu.memory_space<vmem>>, vector<32x64xf32>
    %c144 = arith.constant 144 : index
    %c0_7 = arith.constant 0 : index
    %6 = vector.load %arg2[%c144, %c0_7] : memref<256x64xf32, #tpu.memory_space<vmem>>, vector<16x32xf32>
    %c160 = arith.constant 160 : index
    %c0_8 = arith.constant 0 : index
    %7 = vector.load %arg2[%c160, %c0_8] : memref<256x64xf32, #tpu.memory_space<vmem>>, vector<64x32xf32>
    %c224 = arith.constant 224 : index
    %c0_9 = arith.constant 0 : index
    %8 = vector.load %arg2[%c224, %c0_9] : memref<256x64xf32, #tpu.memory_space<vmem>>, vector<32x16xf32>
    %c0_10 = arith.constant 0 : index
    %c0_11 = arith.constant 0 : index
    %9 = vector.load %arg3[%c0_10, %c0_11] : memref<616x32xf32, #tpu.memory_space<vmem>>, vector<8x32xf32>
    %c0_12 = arith.constant 0 : index
    %c0_13 = arith.constant 0 : index
    %10 = vector.load %arg4[%c0_12, %c0_13] : memref<30x32xf32, #tpu.memory_space<vmem>>, vector<1x32xf32>
    %c8 = arith.constant 8 : index
    %c0_14 = arith.constant 0 : index
    %11 = vector.load %arg3[%c8, %c0_14] : memref<616x32xf32, #tpu.memory_space<vmem>>, vector<32x32xf32>
    %c1 = arith.constant 1 : index
    %c0_15 = arith.constant 0 : index
    %12 = vector.load %arg4[%c1, %c0_15] : memref<30x32xf32, #tpu.memory_space<vmem>>, vector<1x32xf32>
    %c2 = arith.constant 2 : index
    %c0_16 = arith.constant 0 : index
    %13 = vector.load %arg4[%c2, %c0_16] : memref<30x32xf32, #tpu.memory_space<vmem>>, vector<1x32xf32>
    %c3 = arith.constant 3 : index
    %c0_17 = arith.constant 0 : index
    %14 = vector.load %arg4[%c3, %c0_17] : memref<30x32xf32, #tpu.memory_space<vmem>>, vector<1x32xf32>
    %cst = arith.constant dense<0.000000e+00> : vector<64x32xf32>
    %15 = tpu.matmul %1, %9, %cst {dimension_numbers = #tpu.dot_dimension_numbers<[1], [0], [0], [1], [0, 0, 1, 1], [], []>} : vector<64x8xf32>, vector<8x32xf32>, vector<64x32xf32> -> vector<64x32xf32>
    %16 = vector.broadcast %10 : vector<1x32xf32> to vector<64x32xf32>
    %17 = arith.addf %15, %16 : vector<64x32xf32>
    %cst_18 = arith.constant 0.000000e+00 : f32
    %18 = vector.broadcast %cst_18 : f32 to vector<64x32xf32>
    %19 = arith.maximumf %17, %18 : vector<64x32xf32>
    %cst_19 = arith.constant dense<0.000000e+00> : vector<64x32xf32>
    %20 = tpu.matmul %19, %11, %cst_19 {dimension_numbers = #tpu.dot_dimension_numbers<[1], [0], [0], [1], [0, 0, 1, 1], [], []>} : vector<64x32xf32>, vector<32x32xf32>, vector<64x32xf32> -> vector<64x32xf32>
    %21 = vector.broadcast %12 : vector<1x32xf32> to vector<64x32xf32>
    %22 = arith.addf %20, %21 : vector<64x32xf32>
    %cst_20 = arith.constant dense<0.000000e+00> : vector<64xf32>
    %23 = vector.multi_reduction <add>, %22, %cst_20 [1] : vector<64x32xf32> to vector<64xf32>
    %24 = vector.shape_cast %23 : vector<64xf32> to vector<64x1xf32>
    %cst_21 = arith.constant 3.200000e+01 : f32
    %25 = vector.broadcast %cst_21 : f32 to vector<64x1xf32>
    %26 = arith.divf %24, %25 : vector<64x1xf32>
    %27 = vector.broadcast %26 : vector<64x1xf32> to vector<64x32xf32>
    %28 = arith.subf %22, %27 : vector<64x32xf32>
    %29 = arith.mulf %28, %28 : vector<64x32xf32>
    %cst_22 = arith.constant dense<0.000000e+00> : vector<64xf32>
    %30 = vector.multi_reduction <add>, %29, %cst_22 [1] : vector<64x32xf32> to vector<64xf32>
    %31 = vector.shape_cast %30 : vector<64xf32> to vector<64x1xf32>
    %cst_23 = arith.constant 3.200000e+01 : f32
    %32 = vector.broadcast %cst_23 : f32 to vector<64x1xf32>
    %33 = arith.divf %31, %32 : vector<64x1xf32>
    %34 = vector.broadcast %26 : vector<64x1xf32> to vector<64x32xf32>
    %35 = arith.subf %22, %34 : vector<64x32xf32>
    %cst_24 = arith.constant 9.99999974E-6 : f32
    %36 = vector.broadcast %cst_24 : f32 to vector<64x1xf32>
    %37 = arith.addf %33, %36 : vector<64x1xf32>
    %38 = math.rsqrt %37 : vector<64x1xf32>
    %39 = vector.broadcast %38 : vector<64x1xf32> to vector<64x32xf32>
    %40 = arith.mulf %35, %39 : vector<64x32xf32>
    %41 = vector.broadcast %13 : vector<1x32xf32> to vector<64x32xf32>
    %42 = arith.mulf %40, %41 : vector<64x32xf32>
    %43 = vector.broadcast %14 : vector<1x32xf32> to vector<64x32xf32>
    %44 = arith.addf %42, %43 : vector<64x32xf32>
    %c40 = arith.constant 40 : index
    %c0_25 = arith.constant 0 : index
    %45 = vector.load %arg3[%c40, %c0_25] : memref<616x32xf32, #tpu.memory_space<vmem>>, vector<32x32xf32>
    %c72 = arith.constant 72 : index
    %c0_26 = arith.constant 0 : index
    %46 = vector.load %arg3[%c72, %c0_26] : memref<616x32xf32, #tpu.memory_space<vmem>>, vector<32x32xf32>
    %c4 = arith.constant 4 : index
    %c0_27 = arith.constant 0 : index
    %47 = vector.load %arg4[%c4, %c0_27] : memref<30x32xf32, #tpu.memory_space<vmem>>, vector<1x32xf32>
    %c5 = arith.constant 5 : index
    %c0_28 = arith.constant 0 : index
    %48 = vector.load %arg4[%c5, %c0_28] : memref<30x32xf32, #tpu.memory_space<vmem>>, vector<1x32xf32>
    %c6 = arith.constant 6 : index
    %c0_29 = arith.constant 0 : index
    %49 = vector.load %arg4[%c6, %c0_29] : memref<30x32xf32, #tpu.memory_space<vmem>>, vector<1x32xf32>
    %cst_30 = arith.constant dense<0.000000e+00> : vector<64x32xf32>
    %50 = tpu.matmul %2, %44, %cst_30 {dimension_numbers = #tpu.dot_dimension_numbers<[1], [0], [0], [1], [0, 0, 1, 1], [], []>} : vector<64x64xf32>, vector<64x32xf32>, vector<64x32xf32> -> vector<64x32xf32>
    %cst_31 = arith.constant dense<0.000000e+00> : vector<64x32xf32>
    %51 = tpu.matmul %50, %45, %cst_31 {dimension_numbers = #tpu.dot_dimension_numbers<[1], [0], [0], [1], [0, 0, 1, 1], [], []>} : vector<64x32xf32>, vector<32x32xf32>, vector<64x32xf32> -> vector<64x32xf32>
    %cst_32 = arith.constant dense<0.000000e+00> : vector<64x32xf32>
    %52 = tpu.matmul %44, %46, %cst_32 {dimension_numbers = #tpu.dot_dimension_numbers<[1], [0], [0], [1], [0, 0, 1, 1], [], []>} : vector<64x32xf32>, vector<32x32xf32>, vector<64x32xf32> -> vector<64x32xf32>
    %53 = arith.addf %51, %52 : vector<64x32xf32>
    %54 = vector.broadcast %47 : vector<1x32xf32> to vector<64x32xf32>
    %55 = arith.addf %53, %54 : vector<64x32xf32>
    %cst_33 = arith.constant 0.000000e+00 : f32
    %56 = vector.broadcast %cst_33 : f32 to vector<64x32xf32>
    %57 = arith.maximumf %55, %56 : vector<64x32xf32>
    %cst_34 = arith.constant dense<0.000000e+00> : vector<64xf32>
    %58 = vector.multi_reduction <add>, %57, %cst_34 [1] : vector<64x32xf32> to vector<64xf32>
    %59 = vector.shape_cast %58 : vector<64xf32> to vector<64x1xf32>
    %cst_35 = arith.constant 3.200000e+01 : f32
    %60 = vector.broadcast %cst_35 : f32 to vector<64x1xf32>
    %61 = arith.divf %59, %60 : vector<64x1xf32>
    %62 = vector.broadcast %61 : vector<64x1xf32> to vector<64x32xf32>
    %63 = arith.subf %57, %62 : vector<64x32xf32>
    %64 = arith.mulf %63, %63 : vector<64x32xf32>
    %cst_36 = arith.constant dense<0.000000e+00> : vector<64xf32>
    %65 = vector.multi_reduction <add>, %64, %cst_36 [1] : vector<64x32xf32> to vector<64xf32>
    %66 = vector.shape_cast %65 : vector<64xf32> to vector<64x1xf32>
    %cst_37 = arith.constant 3.200000e+01 : f32
    %67 = vector.broadcast %cst_37 : f32 to vector<64x1xf32>
    %68 = arith.divf %66, %67 : vector<64x1xf32>
    %69 = vector.broadcast %61 : vector<64x1xf32> to vector<64x32xf32>
    %70 = arith.subf %57, %69 : vector<64x32xf32>
    %cst_38 = arith.constant 9.99999974E-6 : f32
    %71 = vector.broadcast %cst_38 : f32 to vector<64x1xf32>
    %72 = arith.addf %68, %71 : vector<64x1xf32>
    %73 = math.rsqrt %72 : vector<64x1xf32>
    %74 = vector.broadcast %73 : vector<64x1xf32> to vector<64x32xf32>
    %75 = arith.mulf %70, %74 : vector<64x32xf32>
    %76 = vector.broadcast %48 : vector<1x32xf32> to vector<64x32xf32>
    %77 = arith.mulf %75, %76 : vector<64x32xf32>
    %78 = vector.broadcast %49 : vector<1x32xf32> to vector<64x32xf32>
    %79 = arith.addf %77, %78 : vector<64x32xf32>
    %cst_39 = arith.constant dense<0.000000e+00> : vector<32x32xf32>
    %80 = tpu.matmul %5, %79, %cst_39 {dimension_numbers = #tpu.dot_dimension_numbers<[1], [0], [0], [1], [0, 0, 1, 1], [], []>} : vector<32x64xf32>, vector<64x32xf32>, vector<32x32xf32> -> vector<32x32xf32>
    %c104 = arith.constant 104 : index
    %c0_40 = arith.constant 0 : index
    %81 = vector.load %arg3[%c104, %c0_40] : memref<616x32xf32, #tpu.memory_space<vmem>>, vector<32x32xf32>
    %c136 = arith.constant 136 : index
    %c0_41 = arith.constant 0 : index
    %82 = vector.load %arg3[%c136, %c0_41] : memref<616x32xf32, #tpu.memory_space<vmem>>, vector<32x32xf32>
    %c7 = arith.constant 7 : index
    %c0_42 = arith.constant 0 : index
    %83 = vector.load %arg4[%c7, %c0_42] : memref<30x32xf32, #tpu.memory_space<vmem>>, vector<1x32xf32>
    %c8_43 = arith.constant 8 : index
    %c0_44 = arith.constant 0 : index
    %84 = vector.load %arg4[%c8_43, %c0_44] : memref<30x32xf32, #tpu.memory_space<vmem>>, vector<1x32xf32>
    %c9 = arith.constant 9 : index
    %c0_45 = arith.constant 0 : index
    %85 = vector.load %arg4[%c9, %c0_45] : memref<30x32xf32, #tpu.memory_space<vmem>>, vector<1x32xf32>
    %cst_46 = arith.constant dense<0.000000e+00> : vector<32x32xf32>
    %86 = tpu.matmul %3, %80, %cst_46 {dimension_numbers = #tpu.dot_dimension_numbers<[1], [0], [0], [1], [0, 0, 1, 1], [], []>} : vector<32x32xf32>, vector<32x32xf32>, vector<32x32xf32> -> vector<32x32xf32>
    %cst_47 = arith.constant dense<0.000000e+00> : vector<32x32xf32>
    %87 = tpu.matmul %86, %81, %cst_47 {dimension_numbers = #tpu.dot_dimension_numbers<[1], [0], [0], [1], [0, 0, 1, 1], [], []>} : vector<32x32xf32>, vector<32x32xf32>, vector<32x32xf32> -> vector<32x32xf32>
    %cst_48 = arith.constant dense<0.000000e+00> : vector<32x32xf32>
    %88 = tpu.matmul %80, %82, %cst_48 {dimension_numbers = #tpu.dot_dimension_numbers<[1], [0], [0], [1], [0, 0, 1, 1], [], []>} : vector<32x32xf32>, vector<32x32xf32>, vector<32x32xf32> -> vector<32x32xf32>
    %89 = arith.addf %87, %88 : vector<32x32xf32>
    %90 = vector.broadcast %83 : vector<1x32xf32> to vector<32x32xf32>
    %91 = arith.addf %89, %90 : vector<32x32xf32>
    %cst_49 = arith.constant 0.000000e+00 : f32
    %92 = vector.broadcast %cst_49 : f32 to vector<32x32xf32>
    %93 = arith.maximumf %91, %92 : vector<32x32xf32>
    %cst_50 = arith.constant dense<0.000000e+00> : vector<32xf32>
    %94 = vector.multi_reduction <add>, %93, %cst_50 [1] : vector<32x32xf32> to vector<32xf32>
    %95 = vector.shape_cast %94 : vector<32xf32> to vector<32x1xf32>
    %cst_51 = arith.constant 3.200000e+01 : f32
    %96 = vector.broadcast %cst_51 : f32 to vector<32x1xf32>
    %97 = arith.divf %95, %96 : vector<32x1xf32>
    %98 = vector.broadcast %97 : vector<32x1xf32> to vector<32x32xf32>
    %99 = arith.subf %93, %98 : vector<32x32xf32>
    %100 = arith.mulf %99, %99 : vector<32x32xf32>
    %cst_52 = arith.constant dense<0.000000e+00> : vector<32xf32>
    %101 = vector.multi_reduction <add>, %100, %cst_52 [1] : vector<32x32xf32> to vector<32xf32>
    %102 = vector.shape_cast %101 : vector<32xf32> to vector<32x1xf32>
    %cst_53 = arith.constant 3.200000e+01 : f32
    %103 = vector.broadcast %cst_53 : f32 to vector<32x1xf32>
    %104 = arith.divf %102, %103 : vector<32x1xf32>
    %105 = vector.broadcast %97 : vector<32x1xf32> to vector<32x32xf32>
    %106 = arith.subf %93, %105 : vector<32x32xf32>
    %cst_54 = arith.constant 9.99999974E-6 : f32
    %107 = vector.broadcast %cst_54 : f32 to vector<32x1xf32>
    %108 = arith.addf %104, %107 : vector<32x1xf32>
    %109 = math.rsqrt %108 : vector<32x1xf32>
    %110 = vector.broadcast %109 : vector<32x1xf32> to vector<32x32xf32>
    %111 = arith.mulf %106, %110 : vector<32x32xf32>
    %112 = vector.broadcast %84 : vector<1x32xf32> to vector<32x32xf32>
    %113 = arith.mulf %111, %112 : vector<32x32xf32>
    %114 = vector.broadcast %85 : vector<1x32xf32> to vector<32x32xf32>
    %115 = arith.addf %113, %114 : vector<32x32xf32>
    %cst_55 = arith.constant dense<0.000000e+00> : vector<16x32xf32>
    %116 = tpu.matmul %6, %115, %cst_55 {dimension_numbers = #tpu.dot_dimension_numbers<[1], [0], [0], [1], [0, 0, 1, 1], [], []>} : vector<16x32xf32>, vector<32x32xf32>, vector<16x32xf32> -> vector<16x32xf32>
    %c168 = arith.constant 168 : index
    %c0_56 = arith.constant 0 : index
    %117 = vector.load %arg3[%c168, %c0_56] : memref<616x32xf32, #tpu.memory_space<vmem>>, vector<32x32xf32>
    %c200 = arith.constant 200 : index
    %c0_57 = arith.constant 0 : index
    %118 = vector.load %arg3[%c200, %c0_57] : memref<616x32xf32, #tpu.memory_space<vmem>>, vector<32x32xf32>
    %c10 = arith.constant 10 : index
    %c0_58 = arith.constant 0 : index
    %119 = vector.load %arg4[%c10, %c0_58] : memref<30x32xf32, #tpu.memory_space<vmem>>, vector<1x32xf32>
    %c11 = arith.constant 11 : index
    %c0_59 = arith.constant 0 : index
    %120 = vector.load %arg4[%c11, %c0_59] : memref<30x32xf32, #tpu.memory_space<vmem>>, vector<1x32xf32>
    %c12 = arith.constant 12 : index
    %c0_60 = arith.constant 0 : index
    %121 = vector.load %arg4[%c12, %c0_60] : memref<30x32xf32, #tpu.memory_space<vmem>>, vector<1x32xf32>
    %cst_61 = arith.constant dense<0.000000e+00> : vector<16x32xf32>
    %122 = tpu.matmul %4, %116, %cst_61 {dimension_numbers = #tpu.dot_dimension_numbers<[1], [0], [0], [1], [0, 0, 1, 1], [], []>} : vector<16x16xf32>, vector<16x32xf32>, vector<16x32xf32> -> vector<16x32xf32>
    %cst_62 = arith.constant dense<0.000000e+00> : vector<16x32xf32>
    %123 = tpu.matmul %122, %117, %cst_62 {dimension_numbers = #tpu.dot_dimension_numbers<[1], [0], [0], [1], [0, 0, 1, 1], [], []>} : vector<16x32xf32>, vector<32x32xf32>, vector<16x32xf32> -> vector<16x32xf32>
    %cst_63 = arith.constant dense<0.000000e+00> : vector<16x32xf32>
    %124 = tpu.matmul %116, %118, %cst_63 {dimension_numbers = #tpu.dot_dimension_numbers<[1], [0], [0], [1], [0, 0, 1, 1], [], []>} : vector<16x32xf32>, vector<32x32xf32>, vector<16x32xf32> -> vector<16x32xf32>
    %125 = arith.addf %123, %124 : vector<16x32xf32>
    %126 = vector.broadcast %119 : vector<1x32xf32> to vector<16x32xf32>
    %127 = arith.addf %125, %126 : vector<16x32xf32>
    %cst_64 = arith.constant 0.000000e+00 : f32
    %128 = vector.broadcast %cst_64 : f32 to vector<16x32xf32>
    %129 = arith.maximumf %127, %128 : vector<16x32xf32>
    %cst_65 = arith.constant dense<0.000000e+00> : vector<16xf32>
    %130 = vector.multi_reduction <add>, %129, %cst_65 [1] : vector<16x32xf32> to vector<16xf32>
    %131 = vector.shape_cast %130 : vector<16xf32> to vector<16x1xf32>
    %cst_66 = arith.constant 3.200000e+01 : f32
    %132 = vector.broadcast %cst_66 : f32 to vector<16x1xf32>
    %133 = arith.divf %131, %132 : vector<16x1xf32>
    %134 = vector.broadcast %133 : vector<16x1xf32> to vector<16x32xf32>
    %135 = arith.subf %129, %134 : vector<16x32xf32>
    %136 = arith.mulf %135, %135 : vector<16x32xf32>
    %cst_67 = arith.constant dense<0.000000e+00> : vector<16xf32>
    %137 = vector.multi_reduction <add>, %136, %cst_67 [1] : vector<16x32xf32> to vector<16xf32>
    %138 = vector.shape_cast %137 : vector<16xf32> to vector<16x1xf32>
    %cst_68 = arith.constant 3.200000e+01 : f32
    %139 = vector.broadcast %cst_68 : f32 to vector<16x1xf32>
    %140 = arith.divf %138, %139 : vector<16x1xf32>
    %141 = vector.broadcast %133 : vector<16x1xf32> to vector<16x32xf32>
    %142 = arith.subf %129, %141 : vector<16x32xf32>
    %cst_69 = arith.constant 9.99999974E-6 : f32
    %143 = vector.broadcast %cst_69 : f32 to vector<16x1xf32>
    %144 = arith.addf %140, %143 : vector<16x1xf32>
    %145 = math.rsqrt %144 : vector<16x1xf32>
    %146 = vector.broadcast %145 : vector<16x1xf32> to vector<16x32xf32>
    %147 = arith.mulf %142, %146 : vector<16x32xf32>
    %148 = vector.broadcast %120 : vector<1x32xf32> to vector<16x32xf32>
    %149 = arith.mulf %147, %148 : vector<16x32xf32>
    %150 = vector.broadcast %121 : vector<1x32xf32> to vector<16x32xf32>
    %151 = arith.addf %149, %150 : vector<16x32xf32>
    %c232 = arith.constant 232 : index
    %c0_70 = arith.constant 0 : index
    %152 = vector.load %arg3[%c232, %c0_70] : memref<616x32xf32, #tpu.memory_space<vmem>>, vector<32x32xf32>
    %cst_71 = arith.constant dense<0.000000e+00> : vector<16x32xf32>
    %153 = tpu.matmul %151, %152, %cst_71 {dimension_numbers = #tpu.dot_dimension_numbers<[1], [0], [0], [1], [0, 0, 1, 1], [], []>} : vector<16x32xf32>, vector<32x32xf32>, vector<16x32xf32> -> vector<16x32xf32>
    %c13 = arith.constant 13 : index
    %c0_72 = arith.constant 0 : index
    %154 = vector.load %arg4[%c13, %c0_72] : memref<30x32xf32, #tpu.memory_space<vmem>>, vector<1x32xf32>
    %155 = vector.broadcast %154 : vector<1x32xf32> to vector<16x32xf32>
    %156 = arith.addf %153, %155 : vector<16x32xf32>
    %c264 = arith.constant 264 : index
    %c0_73 = arith.constant 0 : index
    %157 = vector.load %arg3[%c264, %c0_73] : memref<616x32xf32, #tpu.memory_space<vmem>>, vector<32x32xf32>
    %cst_74 = arith.constant dense<0.000000e+00> : vector<16x32xf32>
    %158 = tpu.matmul %151, %157, %cst_74 {dimension_numbers = #tpu.dot_dimension_numbers<[1], [0], [0], [1], [0, 0, 1, 1], [], []>} : vector<16x32xf32>, vector<32x32xf32>, vector<16x32xf32> -> vector<16x32xf32>
    %c14 = arith.constant 14 : index
    %c0_75 = arith.constant 0 : index
    %159 = vector.load %arg4[%c14, %c0_75] : memref<30x32xf32, #tpu.memory_space<vmem>>, vector<1x32xf32>
    %160 = vector.broadcast %159 : vector<1x32xf32> to vector<16x32xf32>
    %161 = arith.addf %158, %160 : vector<16x32xf32>
    %cst_76 = arith.constant 1.000000e+00 : f32
    %162 = vector.broadcast %cst_76 : f32 to vector<16x32xf32>
    %163 = arith.addf %162, %161 : vector<16x32xf32>
    %164 = arith.mulf %156, %156 : vector<16x32xf32>
    %165 = arith.subf %163, %164 : vector<16x32xf32>
    %166 = math.exp %161 : vector<16x32xf32>
    %167 = arith.subf %165, %166 : vector<16x32xf32>
    %cst_77 = arith.constant -5.000000e-01 : f32
    %168 = vector.broadcast %cst_77 : f32 to vector<16x32xf32>
    %169 = arith.mulf %168, %167 : vector<16x32xf32>
    %170 = vector.shape_cast %169 : vector<16x32xf32> to vector<1x16x32xf32>
    %cst_78 = arith.constant dense<0.000000e+00> : vector<1xf32>
    %171 = vector.multi_reduction <add>, %170, %cst_78 [1, 2] : vector<1x16x32xf32> to vector<1xf32>
    %172 = vector.shape_cast %171 : vector<1xf32> to vector<1x1x1xf32>
    %173 = vector.extract %172[0, 0, 0] : f32 from vector<1x1x1xf32>
    %174 = vector.broadcast %173 : f32 to vector<1x1x128xf32>
    %c0_79 = arith.constant 0 : index
    %c0_80 = arith.constant 0 : index
    %c0_81 = arith.constant 0 : index
    %175 = vector.load %arg6[%c0_79, %c0_80, %c0_81] : memref<1x1x128xf32, #tpu.memory_space<vmem>>, vector<1x1x128xf32>
    tpu.vector_store %arg6[%c0_79, %c0_80, %c0_81], %174 {strides = array<i32>} : memref<1x1x128xf32, #tpu.memory_space<vmem>>, vector<1x1x128xf32>,
    %c296 = arith.constant 296 : index
    %c0_82 = arith.constant 0 : index
    %176 = vector.load %arg3[%c296, %c0_82] : memref<616x32xf32, #tpu.memory_space<vmem>>, vector<32x32xf32>
    %c15 = arith.constant 15 : index
    %c0_83 = arith.constant 0 : index
    %177 = vector.load %arg4[%c15, %c0_83] : memref<30x32xf32, #tpu.memory_space<vmem>>, vector<1x32xf32>
    %c328 = arith.constant 328 : index
    %c0_84 = arith.constant 0 : index
    %178 = vector.load %arg3[%c328, %c0_84] : memref<616x32xf32, #tpu.memory_space<vmem>>, vector<32x32xf32>
    %c16 = arith.constant 16 : index
    %c0_85 = arith.constant 0 : index
    %179 = vector.load %arg4[%c16, %c0_85] : memref<30x32xf32, #tpu.memory_space<vmem>>, vector<1x32xf32>
    %c17 = arith.constant 17 : index
    %c0_86 = arith.constant 0 : index
    %180 = vector.load %arg4[%c17, %c0_86] : memref<30x32xf32, #tpu.memory_space<vmem>>, vector<1x32xf32>
    %c18 = arith.constant 18 : index
    %c0_87 = arith.constant 0 : index
    %181 = vector.load %arg4[%c18, %c0_87] : memref<30x32xf32, #tpu.memory_space<vmem>>, vector<1x32xf32>
    %cst_88 = arith.constant dense<0.000000e+00> : vector<16x32xf32>
    %182 = tpu.matmul %156, %176, %cst_88 {dimension_numbers = #tpu.dot_dimension_numbers<[1], [0], [0], [1], [0, 0, 1, 1], [], []>} : vector<16x32xf32>, vector<32x32xf32>, vector<16x32xf32> -> vector<16x32xf32>
    %183 = vector.broadcast %177 : vector<1x32xf32> to vector<16x32xf32>
    %184 = arith.addf %182, %183 : vector<16x32xf32>
    %cst_89 = arith.constant 0.000000e+00 : f32
    %185 = vector.broadcast %cst_89 : f32 to vector<16x32xf32>
    %186 = arith.maximumf %184, %185 : vector<16x32xf32>
    %cst_90 = arith.constant dense<0.000000e+00> : vector<16x32xf32>
    %187 = tpu.matmul %186, %178, %cst_90 {dimension_numbers = #tpu.dot_dimension_numbers<[1], [0], [0], [1], [0, 0, 1, 1], [], []>} : vector<16x32xf32>, vector<32x32xf32>, vector<16x32xf32> -> vector<16x32xf32>
    %188 = vector.broadcast %179 : vector<1x32xf32> to vector<16x32xf32>
    %189 = arith.addf %187, %188 : vector<16x32xf32>
    %cst_91 = arith.constant dense<0.000000e+00> : vector<16xf32>
    %190 = vector.multi_reduction <add>, %189, %cst_91 [1] : vector<16x32xf32> to vector<16xf32>
    %191 = vector.shape_cast %190 : vector<16xf32> to vector<16x1xf32>
    %cst_92 = arith.constant 3.200000e+01 : f32
    %192 = vector.broadcast %cst_92 : f32 to vector<16x1xf32>
    %193 = arith.divf %191, %192 : vector<16x1xf32>
    %194 = vector.broadcast %193 : vector<16x1xf32> to vector<16x32xf32>
    %195 = arith.subf %189, %194 : vector<16x32xf32>
    %196 = arith.mulf %195, %195 : vector<16x32xf32>
    %cst_93 = arith.constant dense<0.000000e+00> : vector<16xf32>
    %197 = vector.multi_reduction <add>, %196, %cst_93 [1] : vector<16x32xf32> to vector<16xf32>
    %198 = vector.shape_cast %197 : vector<16xf32> to vector<16x1xf32>
    %cst_94 = arith.constant 3.200000e+01 : f32
    %199 = vector.broadcast %cst_94 : f32 to vector<16x1xf32>
    %200 = arith.divf %198, %199 : vector<16x1xf32>
    %201 = vector.broadcast %193 : vector<16x1xf32> to vector<16x32xf32>
    %202 = arith.subf %189, %201 : vector<16x32xf32>
    %cst_95 = arith.constant 9.99999974E-6 : f32
    %203 = vector.broadcast %cst_95 : f32 to vector<16x1xf32>
    %204 = arith.addf %200, %203 : vector<16x1xf32>
    %205 = math.rsqrt %204 : vector<16x1xf32>
    %206 = vector.broadcast %205 : vector<16x1xf32> to vector<16x32xf32>
    %207 = arith.mulf %202, %206 : vector<16x32xf32>
    %208 = vector.broadcast %180 : vector<1x32xf32> to vector<16x32xf32>
    %209 = arith.mulf %207, %208 : vector<16x32xf32>
    %210 = vector.broadcast %181 : vector<1x32xf32> to vector<16x32xf32>
    %211 = arith.addf %209, %210 : vector<16x32xf32>
    %c488 = arith.constant 488 : index
    %c0_96 = arith.constant 0 : index
    %212 = vector.load %arg3[%c488, %c0_96] : memref<616x32xf32, #tpu.memory_space<vmem>>, vector<32x32xf32>
    %c520 = arith.constant 520 : index
    %c0_97 = arith.constant 0 : index
    %213 = vector.load %arg3[%c520, %c0_97] : memref<616x32xf32, #tpu.memory_space<vmem>>, vector<32x32xf32>
    %c25 = arith.constant 25 : index
    %c0_98 = arith.constant 0 : index
    %214 = vector.load %arg4[%c25, %c0_98] : memref<30x32xf32, #tpu.memory_space<vmem>>, vector<1x32xf32>
    %c26 = arith.constant 26 : index
    %c0_99 = arith.constant 0 : index
    %215 = vector.load %arg4[%c26, %c0_99] : memref<30x32xf32, #tpu.memory_space<vmem>>, vector<1x32xf32>
    %c27 = arith.constant 27 : index
    %c0_100 = arith.constant 0 : index
    %216 = vector.load %arg4[%c27, %c0_100] : memref<30x32xf32, #tpu.memory_space<vmem>>, vector<1x32xf32>
    %cst_101 = arith.constant dense<0.000000e+00> : vector<16x32xf32>
    %217 = tpu.matmul %4, %211, %cst_101 {dimension_numbers = #tpu.dot_dimension_numbers<[1], [0], [0], [1], [0, 0, 1, 1], [], []>} : vector<16x16xf32>, vector<16x32xf32>, vector<16x32xf32> -> vector<16x32xf32>
    %cst_102 = arith.constant dense<0.000000e+00> : vector<16x32xf32>
    %218 = tpu.matmul %217, %212, %cst_102 {dimension_numbers = #tpu.dot_dimension_numbers<[1], [0], [0], [1], [0, 0, 1, 1], [], []>} : vector<16x32xf32>, vector<32x32xf32>, vector<16x32xf32> -> vector<16x32xf32>
    %cst_103 = arith.constant dense<0.000000e+00> : vector<16x32xf32>
    %219 = tpu.matmul %211, %213, %cst_103 {dimension_numbers = #tpu.dot_dimension_numbers<[1], [0], [0], [1], [0, 0, 1, 1], [], []>} : vector<16x32xf32>, vector<32x32xf32>, vector<16x32xf32> -> vector<16x32xf32>
    %220 = arith.addf %218, %219 : vector<16x32xf32>
    %221 = vector.broadcast %214 : vector<1x32xf32> to vector<16x32xf32>
    %222 = arith.addf %220, %221 : vector<16x32xf32>
    %cst_104 = arith.constant 0.000000e+00 : f32
    %223 = vector.broadcast %cst_104 : f32 to vector<16x32xf32>
    %224 = arith.maximumf %222, %223 : vector<16x32xf32>
    %cst_105 = arith.constant dense<0.000000e+00> : vector<16xf32>
    %225 = vector.multi_reduction <add>, %224, %cst_105 [1] : vector<16x32xf32> to vector<16xf32>
    %226 = vector.shape_cast %225 : vector<16xf32> to vector<16x1xf32>
    %cst_106 = arith.constant 3.200000e+01 : f32
    %227 = vector.broadcast %cst_106 : f32 to vector<16x1xf32>
    %228 = arith.divf %226, %227 : vector<16x1xf32>
    %229 = vector.broadcast %228 : vector<16x1xf32> to vector<16x32xf32>
    %230 = arith.subf %224, %229 : vector<16x32xf32>
    %231 = arith.mulf %230, %230 : vector<16x32xf32>
    %cst_107 = arith.constant dense<0.000000e+00> : vector<16xf32>
    %232 = vector.multi_reduction <add>, %231, %cst_107 [1] : vector<16x32xf32> to vector<16xf32>
    %233 = vector.shape_cast %232 : vector<16xf32> to vector<16x1xf32>
    %cst_108 = arith.constant 3.200000e+01 : f32
    %234 = vector.broadcast %cst_108 : f32 to vector<16x1xf32>
    %235 = arith.divf %233, %234 : vector<16x1xf32>
    %236 = vector.broadcast %228 : vector<16x1xf32> to vector<16x32xf32>
    %237 = arith.subf %224, %236 : vector<16x32xf32>
    %cst_109 = arith.constant 9.99999974E-6 : f32
    %238 = vector.broadcast %cst_109 : f32 to vector<16x1xf32>
    %239 = arith.addf %235, %238 : vector<16x1xf32>
    %240 = math.rsqrt %239 : vector<16x1xf32>
    %241 = vector.broadcast %240 : vector<16x1xf32> to vector<16x32xf32>
    %242 = arith.mulf %237, %241 : vector<16x32xf32>
    %243 = vector.broadcast %215 : vector<1x32xf32> to vector<16x32xf32>
    %244 = arith.mulf %242, %243 : vector<16x32xf32>
    %245 = vector.broadcast %216 : vector<1x32xf32> to vector<16x32xf32>
    %246 = arith.addf %244, %245 : vector<16x32xf32>
    %cst_110 = arith.constant dense<0.000000e+00> : vector<32x32xf32>
    %247 = tpu.matmul %8, %246, %cst_110 {dimension_numbers = #tpu.dot_dimension_numbers<[1], [0], [0], [1], [0, 0, 1, 1], [], []>} : vector<32x16xf32>, vector<16x32xf32>, vector<32x32xf32> -> vector<32x32xf32>
    %c424 = arith.constant 424 : index
    %c0_111 = arith.constant 0 : index
    %248 = vector.load %arg3[%c424, %c0_111] : memref<616x32xf32, #tpu.memory_space<vmem>>, vector<32x32xf32>
    %c456 = arith.constant 456 : index
    %c0_112 = arith.constant 0 : index
    %249 = vector.load %arg3[%c456, %c0_112] : memref<616x32xf32, #tpu.memory_space<vmem>>, vector<32x32xf32>
    %c22 = arith.constant 22 : index
    %c0_113 = arith.constant 0 : index
    %250 = vector.load %arg4[%c22, %c0_113] : memref<30x32xf32, #tpu.memory_space<vmem>>, vector<1x32xf32>
    %c23 = arith.constant 23 : index
    %c0_114 = arith.constant 0 : index
    %251 = vector.load %arg4[%c23, %c0_114] : memref<30x32xf32, #tpu.memory_space<vmem>>, vector<1x32xf32>
    %c24 = arith.constant 24 : index
    %c0_115 = arith.constant 0 : index
    %252 = vector.load %arg4[%c24, %c0_115] : memref<30x32xf32, #tpu.memory_space<vmem>>, vector<1x32xf32>
    %cst_116 = arith.constant dense<0.000000e+00> : vector<32x32xf32>
    %253 = tpu.matmul %3, %247, %cst_116 {dimension_numbers = #tpu.dot_dimension_numbers<[1], [0], [0], [1], [0, 0, 1, 1], [], []>} : vector<32x32xf32>, vector<32x32xf32>, vector<32x32xf32> -> vector<32x32xf32>
    %cst_117 = arith.constant dense<0.000000e+00> : vector<32x32xf32>
    %254 = tpu.matmul %253, %248, %cst_117 {dimension_numbers = #tpu.dot_dimension_numbers<[1], [0], [0], [1], [0, 0, 1, 1], [], []>} : vector<32x32xf32>, vector<32x32xf32>, vector<32x32xf32> -> vector<32x32xf32>
    %cst_118 = arith.constant dense<0.000000e+00> : vector<32x32xf32>
    %255 = tpu.matmul %247, %249, %cst_118 {dimension_numbers = #tpu.dot_dimension_numbers<[1], [0], [0], [1], [0, 0, 1, 1], [], []>} : vector<32x32xf32>, vector<32x32xf32>, vector<32x32xf32> -> vector<32x32xf32>
    %256 = arith.addf %254, %255 : vector<32x32xf32>
    %257 = vector.broadcast %250 : vector<1x32xf32> to vector<32x32xf32>
    %258 = arith.addf %256, %257 : vector<32x32xf32>
    %cst_119 = arith.constant 0.000000e+00 : f32
    %259 = vector.broadcast %cst_119 : f32 to vector<32x32xf32>
    %260 = arith.maximumf %258, %259 : vector<32x32xf32>
    %cst_120 = arith.constant dense<0.000000e+00> : vector<32xf32>
    %261 = vector.multi_reduction <add>, %260, %cst_120 [1] : vector<32x32xf32> to vector<32xf32>
    %262 = vector.shape_cast %261 : vector<32xf32> to vector<32x1xf32>
    %cst_121 = arith.constant 3.200000e+01 : f32
    %263 = vector.broadcast %cst_121 : f32 to vector<32x1xf32>
    %264 = arith.divf %262, %263 : vector<32x1xf32>
    %265 = vector.broadcast %264 : vector<32x1xf32> to vector<32x32xf32>
    %266 = arith.subf %260, %265 : vector<32x32xf32>
    %267 = arith.mulf %266, %266 : vector<32x32xf32>
    %cst_122 = arith.constant dense<0.000000e+00> : vector<32xf32>
    %268 = vector.multi_reduction <add>, %267, %cst_122 [1] : vector<32x32xf32> to vector<32xf32>
    %269 = vector.shape_cast %268 : vector<32xf32> to vector<32x1xf32>
    %cst_123 = arith.constant 3.200000e+01 : f32
    %270 = vector.broadcast %cst_123 : f32 to vector<32x1xf32>
    %271 = arith.divf %269, %270 : vector<32x1xf32>
    %272 = vector.broadcast %264 : vector<32x1xf32> to vector<32x32xf32>
    %273 = arith.subf %260, %272 : vector<32x32xf32>
    %cst_124 = arith.constant 9.99999974E-6 : f32
    %274 = vector.broadcast %cst_124 : f32 to vector<32x1xf32>
    %275 = arith.addf %271, %274 : vector<32x1xf32>
    %276 = math.rsqrt %275 : vector<32x1xf32>
    %277 = vector.broadcast %276 : vector<32x1xf32> to vector<32x32xf32>
    %278 = arith.mulf %273, %277 : vector<32x32xf32>
    %279 = vector.broadcast %251 : vector<1x32xf32> to vector<32x32xf32>
    %280 = arith.mulf %278, %279 : vector<32x32xf32>
    %281 = vector.broadcast %252 : vector<1x32xf32> to vector<32x32xf32>
    %282 = arith.addf %280, %281 : vector<32x32xf32>
    %cst_125 = arith.constant dense<0.000000e+00> : vector<64x32xf32>
    %283 = tpu.matmul %7, %282, %cst_125 {dimension_numbers = #tpu.dot_dimension_numbers<[1], [0], [0], [1], [0, 0, 1, 1], [], []>} : vector<64x32xf32>, vector<32x32xf32>, vector<64x32xf32> -> vector<64x32xf32>
    %c360 = arith.constant 360 : index
    %c0_126 = arith.constant 0 : index
    %284 = vector.load %arg3[%c360, %c0_126] : memref<616x32xf32, #tpu.memory_space<vmem>>, vector<32x32xf32>
    %c392 = arith.constant 392 : index
    %c0_127 = arith.constant 0 : index
    %285 = vector.load %arg3[%c392, %c0_127] : memref<616x32xf32, #tpu.memory_space<vmem>>, vector<32x32xf32>
    %c19 = arith.constant 19 : index
    %c0_128 = arith.constant 0 : index
    %286 = vector.load %arg4[%c19, %c0_128] : memref<30x32xf32, #tpu.memory_space<vmem>>, vector<1x32xf32>
    %c20 = arith.constant 20 : index
    %c0_129 = arith.constant 0 : index
    %287 = vector.load %arg4[%c20, %c0_129] : memref<30x32xf32, #tpu.memory_space<vmem>>, vector<1x32xf32>
    %c21 = arith.constant 21 : index
    %c0_130 = arith.constant 0 : index
    %288 = vector.load %arg4[%c21, %c0_130] : memref<30x32xf32, #tpu.memory_space<vmem>>, vector<1x32xf32>
    %cst_131 = arith.constant dense<0.000000e+00> : vector<64x32xf32>
    %289 = tpu.matmul %2, %283, %cst_131 {dimension_numbers = #tpu.dot_dimension_numbers<[1], [0], [0], [1], [0, 0, 1, 1], [], []>} : vector<64x64xf32>, vector<64x32xf32>, vector<64x32xf32> -> vector<64x32xf32>
    %cst_132 = arith.constant dense<0.000000e+00> : vector<64x32xf32>
    %290 = tpu.matmul %289, %284, %cst_132 {dimension_numbers = #tpu.dot_dimension_numbers<[1], [0], [0], [1], [0, 0, 1, 1], [], []>} : vector<64x32xf32>, vector<32x32xf32>, vector<64x32xf32> -> vector<64x32xf32>
    %cst_133 = arith.constant dense<0.000000e+00> : vector<64x32xf32>
    %291 = tpu.matmul %283, %285, %cst_133 {dimension_numbers = #tpu.dot_dimension_numbers<[1], [0], [0], [1], [0, 0, 1, 1], [], []>} : vector<64x32xf32>, vector<32x32xf32>, vector<64x32xf32> -> vector<64x32xf32>
    %292 = arith.addf %290, %291 : vector<64x32xf32>
    %293 = vector.broadcast %286 : vector<1x32xf32> to vector<64x32xf32>
    %294 = arith.addf %292, %293 : vector<64x32xf32>
    %cst_134 = arith.constant 0.000000e+00 : f32
    %295 = vector.broadcast %cst_134 : f32 to vector<64x32xf32>
    %296 = arith.maximumf %294, %295 : vector<64x32xf32>
    %cst_135 = arith.constant dense<0.000000e+00> : vector<64xf32>
    %297 = vector.multi_reduction <add>, %296, %cst_135 [1] : vector<64x32xf32> to vector<64xf32>
    %298 = vector.shape_cast %297 : vector<64xf32> to vector<64x1xf32>
    %cst_136 = arith.constant 3.200000e+01 : f32
    %299 = vector.broadcast %cst_136 : f32 to vector<64x1xf32>
    %300 = arith.divf %298, %299 : vector<64x1xf32>
    %301 = vector.broadcast %300 : vector<64x1xf32> to vector<64x32xf32>
    %302 = arith.subf %296, %301 : vector<64x32xf32>
    %303 = arith.mulf %302, %302 : vector<64x32xf32>
    %cst_137 = arith.constant dense<0.000000e+00> : vector<64xf32>
    %304 = vector.multi_reduction <add>, %303, %cst_137 [1] : vector<64x32xf32> to vector<64xf32>
    %305 = vector.shape_cast %304 : vector<64xf32> to vector<64x1xf32>
    %cst_138 = arith.constant 3.200000e+01 : f32
    %306 = vector.broadcast %cst_138 : f32 to vector<64x1xf32>
    %307 = arith.divf %305, %306 : vector<64x1xf32>
    %308 = vector.broadcast %300 : vector<64x1xf32> to vector<64x32xf32>
    %309 = arith.subf %296, %308 : vector<64x32xf32>
    %cst_139 = arith.constant 9.99999974E-6 : f32
    %310 = vector.broadcast %cst_139 : f32 to vector<64x1xf32>
    %311 = arith.addf %307, %310 : vector<64x1xf32>
    %312 = math.rsqrt %311 : vector<64x1xf32>
    %313 = vector.broadcast %312 : vector<64x1xf32> to vector<64x32xf32>
    %314 = arith.mulf %309, %313 : vector<64x32xf32>
    %315 = vector.broadcast %287 : vector<1x32xf32> to vector<64x32xf32>
    %316 = arith.mulf %314, %315 : vector<64x32xf32>
    %317 = vector.broadcast %288 : vector<1x32xf32> to vector<64x32xf32>
    %318 = arith.addf %316, %317 : vector<64x32xf32>
    %c552 = arith.constant 552 : index
    %c0_140 = arith.constant 0 : index
    %319 = vector.load %arg3[%c552, %c0_140] : memref<616x32xf32, #tpu.memory_space<vmem>>, vector<32x32xf32>
    %cst_141 = arith.constant dense<0.000000e+00> : vector<64x32xf32>
    %320 = tpu.matmul %318, %319, %cst_141 {dimension_numbers = #tpu.dot_dimension_numbers<[1], [0], [0], [1], [0, 0, 1, 1], [], []>} : vector<64x32xf32>, vector<32x32xf32>, vector<64x32xf32> -> vector<64x32xf32>
    %c28 = arith.constant 28 : index
    %c0_142 = arith.constant 0 : index
    %321 = vector.load %arg4[%c28, %c0_142] : memref<30x32xf32, #tpu.memory_space<vmem>>, vector<1x32xf32>
    %322 = vector.broadcast %321 : vector<1x32xf32> to vector<64x32xf32>
    %323 = arith.addf %320, %322 : vector<64x32xf32>
    %cst_143 = arith.constant 0.000000e+00 : f32
    %324 = vector.broadcast %cst_143 : f32 to vector<64x32xf32>
    %325 = arith.maximumf %323, %324 : vector<64x32xf32>
    %c584 = arith.constant 584 : index
    %c0_144 = arith.constant 0 : index
    %326 = vector.load %arg3[%c584, %c0_144] : memref<616x32xf32, #tpu.memory_space<vmem>>, vector<32x32xf32>
    %cst_145 = arith.constant dense<0.000000e+00> : vector<64x32xf32>
    %327 = tpu.matmul %325, %326, %cst_145 {dimension_numbers = #tpu.dot_dimension_numbers<[1], [0], [0], [1], [0, 0, 1, 1], [], []>} : vector<64x32xf32>, vector<32x32xf32>, vector<64x32xf32> -> vector<64x32xf32>
    %c29 = arith.constant 29 : index
    %c0_146 = arith.constant 0 : index
    %328 = vector.load %arg4[%c29, %c0_146] : memref<30x32xf32, #tpu.memory_space<vmem>>, vector<1x32xf32>
    %329 = vector.broadcast %328 : vector<1x32xf32> to vector<64x32xf32>
    %330 = arith.addf %327, %329 : vector<64x32xf32>
    %c0_147 = arith.constant 0 : index
    %c0_148 = arith.constant 0 : index
    %c0_149 = arith.constant 0 : index
    %331 = vector.load %arg5[%c0_147, %c0_148, %c0_149] : memref<1x64x32xf32, #tpu.memory_space<vmem>>, vector<1x64x32xf32>
    %332 = vector.shape_cast %331 : vector<1x64x32xf32> to vector<64x32xf32>
    %333 = vector.shape_cast %330 : vector<64x32xf32> to vector<1x64x32xf32>
    tpu.vector_store %arg5[%c0_147, %c0_148, %c0_149], %333 {strides = array<i32>} : memref<1x64x32xf32, #tpu.memory_space<vmem>>, vector<1x64x32xf32>,
    return
  }
  func.func @transform_0(%arg0: i32) -> (i32, i32, i32) {
    %c0_i32 = arith.constant 0 : i32
    %c0_i32_0 = arith.constant 0 : i32
    %c0_i32_1 = arith.constant 0 : i32
    return %arg0, %c0_i32, %c0_i32_0 : i32, i32, i32
  }
  func.func @transform_1(%arg0: i32) -> (i32, i32) {
    %c0_i32 = arith.constant 0 : i32
    %c0_i32_0 = arith.constant 0 : i32
    %c0_i32_1 = arith.constant 0 : i32
    return %c0_i32, %c0_i32_0 : i32, i32
  }
  func.func @transform_2(%arg0: i32) -> (i32, i32) {
    %c0_i32 = arith.constant 0 : i32
    %c0_i32_0 = arith.constant 0 : i32
    %c0_i32_1 = arith.constant 0 : i32
    return %c0_i32, %c0_i32_0 : i32, i32
  }
  func.func @transform_3(%arg0: i32) -> (i32, i32) {
    %c0_i32 = arith.constant 0 : i32
    %c0_i32_0 = arith.constant 0 : i32
    %c0_i32_1 = arith.constant 0 : i32
    return %c0_i32, %c0_i32_0 : i32, i32
  }
  func.func @transform_4(%arg0: i32) -> (i32, i32, i32) {
    %c0_i32 = arith.constant 0 : i32
    %c0_i32_0 = arith.constant 0 : i32
    %c0_i32_1 = arith.constant 0 : i32
    return %arg0, %c0_i32, %c0_i32_0 : i32, i32, i32
  }
  func.func @transform_5(%arg0: i32) -> (i32, i32, i32) {
    %c0_i32 = arith.constant 0 : i32
    %c0_i32_0 = arith.constant 0 : i32
    %c0_i32_1 = arith.constant 0 : i32
    return %arg0, %c0_i32, %c0_i32_0 : i32, i32, i32
  }
}

</mosaic_0001>

<bundles_post_ra>
// kernel: msae_forward.1
= control target key start
LH: loop header
LB: loop body
LE: loop exit
PB: predicated region body
PF: predicated region fallthrough
CT: control target
= control target key end

     0   :  { %s3171_s18 = smov 0   ;;  %s4330_s0 = inlined_call_operand.vmem [shape: f32[4,64,8], index: 0, kind: input, shape index: {}]   ;;  %s4331_s1 = inlined_call_operand.vmem [shape: f32[256,64], index: 1, kind: input, shape index: {}]   ;;  %s4332_s2 = inlined_call_operand.vmem [shape: f32[616,32], index: 2, kind: input, shape index: {}]   ;;  %s4333_s3 = inlined_call_operand.vmem [shape: f32[30,32], index: 3, kind: input, shape index: {}]   ;;  %s4334_s4 = inlined_call_operand.vmem [shape: f32[4,64,32], index: 4, kind: output, shape index: {0}]   ;;  %s4335_s5 = inlined_call_operand.vmem [shape: f32[4,1,128], index: 5, kind: output, shape index: {1}]  }
   0x1 LB: > { %s2838_s19 = sadd.s32 4294967295, %s3138_s18   ;;  %p2842_p0 = scmp.ge.s32.totalorder %s3138_s18, 1  ;;  %s3138_s18 = sphi %s3171_s18, %s16_s18  }
   0x2   : > { %p190_p1 = scmp.lt.s32.totalorder %s3138_s18, 5 }
   0x4   : > { %p191_p2 = pnand %p2842_p0, %p190_p1 }
   0x5   : > { %p221_p3 = scmp.lt.s32.totalorder (!%p191_p2), %s2838_s19, 3 }
   0x6   : > { %194 = sbr.rel (%p191_p2) target bundleno = 5711 (0x164f), region = 36 }
   0xb   : > { %v274_v0 = vld [vmem:[%s4332_s2] sm:$0xff]  ;;  %s4353_s19 = smov (!%p221_p3, %s2838_s19), 3  ;;  %vm284_vm0 = vcmask 64512   ;;  %v278_v10 = vld [vmem:[%s4332_s2 + $0x18] sm:$0xff]  ;;  %v277_v11 = vld [vmem:[%s4332_s2 + $0x10] sm:$0xff]  ;;  %vm359_vm1 = vcmask 261120  }
   0xc   : > { %324 = vmatpush.msra.mxu0 %v274_v0  ;;  %s2991_s22 = sshll.u32 %s4353_s19, 6  ;;  %v279_v5 = vld [vmem:[%s4332_s2 + $0x20] sm:$0xff]  ;;  %v276_v12 = vld [vmem:[%s4332_s2 + $0x8] sm:$0xff]  ;;  %v3140_v63 = vmov 32.0   ;;  %s233_s21 = scalar_lea.vmem %s4335_s5, %s4353_s19 }
   0xd   : > { %s225_s25 = scalar_lea.vmem %s4330_s0, %s2991_s22  ;;  %396 = vmatpush.msra.mxu1 %v279_v5  ;;  %v3012_v13 = vld [vmem:[%s4333_s3] ss:$0 sm:$0xff]  ;;  %v3013_v41 = vld [vmem:[%s4333_s3 + $0x1] ss:$0 sm:$0xff]  ;;  %3042 = vrcp.f32 %v3140_v63  ;;  %s230_s13 = scalar_lea.vmem %s4334_s4, %s2991_s22 }
   0xe   : > { %v234_v1 = vld [vmem:[%s225_s25] sm:$0xff]  ;;  %v235_v2 = vld [vmem:[%s225_s25 + $0x8] sm:$0xff]  ;;  %v236_v3 = vld [vmem:[%s225_s25 + $0x10] sm:$0xff] }
   0xf   : > { %2847 = vmatmul.msk.f32.vlgmr.msra.gmra.mxu0 %vm284_vm0, %v234_v1  ;;  %v237_v4 = vld [vmem:[%s225_s25 + $0x18] sm:$0xff]  ;;  %v238_v6 = vld [vmem:[%s225_s25 + $0x20] sm:$0xff]  ;;  %v239_v7 = vld [vmem:[%s225_s25 + $0x28] sm:$0xff]  ;;  %397 = vmatpush.msra.mxu1 %v278_v10 }
  0x10   : > { %v240_v8 = vld [vmem:[%s225_s25 + $0x30] sm:$0xff]  ;;  %v241_v9 = vld [vmem:[%s225_s25 + $0x38] sm:$0xff] }
  0x11   : > { %398 = vmatpush.msra.mxu1 %v277_v11 }
  0x13   : > { %399 = vmatpush.msra.mxu1 %v276_v12  ;;  %v3043_v0 = vpop.eup %3042 }
  0x14   : > { %v450_v1 = vmul.f32 32.0, %v3043_v0  ;;  %vm454_vm2 = vweird.f32 %v3043_v0 }
  0x17   : > { %2848 = vmatmul.msk.f32.gmra.mxu0 %vm284_vm0, %v235_v2  ;;  %v451_v2 = vsub.f32 1.0, %v450_v1 }
  0x1f   : > { %2849 = vmatmul.msk.f32.gmra.mxu0 %vm284_vm0, %v236_v3 }
  0x27   : > { %2850 = vmatmul.msk.f32.gmra.mxu0 %vm284_vm0, %v237_v4  ;;  %v452_v4 = vmul.f32 %v3043_v0, %v451_v2 }
  0x29   : > { %v453_v5 = vadd.f32 %v3043_v0, %v452_v4 }
  0x2f   : > { %2851 = vmatmul.msk.f32.gmra.mxu0 %vm284_vm0, %v238_v6  ;;  %v3235_v6 = vsel %vm454_vm2, %v3043_v0, %v453_v5 }
  0x37   : > { %2852 = vmatmul.msk.f32.gmra.mxu0 %vm284_vm0, %v239_v7 }
  0x3f   : > { %2853 = vmatmul.msk.f32.gmra.mxu0 %vm284_vm0, %v240_v8 }
  0x47   : > { %2854 = vmatmul.msk.f32.gmra.mxu0 %vm284_vm0, %v241_v9 }
  0x8c   : > { %v326_v14 = vpop.f32.mrf.mxu0 }
  0x8d   : > { %v327_v15 = vadd.f32 %v3012_v13, %v326_v14 }
  0x8f   : > { %v350_v16 = vmax.f32 %v327_v15, 0.0 }
  0x91   : > { %2855 = vmatmul.msk.f32.vlgmr.msra.gmra.mxu1 %vm359_vm1, %v350_v16 }
  0x94   : > { %v329_v17 = vpop.f32.mrf.mxu0 }
  0x95   : > { %v330_v18 = vadd.f32 %v3012_v13, %v329_v17 }
  0x97   : > { %v351_v19 = vmax.f32 %v330_v18, 0.0 }
  0x99   : > { %2856 = vmatmul.msk.f32.gmra.mxu1 %vm359_vm1, %v351_v19 }
  0x9c   : > { %v332_v20 = vpop.f32.mrf.mxu0 }
  0x9d   : > { %v333_v21 = vadd.f32 %v3012_v13, %v332_v20 }
  0x9f   : > { %v352_v22 = vmax.f32 %v333_v21, 0.0 }
  0xa1   : > { %2857 = vmatmul.msk.f32.gmra.mxu1 %vm359_vm1, %v352_v22 }
  0xa4   : > { %v335_v23 = vpop.f32.mrf.mxu0 }
  0xa5   : > { %v336_v24 = vadd.f32 %v3012_v13, %v335_v23 }
  0xa7   : > { %v353_v25 = vmax.f32 %v336_v24, 0.0 }
  0xa9   : > { %2858 = vmatmul.msk.f32.gmra.mxu1 %vm359_vm1, %v353_v25 }
  0xac   : > { %v338_v26 = vpop.f32.mrf.mxu0 }
  0xad   : > { %v339_v27 = vadd.f32 %v3012_v13, %v338_v26 }
  0xaf   : > { %v354_v28 = vmax.f32 %v339_v27, 0.0 }
  0xb1   : > { %2859 = vmatmul.msk.f32.gmra.mxu1 %vm359_vm1, %v354_v28 }
  0xb4   : > { %v341_v29 = vpop.f32.mrf.mxu0 }
  0xb5   : > { %v342_v30 = vadd.f32 %v3012_v13, %v341_v29 }
  0xb7   : > { %v355_v31 = vmax.f32 %v342_v30, 0.0 }
  0xb9   : > { %2860 = vmatmul.msk.f32.gmra.mxu1 %vm359_vm1, %v355_v31 }
  0xbc   : > { %v344_v32 = vpop.f32.mrf.mxu0 }
  0xbd   : > { %v345_v33 = vadd.f32 %v3012_v13, %v344_v32 }
  0xbf   : > { %v356_v34 = vmax.f32 %v345_v33, 0.0 }
  0xc1   : > { %2861 = vmatmul.msk.f32.gmra.mxu1 %vm359_vm1, %v356_v34 }
  0xc4   : > { %v347_v35 = vpop.f32.mrf.mxu0 }
  0xc5   : > { %v348_v36 = vadd.f32 %v3012_v13, %v347_v35 }
  0xc7   : > { %v357_v37 = vmax.f32 %v348_v36, 0.0 }
  0xc9   : > { %2862 = vmatmul.msk.f32.gmra.mxu1 %vm359_vm1, %v357_v37 }
 0x10e   : > { %v401_v38 = vpop.f32.mrf.mxu1 }
 0x10f   : > { %v402_v54 = vadd.f32 %v3013_v41, %v401_v38 }
 0x111   : > { %v425_v58 = vsel %vm359_vm1, %v402_v54, 0.0 }
 0x116   : > { %v404_v39 = vpop.f32.mrf.mxu1 }
 0x117   : > { %v405_v61 = vadd.f32 %v3013_v41, %v404_v39 }
 0x119   : > { %v428_v62 = vsel %vm359_vm1, %v405_v61, 0.0 }
 0x11e   : > { %v407_v40 = vpop.f32.mrf.mxu1 }
 0x11f   : > { %v408_v45 = vadd.f32 %v3013_v41, %v407_v40 }
 0x121   : > { %v431_v47 = vsel %vm359_vm1, %v408_v45, 0.0 }
 0x126   : > { %v410_v42 = vpop.f32.mrf.mxu1 }
 0x127   : > { %v3224_v43 = vadd.f32 %v3013_v41, %v410_v42 }
 0x129   : > { %v434_v44 = vsel %vm359_vm1, %v3224_v43, 0.0 }
 0x12a   : > { %435 = vadd.xlane.f32.xlu2 %v434_v44 }
 0x12e   : > { %v413_v46 = vpop.f32.mrf.mxu1 }
 0x12f   : > { %v414_v51 = vadd.f32 %v3013_v41, %v413_v46 }
 0x131   : > { %v437_v53 = vsel %vm359_vm1, %v414_v51, 0.0 }
 0x132   : > { %432 = vadd.xlane.f32.xlu2 %v431_v47 }
 0x136   : > { %v416_v48 = vpop.f32.mrf.mxu1 }
 0x137   : > { %v417_v49 = vadd.f32 %v3013_v41, %v416_v48 }
 0x139   : > { %v440_v50 = vsel %vm359_vm1, %v417_v49, 0.0 }
 0x13a   : > { %441 = vadd.xlane.f32.xlu1 %v440_v50 }
 0x13e   : > { %v419_v52 = vpop.f32.mrf.mxu1 }
 0x13f   : > { %v420_v59 = vadd.f32 %v3013_v41, %v419_v52 }
 0x141   : > { %v443_v60 = vsel %vm359_vm1, %v420_v59, 0.0 }
 0x142   : > { %438 = vadd.xlane.f32.xlu1 %v437_v53 }
 0x146   : > { %v422_v55 = vpop.f32.mrf.mxu1 }
 0x147   : > { %v423_v56 = vadd.f32 %v3013_v41, %v422_v55 }
 0x149   : > { %v446_v57 = vsel %vm359_vm1, %v423_v56, 0.0 }
 0x14a   : > { %447 = vadd.xlane.f32.xlu0 %v446_v57  ;;  %426 = vadd.xlane.f32.xlu1 %v425_v58 }
 0x152   : > { %444 = vadd.xlane.f32.xlu0 %v443_v60 }
 0x15a   : > { %429 = vadd.xlane.f32.xlu0 %v428_v62 }
 0x19d   : > { %v436_v3 = vpop.xlane.xlu2 %435 }
 0x19e   : > { %v459_v27 = vmul.f32 %v3235_v6, %v436_v3 }
 0x1a0   : > { %v3267_v31 = vsub.f32 %v3224_v43, %v459_v27 }
 0x1a2   : > { %v475_v39 = vmul.f32 %v3267_v31, %v3267_v31 }
 0x1a4   : > { %v489_v42 = vsel %vm359_vm1, %v475_v39, 0.0 }
 0x1a5   : > { %v433_v7 = vpop.xlane.xlu2 %432 }
 0x1a6   : > { %v458_v10 = vmul.f32 %v3235_v6, %v433_v7 }
 0x1a8   : > { %v3243_v13 = vsub.f32 %v408_v45, %v458_v10 }
 0x1aa   : > { %v474_v15 = vmul.f32 %v3243_v13, %v3243_v13 }
 0x1ac   : > { %v486_v16 = vsel %vm359_vm1, %v474_v15, 0.0 }
 0x1ad   : > { %v442_v8 = vpop.xlane.xlu1 %441 }
 0x1ae   : > { %v461_v9 = vmul.f32 %v3235_v6, %v442_v8 }
 0x1b0   : > { %v3239_v11 = vsub.f32 %v417_v49, %v461_v9 }
 0x1b2   : > { %v477_v12 = vmul.f32 %v3239_v11, %v3239_v11 }
 0x1b4   : > { %v495_v14 = vsel %vm359_vm1, %v477_v12, 0.0 }
 0x1b5   : > { %496 = vadd.xlane.f32.xlu1 %v495_v14  ;;  %v439_v17 = vpop.xlane.xlu1 %438 }
 0x1b6   : > { %v460_v20 = vmul.f32 %v3235_v6, %v439_v17 }
 0x1b8   : > { %v3255_v23 = vsub.f32 %v414_v51, %v460_v20 }
 0x1ba   : > { %v476_v29 = vmul.f32 %v3255_v23, %v3255_v23 }
 0x1bc   : > { %v492_v32 = vsel %vm359_vm1, %v476_v29, 0.0 }
 0x1bd   : > { %v448_v18 = vpop.xlane.xlu0 %447  ;;  %487 = vadd.xlane.f32.xlu1 %v486_v16  ;;  %v427_v34 = vpop.xlane.xlu1 %426 }
 0x1be   : > { %v463_v19 = vmul.f32 %v3235_v6, %v448_v18  ;;  %v456_v37 = vmul.f32 %v3235_v6, %v427_v34  ;;  %v3321_v34 = vld [vmem:[%s4333_s3 + $0x2] ss:$0 sm:$0xff] }
 0x1c0   : > { %v3251_v21 = vsub.f32 %v423_v56, %v463_v19  ;;  %v3279_v41 = vsub.f32 %v402_v54, %v456_v37 }
 0x1c2   : > { %v479_v22 = vmul.f32 %v3251_v21, %v3251_v21  ;;  %v472_v44 = vmul.f32 %v3279_v41, %v3279_v41 }
 0x1c4   : > { %v501_v24 = vsel %vm359_vm1, %v479_v22, 0.0  ;;  %v480_v45 = vsel %vm359_vm1, %v472_v44, 0.0 }
 0x1c5   : > { %v445_v25 = vpop.xlane.xlu0 %444  ;;  %502 = vadd.xlane.f32.xlu2 %v501_v24 }
 0x1c6   : > { %v462_v26 = vmul.f32 %v3235_v6, %v445_v25 }
 0x1c8   : > { %v3260_v28 = vsub.f32 %v420_v59, %v462_v26 }
 0x1ca   : > { %v478_v30 = vmul.f32 %v3260_v28, %v3260_v28 }
 0x1cc   : > { %v498_v33 = vsel %vm359_vm1, %v478_v30, 0.0 }
 0x1cd   : > { %493 = vadd.xlane.f32.xlu2 %v492_v32  ;;  %499 = vadd.xlane.f32.xlu0 %v498_v33  ;;  %v430_v35 = vpop.xlane.xlu0 %429 }
 0x1ce   : > { %v457_v36 = vmul.f32 %v3235_v6, %v430_v35 }
 0x1d0   : > { %v3273_v38 = vsub.f32 %v405_v61, %v457_v36 }
 0x1d2   : > { %v473_v40 = vmul.f32 %v3273_v38, %v3273_v38 }
 0x1d4   : > { %v483_v43 = vsel %vm359_vm1, %v473_v40, 0.0 }
 0x1d5   : > { %490 = vadd.xlane.f32.xlu0 %v489_v42  ;;  %484 = vadd.xlane.f32.xlu2 %v483_v43  ;;  %v3335_v43 = vld [vmem:[%s4333_s3 + $0x3] ss:$0 sm:$0xff] }
 0x1dd   : > { %481 = vadd.xlane.f32.xlu0 %v480_v45 }
 0x228   : > { %v497_v46 = vpop.xlane.xlu1 %496 }
 0x229   : > { %v509_v47 = vmul.f32 %v497_v46, %v3235_v6 }
 0x22b   : > { %v517_v48 = vadd.f32 1e-05, %v509_v47 }
 0x22d   : > { %3044 = vrsqrt.f32 %v517_v48  ;;  %vm576_vm7 = vweird.f32 %v517_v48 }
 0x230   : > { %v488_v49 = vpop.xlane.xlu1 %487 }
 0x231   : > { %v506_v50 = vmul.f32 %v488_v49, %v3235_v6 }
 0x233   : > { %v3288_v51 = vadd.f32 1e-05, %v506_v50  ;;  %v3291_v54 = vpop.eup %3044 }
 0x234   : > { %v571_v56 = vmul.f32 %v3291_v54, %v517_v48  ;;  %vm577_vm5 = vweird.f32 %v3291_v54 }
 0x235   : > { %3046 = vrsqrt.f32 %v3288_v51  ;;  %vm3323_vm8 = vmor %vm576_vm7, %vm577_vm5  ;;  %vm546_vm0 = vweird.f32 %v3288_v51 }
 0x236   : > { %v572_v59 = vmul.f32 %v3291_v54, %v571_v56 }
 0x238   : > { %v503_v52 = vpop.xlane.xlu2 %502  ;;  %v573_v3 = vmul.f32 0.5, %v572_v59 }
 0x239   : > { %v511_v53 = vmul.f32 %v503_v52, %v3235_v6 }
 0x23a   : > { %v574_v10 = vsub.f32 1.5, %v573_v3 }
 0x23b   : > { %v519_v55 = vadd.f32 1e-05, %v511_v53  ;;  %v3298_v62 = vpop.eup %3046 }
 0x23c   : > { %v541_v4 = vmul.f32 %v3298_v62, %v3288_v51  ;;  %v575_v25 = vmul.f32 %v3291_v54, %v574_v10  ;;  %vm547_vm15 = vweird.f32 %v3298_v62 }
 0x23d   : > { %3048 = vrsqrt.f32 %v519_v55  ;;  %vm596_vm4 = vweird.f32 %v519_v55  ;;  %vm3362_vm2 = vmor %vm546_vm0, %vm547_vm15 }
 0x23e   : > { %v542_v15 = vmul.f32 %v3298_v62, %v541_v4  ;;  %v579_v39 = vsel %vm3323_vm8, %v3291_v54, %v575_v25 }
 0x23f   : > { %v605_v54 = vmul.f32 %v579_v39, %v3239_v11  ;;  %v242_v39 = vld [vmem:[%s4331_s1] sm:$0xff] }
 0x240   : > { %v494_v57 = vpop.xlane.xlu2 %493  ;;  %v500_v58 = vpop.xlane.xlu0 %499  ;;  %v543_v27 = vmul.f32 0.5, %v542_v15 }
 0x241   : > { %v508_v60 = vmul.f32 %v494_v57, %v3235_v6  ;;  %v510_v61 = vmul.f32 %v500_v58, %v3235_v6  ;;  %v614_v3 = vmul.f32 %v3321_v34, %v605_v54  ;;  %v626_v54 = vld [vmem:[%s4332_s2 + $0x28] sm:$0xff] }
 0x242   : > { %v544_v44 = vsub.f32 1.5, %v543_v27 }
 0x243   : > { %v3049_v63 = vpop.eup %3048  ;;  %v516_v0 = vadd.f32 1e-05, %v508_v60  ;;  %v3300_v1 = vadd.f32 1e-05, %v510_v61 }
 0x244   : > { %v591_v2 = vmul.f32 %v3049_v63, %v519_v55  ;;  %vm597_vm3 = vweird.f32 %v3049_v63  ;;  %v545_v59 = vmul.f32 %v3298_v62, %v544_v44  ;;  %v248_v44 = vld [vmem:[%s4331_s1 + $0x30] sm:$0xff] }
 0x245   : > { %3050 = vrsqrt.f32 %v516_v0  ;;  %vm598_vm6 = vmor %vm596_vm4, %vm597_vm3  ;;  %vm566_vm11 = vweird.f32 %v516_v0  ;;  %vm586_vm13 = vweird.f32 %v3300_v1 }
 0x246   : > { %v592_v5 = vmul.f32 %v3049_v63, %v591_v2  ;;  %3052 = vrsqrt.f32 %v3300_v1 }
 0x248   : > { %v593_v7 = vmul.f32 0.5, %v592_v5  ;;  %v485_v8 = vpop.xlane.xlu2 %484  ;;  %v491_v9 = vpop.xlane.xlu0 %490 }
 0x249   : > { %v505_v12 = vmul.f32 %v485_v8, %v3235_v6  ;;  %v507_v14 = vmul.f32 %v491_v9, %v3235_v6 }
 0x24a   : > { %v594_v16 = vsub.f32 1.5, %v593_v7 }
 0x24b   : > { %v3051_v17 = vpop.eup %3050  ;;  %v3308_v18 = vadd.f32 1e-05, %v505_v12  ;;  %v3310_v19 = vadd.f32 1e-05, %v507_v14 }
 0x24c   : > { %v3053_v20 = vpop.eup %3052  ;;  %v595_v22 = vmul.f32 %v3049_v63, %v594_v16  ;;  %v561_v24 = vmul.f32 %v3051_v17, %v516_v0  ;;  %vm567_vm9 = vweird.f32 %v3051_v17 }
 0x24d   : > { %v581_v26 = vmul.f32 %v3053_v20, %v3300_v1  ;;  %3054 = vrsqrt.f32 %v3308_v18  ;;  %vm587_vm10 = vweird.f32 %v3053_v20  ;;  %vm3344_vm12 = vmor %vm566_vm11, %vm567_vm9  ;;  %vm536_vm4 = vweird.f32 %v3308_v18 }
 0x24e   : > { %v599_v29 = vsel %vm598_vm6, %v3049_v63, %v595_v22  ;;  %v562_v30 = vmul.f32 %v3051_v17, %v561_v24  ;;  %3056 = vrsqrt.f32 %v3310_v19  ;;  %vm588_vm14 = vmor %vm586_vm13, %vm587_vm10  ;;  %vm556_vm7 = vweird.f32 %v3310_v19 }
 0x24f   : > { %v582_v32 = vmul.f32 %v3053_v20, %v581_v26  ;;  %v607_v33 = vmul.f32 %v599_v29, %v3251_v21 }
 0x250   : > { %v563_v36 = vmul.f32 0.5, %v562_v30  ;;  %v482_v37 = vpop.xlane.xlu0 %481 }
 0x251   : > { %v583_v40 = vmul.f32 0.5, %v582_v32  ;;  %v504_v42 = vmul.f32 %v482_v37, %v3235_v6  ;;  %v616_v21 = vmul.f32 %v3321_v34, %v607_v33 }
 0x252   : > { %v564_v45 = vsub.f32 1.5, %v563_v36 }
 0x253   : > { %v3055_v46 = vpop.eup %3054  ;;  %v584_v47 = vsub.f32 1.5, %v583_v40  ;;  %v3337_v48 = vadd.f32 1e-05, %v504_v42  ;;  %v3340_v49 = vadd.f32 %v3335_v43, %v616_v21  ;;  %v247_v40 = vld [vmem:[%s4331_s1 + $0x28] sm:$0xff]  ;;  %v631_v42 = vld [vmem:[%s4332_s2 + $0x50] sm:$0xff] }
 0x254   : > { %v3057_v50 = vpop.eup %3056  ;;  %v565_v52 = vmul.f32 %v3051_v17, %v564_v45  ;;  %v531_v53 = vmul.f32 %v3055_v46, %v3308_v18  ;;  %vm537_vm3 = vweird.f32 %v3055_v46  ;;  %v630_v21 = vld [vmem:[%s4332_s2 + $0x48] sm:$0xff]  ;;  %v244_v45 = vld [vmem:[%s4331_s1 + $0x10] sm:$0xff] }
 0x255   : > { %v585_v56 = vmul.f32 %v3053_v20, %v584_v47  ;;  %v551_v57 = vmul.f32 %v3057_v50, %v3310_v19  ;;  %3058 = vrsqrt.f32 %v3337_v48  ;;  %670 = vmatpush.msra.mxu2 %v3340_v49  ;;  %2993 = vmatpush.msra.mxu3 %v3340_v49  ;;  %vm557_vm5 = vweird.f32 %v3057_v50  ;;  %vm3376_vm6 = vmor %vm536_vm4, %vm537_vm3  ;;  %v245_v47 = vld [vmem:[%s4331_s1 + $0x18] sm:$0xff] }
 0x256   : > { %v569_v58 = vsel %vm3344_vm12, %v3051_v17, %v565_v52  ;;  %v532_v11 = vmul.f32 %v3055_v46, %v531_v53  ;;  %vm558_vm8 = vmor %vm556_vm7, %vm557_vm5  ;;  %vm526_vm10 = vweird.f32 %v3337_v48  ;;  %vm637_vm12 = vcmask 523264   ;;  %v628_v52 = vld [vmem:[%s4332_s2 + $0x38] sm:$0xff]  ;;  %v627_v53 = vld [vmem:[%s4332_s2 + $0x30] sm:$0xff] }
 0x257   : > { %v589_v60 = vsel %vm588_vm14, %v3053_v20, %v585_v56  ;;  %v552_v61 = vmul.f32 %v3057_v50, %v551_v57  ;;  %v604_v1 = vmul.f32 %v569_v58, %v3255_v23 }
 0x258   : > { %v533_v63 = vmul.f32 0.5, %v532_v11  ;;  %v606_v0 = vmul.f32 %v589_v60, %v3260_v28  ;;  %v549_v28 = vsel %vm3362_vm2, %v3298_v62, %v545_v59  ;;  %v3382_v62 = vadd.f32 %v3335_v43, %v614_v3 }
 0x259   : > { %v553_v2 = vmul.f32 0.5, %v552_v61  ;;  %v613_v12 = vmul.f32 %v3321_v34, %v604_v1  ;;  %v602_v18 = vmul.f32 %v549_v28, %v3243_v13 }
 0x25a   : > { %v534_v5 = vsub.f32 1.5, %v533_v63  ;;  %v615_v7 = vmul.f32 %v3321_v34, %v606_v0 }
 0x25b   : > { %v3059_v8 = vpop.eup %3058  ;;  %v554_v23 = vsub.f32 1.5, %v553_v2  ;;  %v3392_v19 = vadd.f32 %v3335_v43, %v613_v12  ;;  %v611_v27 = vmul.f32 %v3321_v34, %v602_v18 }
 0x25c   : > { %v535_v51 = vmul.f32 %v3055_v46, %v534_v5  ;;  %v521_v9 = vmul.f32 %v3059_v8, %v3337_v48  ;;  %v3373_v10 = vadd.f32 %v3335_v43, %v615_v7  ;;  %vm527_vm9 = vweird.f32 %v3059_v8  ;;  %v246_v48 = vld [vmem:[%s4331_s1 + $0x20] sm:$0xff] }
 0x25d   : > { %v555_v15 = vmul.f32 %v3057_v50, %v554_v23  ;;  %vm528_vm11 = vmor %vm526_vm10, %vm527_vm9 }
 0x25e   : > { %v539_v16 = vsel %vm3376_vm6, %v3055_v46, %v535_v51  ;;  %v522_v17 = vmul.f32 %v3059_v8, %v521_v9  ;;  %671 = vmatpush.msra.mxu2 %v3373_v10  ;;  %2994 = vmatpush.msra.mxu3 %v3373_v10  ;;  %v249_v46 = vld [vmem:[%s4331_s1 + $0x38] sm:$0xff]  ;;  %v3016_v51 = vld [vmem:[%s4333_s3 + $0x4] ss:$0 sm:$0xff] }
 0x25f   : > { %v559_v20 = vsel %vm558_vm8, %v3057_v50, %v555_v15  ;;  %v601_v25 = vmul.f32 %v539_v16, %v3273_v38  ;;  %v620_v38 = vadd.f32 %v3335_v43, %v611_v27  ;;  %v629_v50 = vld [vmem:[%s4332_s2 + $0x40] sm:$0xff] }
 0x260   : > { %v523_v22 = vmul.f32 0.5, %v522_v17  ;;  %672 = vmatpush.msra.mxu2 %v3382_v62  ;;  %2995 = vmatpush.msra.mxu3 %v3382_v62  ;;  %v603_v24 = vmul.f32 %v559_v20, %v3267_v31 }
 0x261   : > { %v610_v32 = vmul.f32 %v3321_v34, %v601_v25  ;;  %804 = vmatpush.msrb.mxu0 %v629_v50 }
 0x262   : > { %v524_v26 = vsub.f32 1.5, %v523_v22  ;;  %673 = vmatpush.msra.mxu2 %v3392_v19  ;;  %2996 = vmatpush.msra.mxu3 %v3392_v19  ;;  %v612_v13 = vmul.f32 %v3321_v34, %v603_v24 }
 0x263   : > { %v619_v35 = vadd.f32 %v3335_v43, %v610_v32  ;;  %805 = vmatpush.msrb.mxu0 %v628_v52 }
 0x264   : > { %v525_v29 = vmul.f32 %v3059_v8, %v524_v26  ;;  %v621_v30 = vadd.f32 %v3335_v43, %v612_v13 }
 0x265   : > { %806 = vmatpush.msrb.mxu0 %v627_v53 }
 0x266   : > { %v529_v31 = vsel %vm528_vm11, %v3059_v8, %v525_v29  ;;  %674 = vmatpush.msra.mxu2 %v621_v30  ;;  %2997 = vmatpush.msra.mxu3 %v621_v30 }
 0x267   : > { %v600_v33 = vmul.f32 %v529_v31, %v3279_v41  ;;  %v633_v41 = vld [vmem:[%s4332_s2 + $0x60] sm:$0xff]  ;;  %807 = vmatpush.msrb.mxu0 %v626_v54 }
 0x268   : > { %675 = vmatpush.msra.mxu2 %v620_v38  ;;  %2998 = vmatpush.msra.mxu3 %v620_v38 }
 0x269   : > { %v609_v36 = vmul.f32 %v3321_v34, %v600_v33  ;;  %v632_v34 = vld [vmem:[%s4332_s2 + $0x58] sm:$0xff] }
 0x26a   : > { %676 = vmatpush.msra.mxu2 %v619_v35  ;;  %2999 = vmatpush.msra.mxu3 %v619_v35 }
 0x26b   : > { %v618_v37 = vadd.f32 %v3335_v43, %v609_v36  ;;  %v243_v43 = vld [vmem:[%s4331_s1 + $0x8] sm:$0xff] }
 0x26d   : > { %677 = vmatpush.msra.mxu2 %v618_v37  ;;  %3000 = vmatpush.msra.mxu3 %v618_v37 }
 0x26e   : > { %2863 = vmatmul.msk.f32.vlgmr.msra.gmra.mxu2 %vm637_vm12, %v242_v39  ;;  %2868 = vmatmul.msk.f32.vlgmr.msra.gmra.mxu3 %vm637_vm12, %v247_v40 }
 0x26f   : > { %739 = vmatpush.msrb.mxu3 %v633_v41 }
 0x271   : > { %740 = vmatpush.msrb.mxu3 %v632_v34 }
 0x273   : > { %741 = vmatpush.msrb.mxu3 %v631_v42 }
 0x275   : > { %742 = vmatpush.msrb.mxu3 %v630_v21 }
 0x276   : > { %2864 = vmatmul.msk.f32.gmra.mxu2 %vm637_vm12, %v243_v43  ;;  %2869 = vmatmul.msk.f32.gmra.mxu3 %vm637_vm12, %v248_v44 }
 0x27e   : > { %2865 = vmatmul.msk.f32.gmra.mxu2 %vm637_vm12, %v244_v45  ;;  %2870 = vmatmul.msk.f32.gmra.mxu3 %vm637_vm12, %v249_v46 }
 0x286   : > { %2866 = vmatmul.msk.f32.gmra.mxu2 %vm637_vm12, %v245_v47  ;;  %2871 = vmatmul.msk.f32.vlgmr.msrb.gmra.mxu3 %vm359_vm1, %v618_v37 }
 0x28e   : > { %2867 = vmatmul.msk.f32.gmra.mxu2 %vm637_vm12, %v246_v48  ;;  %2872 = vmatmul.msk.f32.gmra.mxu3 %vm359_vm1, %v619_v35 }
 0x296   : > { %2873 = vmatmul.msk.f32.gmra.mxu3 %vm359_vm1, %v620_v38 }
 0x29e   : > { %2874 = vmatmul.msk.f32.gmra.mxu3 %vm359_vm1, %v621_v30 }
 0x2a6   : > { %2875 = vmatmul.msk.f32.gmra.mxu3 %vm359_vm1, %v3392_v19 }
 0x2ae   : > { %2876 = vmatmul.msk.f32.gmra.mxu3 %vm359_vm1, %v3382_v62 }
 0x2b6   : > { %2877 = vmatmul.msk.f32.gmra.mxu3 %vm359_vm1, %v3373_v10 }
 0x2be   : > { %2878 = vmatmul.msk.f32.gmra.mxu3 %vm359_vm1, %v3340_v49 }
 0x2f1   : > { %v679_v55 = vpop.f32.mrf.mxu2  ;;  %v694_v49 = vpop.f32.mrf.mxu3 }
 0x2f2   : > { %2879 = vmatmul.msk.f32.vlgmr.msrb.gmra.mxu0 %vm359_vm1, %v679_v55 }
 0x2f9   : > { %v682_v56 = vpop.f32.mrf.mxu2  ;;  %v697_v59 = vpop.f32.mrf.mxu3 }
 0x2fa   : > { %2880 = vmatmul.msk.f32.gmra.mxu0 %vm359_vm1, %v682_v56 }
 0x301   : > { %v685_v57 = vpop.f32.mrf.mxu2  ;;  %v700_v60 = vpop.f32.mrf.mxu3 }
 0x302   : > { %2881 = vmatmul.msk.f32.gmra.mxu0 %vm359_vm1, %v685_v57 }
 0x309   : > { %v688_v58 = vpop.f32.mrf.mxu2  ;;  %v744_v61 = vpop.f32.mrf.mxu3 }
 0x30a   : > { %2882 = vmatmul.msk.f32.gmra.mxu0 %vm359_vm1, %v688_v58 }
 0x311   : > { %v691_v11 = vpop.f32.mrf.mxu2  ;;  %v747_v63 = vpop.f32.mrf.mxu3 }
 0x312   : > { %2883 = vmatmul.msk.f32.gmra.mxu0 %vm359_vm1, %v691_v11 }
 0x319   : > { %v750_v1 = vpop.f32.mrf.mxu3 }
 0x31a   : > { %2884 = vmatmul.msk.f32.gmra.mxu0 %vm359_vm1, %v694_v49 }
 0x321   : > { %v753_v3 = vpop.f32.mrf.mxu3 }
 0x322   : > { %2885 = vmatmul.msk.f32.gmra.mxu0 %vm359_vm1, %v697_v59 }
 0x329   : > { %v756_v7 = vpop.f32.mrf.mxu3 }
 0x32a   : > { %2886 = vmatmul.msk.f32.gmra.mxu0 %vm359_vm1, %v700_v60 }
 0x331   : > { %v759_v28 = vpop.f32.mrf.mxu3 }
 0x339   : > { %v762_v15 = vpop.f32.mrf.mxu3 }
 0x341   : > { %v765_v27 = vpop.f32.mrf.mxu3 }
 0x36f   : > { %v809_v0 = vpop.f32.mrf.mxu0 }
 0x370   : > { %v810_v32 = vadd.f32 %v809_v0, %v744_v61 }
 0x372   : > { %v834_v40 = vadd.f32 %v3016_v51, %v810_v32 }
 0x374   : > { %v842_v34 = vmax.f32 %v834_v40, 0.0 }
 0x376   : > { %v850_v21 = vsel %vm359_vm1, %v842_v34, 0.0 }
 0x377   : > { %v812_v2 = vpop.f32.mrf.mxu0 }
 0x378   : > { %v813_v41 = vadd.f32 %v812_v2, %v747_v63 }
 0x37a   : > { %v835_v44 = vadd.f32 %v3016_v51, %v813_v41 }
 0x37c   : > { %v843_v45 = vmax.f32 %v835_v44, 0.0 }
 0x37e   : > { %v853_v46 = vsel %vm359_vm1, %v843_v45, 0.0 }
 0x37f   : > { %v815_v4 = vpop.f32.mrf.mxu0 }
 0x380   : > { %v816_v10 = vadd.f32 %v815_v4, %v750_v1 }
 0x382   : > { %v836_v16 = vadd.f32 %v3016_v51, %v816_v10 }
 0x384   : > { %v844_v19 = vmax.f32 %v836_v16, 0.0 }
 0x386   : > { %v856_v26 = vsel %vm359_vm1, %v844_v19, 0.0 }
 0x387   : > { %v818_v5 = vpop.f32.mrf.mxu0 }
 0x388   : > { %v819_v20 = vadd.f32 %v818_v5, %v753_v3 }
 0x38a   : > { %v837_v13 = vadd.f32 %v3016_v51, %v819_v20 }
 0x38c   : > { %v845_v33 = vmax.f32 %v837_v13, 0.0 }
 0x38e   : > { %v859_v39 = vsel %vm359_vm1, %v845_v33, 0.0 }
 0x38f   : > { %v821_v8 = vpop.f32.mrf.mxu0 }
 0x390   : > { %v822_v31 = vadd.f32 %v821_v8, %v756_v7 }
 0x392   : > { %v838_v36 = vadd.f32 %v3016_v51, %v822_v31 }
 0x394   : > { %v846_v42 = vmax.f32 %v838_v36, 0.0 }
 0x396   : > { %v862_v43 = vsel %vm359_vm1, %v846_v42, 0.0 }
 0x397   : > { %v824_v23 = vpop.f32.mrf.mxu0 }
 0x398   : > { %v825_v9 = vadd.f32 %v824_v23, %v759_v28 }
 0x39a   : > { %v839_v12 = vadd.f32 %v3016_v51, %v825_v9 }
 0x39c   : > { %v847_v14 = vmax.f32 %v839_v12, 0.0 }
 0x39e   : > { %v865_v62 = vsel %vm359_vm1, %v847_v14, 0.0 }
 0x39f   : > { %v827_v17 = vpop.f32.mrf.mxu0  ;;  %866 = vadd.xlane.f32.xlu0 %v865_v62 }
 0x3a0   : > { %v828_v18 = vadd.f32 %v827_v17, %v762_v15 }
 0x3a2   : > { %v840_v22 = vadd.f32 %v3016_v51, %v828_v18 }
 0x3a4   : > { %v848_v24 = vmax.f32 %v840_v22, 0.0 }
 0x3a6   : > { %v868_v25 = vsel %vm359_vm1, %v848_v24, 0.0 }
 0x3a7   : > { %v830_v29 = vpop.f32.mrf.mxu0  ;;  %869 = vadd.xlane.f32.xlu2 %v868_v25  ;;  %857 = vadd.xlane.f32.xlu0 %v856_v26 }
 0x3a8   : > { %v831_v30 = vadd.f32 %v830_v29, %v765_v27 }
 0x3aa   : > { %v841_v38 = vadd.f32 %v3016_v51, %v831_v30 }
 0x3ac   : > { %v849_v35 = vmax.f32 %v841_v38, 0.0 }
 0x3ae   : > { %v871_v37 = vsel %vm359_vm1, %v849_v35, 0.0 }
 0x3af   : > { %872 = vadd.xlane.f32.xlu1 %v871_v37  ;;  %860 = vadd.xlane.f32.xlu2 %v859_v39 }
 0x3b7   : > { %851 = vadd.xlane.f32.xlu2 %v850_v21  ;;  %863 = vadd.xlane.f32.xlu1 %v862_v43 }
 0x3bf   : > { %854 = vadd.xlane.f32.xlu1 %v853_v46 }
 0x412   : > { %v867_v47 = vpop.xlane.xlu0 %866 }
 0x413   : > { %v879_v48 = vmul.f32 %v867_v47, %v3235_v6 }
 0x415   : > { %v3496_v50 = vsub.f32 %v847_v14, %v879_v48 }
 0x417   : > { %v895_v52 = vmul.f32 %v3496_v50, %v3496_v50 }
 0x419   : > { %v913_v53 = vsel %vm359_vm1, %v895_v52, 0.0 }
 0x41a   : > { %v870_v54 = vpop.xlane.xlu2 %869  ;;  %914 = vadd.xlane.f32.xlu2 %v913_v53  ;;  %v858_v55 = vpop.xlane.xlu0 %857 }
 0x41b   : > { %v880_v56 = vmul.f32 %v870_v54, %v3235_v6  ;;  %v876_v57 = vmul.f32 %v858_v55, %v3235_v6 }
 0x41d   : > { %v3503_v58 = vsub.f32 %v848_v24, %v880_v56  ;;  %v3505_v11 = vsub.f32 %v844_v19, %v876_v57 }
 0x41f   : > { %v892_v49 = vmul.f32 %v3505_v11, %v3505_v11  ;;  %v896_v59 = vmul.f32 %v3503_v58, %v3503_v58 }
 0x421   : > { %v904_v60 = vsel %vm359_vm1, %v892_v49, 0.0  ;;  %v916_v61 = vsel %vm359_vm1, %v896_v59, 0.0 }
 0x422   : > { %v873_v63 = vpop.xlane.xlu1 %872  ;;  %v861_v0 = vpop.xlane.xlu2 %860  ;;  %905 = vadd.xlane.f32.xlu2 %v904_v60  ;;  %917 = vadd.xlane.f32.xlu1 %v916_v61 }
 0x423   : > { %v881_v1 = vmul.f32 %v873_v63, %v3235_v6  ;;  %v877_v2 = vmul.f32 %v861_v0, %v3235_v6 }
 0x425   : > { %v3515_v3 = vsub.f32 %v849_v35, %v881_v1  ;;  %v3517_v4 = vsub.f32 %v845_v33, %v877_v2 }
 0x427   : > { %v897_v5 = vmul.f32 %v3515_v3, %v3515_v3  ;;  %v893_v7 = vmul.f32 %v3517_v4, %v3517_v4 }
 0x429   : > { %v919_v8 = vsel %vm359_vm1, %v897_v5, 0.0  ;;  %v907_v28 = vsel %vm359_vm1, %v893_v7, 0.0 }
 0x42a   : > { %v852_v23 = vpop.xlane.xlu2 %851  ;;  %920 = vadd.xlane.f32.xlu0 %v919_v8  ;;  %908 = vadd.xlane.f32.xlu1 %v907_v28  ;;  %v864_v51 = vpop.xlane.xlu1 %863 }
 0x42b   : > { %v874_v9 = vmul.f32 %v852_v23, %v3235_v6  ;;  %v878_v10 = vmul.f32 %v864_v51, %v3235_v6 }
 0x42d   : > { %v3527_v12 = vsub.f32 %v842_v34, %v874_v9  ;;  %v3529_v14 = vsub.f32 %v846_v42, %v878_v10  ;;  %v1092_v9 = vld [vmem:[%s4332_s2 + $0xa0] sm:$0xff] }
 0x42e   : > { %1161 = vmatpush.msrb.mxu2 %v1092_v9 }
 0x42f   : > { %v890_v15 = vmul.f32 %v3527_v12, %v3527_v12  ;;  %v894_v62 = vmul.f32 %v3529_v14, %v3529_v14 }
 0x431   : > { %v898_v16 = vsel %vm359_vm1, %v890_v15, 0.0  ;;  %v910_v17 = vsel %vm359_vm1, %v894_v62, 0.0 }
 0x432   : > { %899 = vadd.xlane.f32.xlu1 %v898_v16  ;;  %911 = vadd.xlane.f32.xlu0 %v910_v17  ;;  %v855_v18 = vpop.xlane.xlu1 %854 }
 0x433   : > { %v875_v20 = vmul.f32 %v855_v18, %v3235_v6  ;;  %v257_v18 = vld [vmem:[%s4331_s1 + $0x78] sm:$0xff] }
 0x435   : > { %v3538_v22 = vsub.f32 %v843_v45, %v875_v20 }
 0x437   : > { %v891_v19 = vmul.f32 %v3538_v22, %v3538_v22 }
 0x439   : > { %v901_v24 = vsel %vm359_vm1, %v891_v19, 0.0 }
 0x43a   : > { %902 = vadd.xlane.f32.xlu0 %v901_v24 }
 0x48d   : > { %v915_v25 = vpop.xlane.xlu2 %914 }
 0x48e   : > { %v927_v26 = vmul.f32 %v915_v25, %v3235_v6 }
 0x490   : > { %v935_v13 = vadd.f32 1e-05, %v927_v26 }
 0x492   : > { %3060 = vrsqrt.f32 %v935_v13  ;;  %vm994_vm2 = vweird.f32 %v935_v13 }
 0x495   : > { %v906_v27 = vpop.xlane.xlu2 %905  ;;  %v918_v29 = vpop.xlane.xlu1 %917 }
 0x496   : > { %v924_v30 = vmul.f32 %v906_v27, %v3235_v6  ;;  %v928_v32 = vmul.f32 %v918_v29, %v3235_v6 }
 0x498   : > { %v3546_v31 = vadd.f32 1e-05, %v924_v30  ;;  %v936_v38 = vadd.f32 1e-05, %v928_v32  ;;  %v3548_v33 = vpop.eup %3060 }
 0x499   : > { %v989_v35 = vmul.f32 %v3548_v33, %v935_v13  ;;  %vm995_vm14 = vweird.f32 %v3548_v33 }
 0x49a   : > { %3062 = vrsqrt.f32 %v936_v38  ;;  %vm1004_vm15 = vweird.f32 %v936_v38  ;;  %vm3587_vm4 = vmor %vm994_vm2, %vm995_vm14  ;;  %vm964_vm11 = vweird.f32 %v3546_v31 }
 0x49b   : > { %3064 = vrsqrt.f32 %v3546_v31  ;;  %v990_v21 = vmul.f32 %v3548_v33, %v989_v35 }
 0x49d   : > { %v921_v36 = vpop.xlane.xlu0 %920  ;;  %v909_v37 = vpop.xlane.xlu1 %908  ;;  %v991_v46 = vmul.f32 0.5, %v990_v21 }
 0x49e   : > { %v929_v39 = vmul.f32 %v921_v36, %v3235_v6  ;;  %v925_v40 = vmul.f32 %v909_v37, %v3235_v6 }
 0x49f   : > { %v992_v61 = vsub.f32 1.5, %v991_v46 }
 0x4a0   : > { %v937_v41 = vadd.f32 1e-05, %v929_v39  ;;  %v3554_v34 = vadd.f32 1e-05, %v925_v40  ;;  %v3063_v42 = vpop.eup %3062 }
 0x4a1   : > { %v3557_v43 = vpop.eup %3064  ;;  %v999_v44 = vmul.f32 %v3063_v42, %v936_v38  ;;  %vm1005_vm13 = vweird.f32 %v3063_v42  ;;  %v993_v8 = vmul.f32 %v3548_v33, %v992_v61 }
 0x4a2   : > { %3066 = vrsqrt.f32 %v937_v41  ;;  %v959_v47 = vmul.f32 %v3557_v43, %v3546_v31  ;;  %vm3578_vm0 = vmor %vm1004_vm15, %vm1005_vm13  ;;  %vm1014_vm5 = vweird.f32 %v937_v41  ;;  %vm965_vm8 = vweird.f32 %v3557_v43 }
 0x4a3   : > { %3068 = vrsqrt.f32 %v3554_v34  ;;  %v1000_v45 = vmul.f32 %v3063_v42, %v999_v44  ;;  %v997_v27 = vsel %vm3587_vm4, %v3548_v33, %v993_v8  ;;  %v3017_v33 = vld [vmem:[%s4333_s3 + $0x5] ss:$0 sm:$0xff]  ;;  %vm974_vm9 = vweird.f32 %v3554_v34  ;;  %vm3625_vm14 = vmor %vm964_vm11, %vm965_vm8 }
 0x4a4   : > { %v960_v63 = vmul.f32 %v3557_v43, %v959_v47  ;;  %v1023_v39 = vmul.f32 %v997_v27, %v3496_v50 }
 0x4a5   : > { %v912_v48 = vpop.xlane.xlu0 %911  ;;  %v900_v52 = vpop.xlane.xlu1 %899  ;;  %v1001_v53 = vmul.f32 0.5, %v1000_v45 }
 0x4a6   : > { %v926_v54 = vmul.f32 %v912_v48, %v3235_v6  ;;  %v922_v55 = vmul.f32 %v900_v52, %v3235_v6  ;;  %v961_v28 = vmul.f32 0.5, %v960_v63  ;;  %v1032_v52 = vmul.f32 %v3017_v33, %v1023_v39 }
 0x4a7   : > { %v1002_v57 = vsub.f32 1.5, %v1001_v53 }
 0x4a8   : > { %v3067_v56 = vpop.eup %3066  ;;  %v3564_v49 = vadd.f32 1e-05, %v926_v54  ;;  %v3566_v59 = vadd.f32 1e-05, %v922_v55  ;;  %v962_v25 = vsub.f32 1.5, %v961_v28 }
 0x4a9   : > { %v3568_v60 = vpop.eup %3068  ;;  %v1009_v0 = vmul.f32 %v3067_v56, %v937_v41  ;;  %v1003_v2 = vmul.f32 %v3063_v42, %v1002_v57  ;;  %vm1015_vm3 = vweird.f32 %v3067_v56 }
 0x4aa   : > { %v969_v1 = vmul.f32 %v3568_v60, %v3554_v34  ;;  %3070 = vrsqrt.f32 %v3564_v49  ;;  %vm1016_vm6 = vmor %vm1014_vm5, %vm1015_vm3  ;;  %vm975_vm7 = vweird.f32 %v3568_v60  ;;  %v963_v40 = vmul.f32 %v3557_v43, %v962_v25 }
 0x4ab   : > { %v1010_v5 = vmul.f32 %v3067_v56, %v1009_v0  ;;  %3072 = vrsqrt.f32 %v3566_v59  ;;  %v1007_v16 = vsel %vm3578_vm0, %v3063_v42, %v1003_v2  ;;  %vm3614_vm10 = vmor %vm974_vm9, %vm975_vm7  ;;  %vm984_vm15 = vweird.f32 %v3564_v49 }
 0x4ac   : > { %v970_v7 = vmul.f32 %v3568_v60, %v969_v1  ;;  %v1024_v30 = vmul.f32 %v1007_v16, %v3503_v58  ;;  %v967_v31 = vsel %vm3625_vm14, %v3557_v43, %v963_v40  ;;  %vm944_vm3 = vweird.f32 %v3566_v59 }
 0x4ad   : > { %v1011_v23 = vmul.f32 0.5, %v1010_v5  ;;  %v903_v51 = vpop.xlane.xlu0 %902  ;;  %v1020_v0 = vmul.f32 %v967_v31, %v3505_v11 }
 0x4ae   : > { %v971_v10 = vmul.f32 0.5, %v970_v7  ;;  %v923_v15 = vmul.f32 %v903_v51, %v3235_v6  ;;  %v1033_v44 = vmul.f32 %v3017_v33, %v1024_v30  ;;  %v3686_v30 = vld [vmem:[%s4331_s1 + $0x48] sm:$0xff] }
 0x4af   : > { %v1012_v62 = vsub.f32 1.5, %v1011_v23  ;;  %v1029_v8 = vmul.f32 %v3017_v33, %v1020_v0 }
 0x4b0   : > { %v3071_v17 = vpop.eup %3070  ;;  %v972_v20 = vsub.f32 1.5, %v971_v10  ;;  %v3591_v19 = vadd.f32 1e-05, %v923_v15  ;;  %v1091_v10 = vld [vmem:[%s4332_s2 + $0x98] sm:$0xff] }
 0x4b1   : > { %v3593_v24 = vpop.eup %3072  ;;  %v1013_v26 = vmul.f32 %v3067_v56, %v1012_v62  ;;  %v979_v13 = vmul.f32 %v3071_v17, %v3564_v49  ;;  %vm985_vm13 = vweird.f32 %v3071_v17  ;;  %1162 = vmatpush.msrb.mxu2 %v1091_v10 }
 0x4b2   : > { %v939_v29 = vmul.f32 %v3593_v24, %v3566_v59  ;;  %3074 = vrsqrt.f32 %v3591_v19  ;;  %v973_v32 = vmul.f32 %v3568_v60, %v972_v20  ;;  %vm986_vm0 = vmor %vm984_vm15, %vm985_vm13  ;;  %vm945_vm2 = vweird.f32 %v3593_v24  ;;  %v258_v20 = vld [vmem:[%s4331_s1 + $0x80] sm:$0xff] }
 0x4b3   : > { %v980_v38 = vmul.f32 %v3071_v17, %v979_v13  ;;  %v1017_v35 = vsel %vm1016_vm6, %v3067_v56, %v1013_v26  ;;  %vm946_vm4 = vmor %vm944_vm3, %vm945_vm2  ;;  %vm954_vm6 = vweird.f32 %v3591_v19 }
 0x4b4   : > { %v940_v36 = vmul.f32 %v3593_v24, %v939_v29  ;;  %v1025_v37 = vmul.f32 %v1017_v35, %v3515_v3  ;;  %v3018_v3 = vld [vmem:[%s4333_s3 + $0x6] ss:$0 sm:$0xff]  ;;  %v977_v34 = vsel %vm3614_vm10, %v3568_v60, %v973_v32  ;;  %v3693_v32 = vld [vmem:[%s4331_s1 + $0x50] sm:$0xff] }
 0x4b5   : > { %v981_v58 = vmul.f32 0.5, %v980_v38  ;;  %v1042_v55 = vadd.f32 %v3018_v3, %v1033_v44  ;;  %v1021_v56 = vmul.f32 %v977_v34, %v3517_v4  ;;  %v1041_v63 = vadd.f32 %v3018_v3, %v1032_v52  ;;  %v3679_v29 = vld [vmem:[%s4331_s1 + $0x40] sm:$0xff]  ;;  %v3700_v38 = vld [vmem:[%s4331_s1 + $0x58] sm:$0xff] }
 0x4b6   : > { %v941_v42 = vmul.f32 0.5, %v940_v36  ;;  %v1034_v21 = vmul.f32 %v3017_v33, %v1025_v37  ;;  %v1038_v23 = vadd.f32 %v3018_v3, %v1029_v8  ;;  %v1088_v35 = vld [vmem:[%s4332_s2 + $0x80] sm:$0xff]  ;;  %v1087_v36 = vld [vmem:[%s4332_s2 + $0x78] sm:$0xff]  ;;  %v1086_v37 = vld [vmem:[%s4332_s2 + $0x70] sm:$0xff] }
 0x4b7   : > { %v982_v50 = vsub.f32 1.5, %v981_v58  ;;  %v1030_v2 = vmul.f32 %v3017_v33, %v1021_v56 }
 0x4b8   : > { %v3075_v45 = vpop.eup %3074  ;;  %v942_v47 = vsub.f32 1.5, %v941_v42  ;;  %v1043_v48 = vadd.f32 %v3018_v3, %v1034_v21 }
 0x4b9   : > { %v983_v53 = vmul.f32 %v3071_v17, %v982_v50  ;;  %v949_v54 = vmul.f32 %v3075_v45, %v3591_v19  ;;  %vm955_vm5 = vweird.f32 %v3075_v45  ;;  %v259_v19 = vld [vmem:[%s4331_s1 + $0x88] sm:$0xff]  ;;  %v3019_v50 = vld [vmem:[%s4333_s3 + $0x7] ss:$0 sm:$0xff] }
 0x4ba   : > { %1064 = vmatpush.msrb.mxu1 %v1043_v48  ;;  %v943_v57 = vmul.f32 %v3593_v24, %v942_v47  ;;  %vm956_vm7 = vmor %vm954_vm6, %vm955_vm5  ;;  %vm1366_vm6 = vcmask 130048  }
 0x4bb   : > { %v950_v60 = vmul.f32 %v3075_v45, %v949_v54  ;;  %v987_v61 = vsel %vm986_vm0, %v3071_v17, %v983_v53  ;;  %v256_v17 = vld [vmem:[%s4331_s1 + $0x70] sm:$0xff] }
 0x4bc   : > { %1065 = vmatpush.msrb.mxu1 %v1042_v55  ;;  %v1022_v49 = vmul.f32 %v987_v61, %v3529_v14  ;;  %v947_v5 = vsel %vm946_vm4, %v3593_v24, %v943_v57  ;;  %v1039_v14 = vadd.f32 %v3018_v3, %v1030_v2  ;;  %v1089_v24 = vld [vmem:[%s4332_s2 + $0x88] sm:$0xff] }
 0x4bd   : > { %v951_v43 = vmul.f32 0.5, %v950_v60  ;;  %v1018_v11 = vmul.f32 %v947_v5, %v3527_v12  ;;  %v1090_v12 = vld [vmem:[%s4332_s2 + $0x90] sm:$0xff] }
 0x4be   : > { %1066 = vmatpush.msrb.mxu1 %v1041_v63  ;;  %v1031_v1 = vmul.f32 %v3017_v33, %v1022_v49  ;;  %1163 = vmatpush.msrb.mxu2 %v1090_v12 }
 0x4bf   : > { %v952_v4 = vsub.f32 1.5, %v951_v43  ;;  %v1027_v62 = vmul.f32 %v3017_v33, %v1018_v11 }
 0x4c0   : > { %v1040_v7 = vadd.f32 %v3018_v3, %v1031_v1  ;;  %1164 = vmatpush.msrb.mxu2 %v1089_v24 }
 0x4c1   : > { %v953_v28 = vmul.f32 %v3075_v45, %v952_v4 }
 0x4c2   : > { %1067 = vmatpush.msrb.mxu1 %v1040_v7 }
 0x4c3   : > { %v957_v59 = vsel %vm956_vm7, %v3075_v45, %v953_v28 }
 0x4c4   : > { %1068 = vmatpush.msrb.mxu1 %v1039_v14  ;;  %v1019_v51 = vmul.f32 %v957_v59, %v3538_v22  ;;  %v1036_v22 = vadd.f32 %v3018_v3, %v1027_v62 }
 0x4c6   : > { %1069 = vmatpush.msrb.mxu1 %v1038_v23  ;;  %v1028_v15 = vmul.f32 %v3017_v33, %v1019_v51  ;;  %v1085_v33 = vld [vmem:[%s4332_s2 + $0x68] sm:$0xff] }
 0x4c8   : > { %v1037_v16 = vadd.f32 %v3018_v3, %v1028_v15 }
 0x4ca   : > { %1070 = vmatpush.msrb.mxu1 %v1037_v16 }
 0x4cc   : > { %1071 = vmatpush.msrb.mxu1 %v1036_v22 }
 0x4cd   : > { %2887 = vmatmul.msk.f32.vlgmr.msrb.gmra.mxu1 %vm637_vm12, %v256_v17 }
 0x4ce   : > { %1202 = vmatpush.msra.mxu1 %v1088_v35 }
 0x4d0   : > { %1203 = vmatpush.msra.mxu1 %v1087_v36 }
 0x4d2   : > { %1204 = vmatpush.msra.mxu1 %v1086_v37 }
 0x4d4   : > { %1205 = vmatpush.msra.mxu1 %v1085_v33 }
 0x4d5   : > { %2888 = vmatmul.msk.f32.gmra.mxu1 %vm637_vm12, %v257_v18 }
 0x4dd   : > { %2889 = vmatmul.msk.f32.gmra.mxu1 %vm637_vm12, %v258_v20 }
 0x4e5   : > { %2890 = vmatmul.msk.f32.gmra.mxu1 %vm637_vm12, %v259_v19 }
 0x54a   : > { %v1073_v25 = vpop.f32.mrf.mxu1 }
 0x54b   : > { %2895 = vmatmul.msk.f32.vlgmr.msrb.gmra.mxu2 %vm359_vm1, %v1073_v25 }
 0x552   : > { %v1076_v26 = vpop.f32.mrf.mxu1 }
 0x553   : > { %2896 = vmatmul.msk.f32.gmra.mxu2 %vm359_vm1, %v1076_v26 }
 0x55a   : > { %v1079_v13 = vpop.f32.mrf.mxu1 }
 0x55b   : > { %2897 = vmatmul.msk.f32.gmra.mxu2 %vm359_vm1, %v1079_v13 }
 0x562   : > { %v1082_v27 = vpop.f32.mrf.mxu1 }
 0x563   : > { %1120 = vmatpush.msra.mxu3 %v1082_v27  ;;  %2898 = vmatmul.msk.f32.gmra.mxu2 %vm359_vm1, %v1082_v27 }
 0x565   : > { %1121 = vmatpush.msra.mxu3 %v1079_v13 }
 0x567   : > { %1122 = vmatpush.msra.mxu3 %v1076_v26 }
 0x569   : > { %1123 = vmatpush.msra.mxu3 %v1073_v25 }
 0x56a   : > { %2891 = vmatmul.msk.f32.vlgmr.msra.gmra.mxu3 %vm359_vm1, %v3679_v29 }
 0x572   : > { %2892 = vmatmul.msk.f32.gmra.mxu3 %vm359_vm1, %v3686_v30 }
 0x57a   : > { %2893 = vmatmul.msk.f32.gmra.mxu3 %vm359_vm1, %v3693_v32 }
 0x582   : > { %2894 = vmatmul.msk.f32.gmra.mxu3 %vm359_vm1, %v3700_v38 }
 0x5ce   : > { %v1166_v42 = vpop.f32.mrf.mxu2 }
 0x5d6   : > { %v1169_v3 = vpop.f32.mrf.mxu2 }
 0x5de   : > { %v1172_v47 = vpop.f32.mrf.mxu2 }
 0x5e6   : > { %v1175_v56 = vpop.f32.mrf.mxu2 }
 0x5ed   : > { %v1125_v39 = vpop.f32.mrf.mxu3 }
 0x5ee   : > { %2899 = vmatmul.msk.f32.vlgmr.msra.gmra.mxu1 %vm359_vm1, %v1125_v39 }
 0x5f5   : > { %v1128_v40 = vpop.f32.mrf.mxu3 }
 0x5f6   : > { %2900 = vmatmul.msk.f32.gmra.mxu1 %vm359_vm1, %v1128_v40 }
 0x5fd   : > { %v1131_v58 = vpop.f32.mrf.mxu3 }
 0x5fe   : > { %2901 = vmatmul.msk.f32.gmra.mxu1 %vm359_vm1, %v1131_v58 }
 0x605   : > { %v1134_v41 = vpop.f32.mrf.mxu3 }
 0x606   : > { %2902 = vmatmul.msk.f32.gmra.mxu1 %vm359_vm1, %v1134_v41 }
 0x66b   : > { %v1207_v21 = vpop.f32.mrf.mxu1 }
 0x66c   : > { %v1208_v61 = vadd.f32 %v1207_v21, %v1166_v42 }
 0x66e   : > { %v1220_v0 = vadd.f32 %v3019_v50, %v1208_v61 }
 0x670   : > { %v1224_v1 = vmax.f32 %v1220_v0, 0.0 }
 0x672   : > { %v1228_v2 = vsel %vm359_vm1, %v1224_v1, 0.0 }
 0x673   : > { %v1210_v44 = vpop.f32.mrf.mxu1 }
 0x674   : > { %v1211_v34 = vadd.f32 %v1210_v44, %v1169_v3 }
 0x676   : > { %v1221_v45 = vadd.f32 %v3019_v50, %v1211_v34 }
 0x678   : > { %v1225_v46 = vmax.f32 %v1221_v45, 0.0 }
 0x67a   : > { %v1231_v48 = vsel %vm359_vm1, %v1225_v46, 0.0 }
 0x67b   : > { %1232 = vadd.xlane.f32.xlu1 %v1231_v48  ;;  %v1213_v52 = vpop.f32.mrf.mxu1 }
 0x67c   : > { %v1214_v53 = vadd.f32 %v1213_v52, %v1172_v47 }
 0x67e   : > { %v1222_v54 = vadd.f32 %v3019_v50, %v1214_v53 }
 0x680   : > { %v1226_v31 = vmax.f32 %v1222_v54, 0.0 }
 0x682   : > { %v1234_v55 = vsel %vm359_vm1, %v1226_v31, 0.0 }
 0x683   : > { %1235 = vadd.xlane.f32.xlu0 %v1234_v55  ;;  %v1216_v57 = vpop.f32.mrf.mxu1 }
 0x684   : > { %v1217_v60 = vadd.f32 %v1216_v57, %v1175_v56 }
 0x686   : > { %v1223_v63 = vadd.f32 %v3019_v50, %v1217_v60 }
 0x688   : > { %v1227_v49 = vmax.f32 %v1223_v63, 0.0 }
 0x68a   : > { %v1237_v43 = vsel %vm359_vm1, %v1227_v49, 0.0 }
 0x68b   : > { %1238 = vadd.xlane.f32.xlu2 %v1237_v43 }
 0x693   : > { %1229 = vadd.xlane.f32.xlu2 %v1228_v2  ;;  %v3020_v2 = vld [vmem:[%s4333_s3 + $0x8] ss:$0 sm:$0xff] }
 0x6ee   : > { %v1233_v4 = vpop.xlane.xlu1 %1232 }
 0x6ef   : > { %v1241_v5 = vmul.f32 %v1233_v4, %v3235_v6 }
 0x6f1   : > { %v3728_v7 = vsub.f32 %v1225_v46, %v1241_v5 }
 0x6f3   : > { %v1249_v8 = vmul.f32 %v3728_v7, %v3728_v7 }
 0x6f5   : > { %v1255_v28 = vsel %vm359_vm1, %v1249_v8, 0.0 }
 0x6f6   : > { %v1236_v14 = vpop.xlane.xlu0 %1235  ;;  %1256 = vadd.xlane.f32.xlu2 %v1255_v28  ;;  %v3021_v28 = vld [vmem:[%s4333_s3 + $0x9] ss:$0 sm:$0xff] }
 0x6f7   : > { %v1242_v11 = vmul.f32 %v1236_v14, %v3235_v6 }
 0x6f9   : > { %v3734_v59 = vsub.f32 %v1226_v31, %v1242_v11 }
 0x6fb   : > { %v1250_v23 = vmul.f32 %v3734_v59, %v3734_v59 }
 0x6fd   : > { %v1258_v51 = vsel %vm359_vm1, %v1250_v23, 0.0 }
 0x6fe   : > { %1259 = vadd.xlane.f32.xlu1 %v1258_v51  ;;  %v1239_v9 = vpop.xlane.xlu2 %1238 }
 0x6ff   : > { %v1243_v10 = vmul.f32 %v1239_v9, %v3235_v6 }
 0x701   : > { %v1247_v15 = vsub.f32 %v1227_v49, %v1243_v10 }
 0x703   : > { %v1251_v62 = vmul.f32 %v1247_v15, %v1247_v15 }
 0x705   : > { %v1261_v12 = vsel %vm359_vm1, %v1251_v62, 0.0 }
 0x706   : > { %1262 = vadd.xlane.f32.xlu0 %v1261_v12  ;;  %v1230_v16 = vpop.xlane.xlu2 %1229 }
 0x707   : > { %v1240_v22 = vmul.f32 %v1230_v16, %v3235_v6  ;;  %v260_v16 = vld [vmem:[%s4331_s1 + $0x90] sm:$0xff] }
 0x709   : > { %v3742_v17 = vsub.f32 %v1224_v1, %v1240_v22  ;;  %v261_v22 = vld [vmem:[%s4331_s1 + $0x98] sm:$0xff] }
 0x70b   : > { %v1248_v18 = vmul.f32 %v3742_v17, %v3742_v17 }
 0x70d   : > { %v1252_v20 = vsel %vm359_vm1, %v1248_v18, 0.0  ;;  %v1361_v18 = vld [vmem:[%s4332_s2 + $0xd8] sm:$0xff] }
 0x70e   : > { %1253 = vadd.xlane.f32.xlu0 %v1252_v20  ;;  %v1360_v20 = vld [vmem:[%s4332_s2 + $0xd0] sm:$0xff] }
 0x769   : > { %v1257_v19 = vpop.xlane.xlu2 %1256 }
 0x76a   : > { %v1265_v24 = vmul.f32 %v1257_v19, %v3235_v6  ;;  %v1359_v19 = vld [vmem:[%s4332_s2 + $0xc8] sm:$0xff] }
 0x76c   : > { %v1269_v25 = vadd.f32 1e-05, %v1265_v24 }
 0x76e   : > { %3076 = vrsqrt.f32 %v1269_v25  ;;  %vm1288_vm13 = vweird.f32 %v1269_v25 }
 0x771   : > { %v1260_v26 = vpop.xlane.xlu1 %1259 }
 0x772   : > { %v1266_v13 = vmul.f32 %v1260_v26, %v3235_v6  ;;  %v3784_v26 = vld [vmem:[%s4331_s1 + $0x60] sm:$0xff] }
 0x774   : > { %v1270_v27 = vadd.f32 1e-05, %v1266_v13  ;;  %v3077_v35 = vpop.eup %3076  ;;  %v1358_v13 = vld [vmem:[%s4332_s2 + $0xc0] sm:$0xff] }
 0x775   : > { %v1283_v36 = vmul.f32 %v3077_v35, %v1269_v25  ;;  %vm1289_vm9 = vweird.f32 %v3077_v35 }
 0x776   : > { %3078 = vrsqrt.f32 %v1270_v27  ;;  %vm1298_vm10 = vweird.f32 %v1270_v27  ;;  %vm1290_vm15 = vmor %vm1288_vm13, %vm1289_vm9 }
 0x777   : > { %v1284_v58 = vmul.f32 %v3077_v35, %v1283_v36  ;;  %v3801_v36 = vld [vmem:[%s4331_s1 + $0x68] sm:$0xff] }
 0x779   : > { %v1263_v37 = vpop.xlane.xlu0 %1262  ;;  %v1285_v21 = vmul.f32 0.5, %v1284_v58  ;;  %v3022_v58 = vld [vmem:[%s4333_s3 + $0xa] ss:$0 sm:$0xff] }
 0x77a   : > { %v1267_v33 = vmul.f32 %v1263_v37, %v3235_v6  ;;  %v1355_v37 = vld [vmem:[%s4332_s2 + $0xa8] sm:$0xff] }
 0x77b   : > { %v1286_v47 = vsub.f32 1.5, %v1285_v21 }
 0x77c   : > { %v3079_v39 = vpop.eup %3078  ;;  %v1271_v40 = vadd.f32 1e-05, %v1267_v33 }
 0x77d   : > { %v1293_v41 = vmul.f32 %v3079_v39, %v1270_v27  ;;  %vm1299_vm8 = vweird.f32 %v3079_v39  ;;  %v1287_v54 = vmul.f32 %v3077_v35, %v1286_v47  ;;  %v1357_v27 = vld [vmem:[%s4332_s2 + $0xb8] sm:$0xff] }
 0x77e   : > { %3080 = vrsqrt.f32 %v1271_v40  ;;  %vm1300_vm11 = vmor %vm1298_vm10, %vm1299_vm8  ;;  %vm1308_vm0 = vweird.f32 %v1271_v40 }
 0x77f   : > { %v1294_v42 = vmul.f32 %v3079_v39, %v1293_v41  ;;  %v1291_v60 = vsel %vm1290_vm15, %v3077_v35, %v1287_v54  ;;  %v1356_v35 = vld [vmem:[%s4332_s2 + $0xb0] sm:$0xff] }
 0x780   : > { %v1313_v4 = vmul.f32 %v1291_v60, %v3728_v7 }
 0x781   : > { %v1295_v3 = vmul.f32 0.5, %v1294_v42  ;;  %v1254_v44 = vpop.xlane.xlu0 %1253 }
 0x782   : > { %v1264_v50 = vmul.f32 %v1254_v44, %v3235_v6 }
 0x783   : > { %v1296_v34 = vsub.f32 1.5, %v1295_v3 }
 0x784   : > { %v3081_v45 = vpop.eup %3080  ;;  %v1268_v46 = vadd.f32 1e-05, %v1264_v50 }
 0x785   : > { %v1303_v48 = vmul.f32 %v3081_v45, %v1271_v40  ;;  %v1297_v52 = vmul.f32 %v3079_v39, %v1296_v34  ;;  %vm1309_vm14 = vweird.f32 %v3081_v45 }
 0x786   : > { %3082 = vrsqrt.f32 %v1268_v46  ;;  %vm1310_vm2 = vmor %vm1308_vm0, %vm1309_vm14  ;;  %vm1278_vm4 = vweird.f32 %v1268_v46 }
 0x787   : > { %v1304_v53 = vmul.f32 %v3081_v45, %v1303_v48  ;;  %v1301_v55 = vsel %vm1300_vm11, %v3079_v39, %v1297_v52 }
 0x788   : > { %v1314_v49 = vmul.f32 %v1301_v55, %v3734_v59  ;;  %v1318_v59 = vmul.f32 %v3020_v2, %v1313_v4  ;;  %v1545_v4 = vld [vmem:[%s4332_s2 + $0x110] sm:$0xff] }
 0x789   : > { %v1305_v31 = vmul.f32 0.5, %v1304_v53 }
 0x78a   : > { %v1319_v14 = vmul.f32 %v3020_v2, %v1314_v49  ;;  %v1512_v49 = vld [vmem:[%s4332_s2 + $0x100] sm:$0xff] }
 0x78b   : > { %v1306_v56 = vsub.f32 1.5, %v1305_v31  ;;  %1533 = vmatpush.msra.mxu0 %v1512_v49 }
 0x78c   : > { %v3083_v57 = vpop.eup %3082  ;;  %v1324_v9 = vadd.f32 %v3021_v28, %v1319_v14 }
 0x78d   : > { %v1307_v61 = vmul.f32 %v3081_v45, %v1306_v56  ;;  %v1273_v63 = vmul.f32 %v3083_v57, %v1268_v46  ;;  %vm1279_vm3 = vweird.f32 %v3083_v57 }
 0x78e   : > { %vm1280_vm5 = vmor %vm1278_vm4, %vm1279_vm3 }
 0x78f   : > { %v1311_v0 = vsel %vm1310_vm2, %v3081_v45, %v1307_v61  ;;  %v1274_v43 = vmul.f32 %v3083_v57, %v1273_v63 }
 0x790   : > { %v1315_v1 = vmul.f32 %v1311_v0, %v1247_v15  ;;  %v1323_v15 = vadd.f32 %v3021_v28, %v1318_v59  ;;  %v1547_v0 = vld [vmem:[%s4332_s2 + $0x120] sm:$0xff]  ;;  %v1603_v59 = vld [vmem:[%s4332_s2 + $0x138] sm:$0xff] }
 0x791   : > { %v1275_v5 = vmul.f32 0.5, %v1274_v43  ;;  %1562 = vmatpush.msrb.mxu1 %v1547_v0  ;;  %v1511_v43 = vld [vmem:[%s4332_s2 + $0xf8] sm:$0xff] }
 0x792   : > { %v1320_v8 = vmul.f32 %v3020_v2, %v1315_v1  ;;  %v1546_v1 = vld [vmem:[%s4332_s2 + $0x118] sm:$0xff]  ;;  %1534 = vmatpush.msra.mxu0 %v1511_v43 }
 0x793   : > { %v1276_v11 = vsub.f32 1.5, %v1275_v5  ;;  %1563 = vmatpush.msrb.mxu1 %v1546_v1  ;;  %v1509_v5 = vld [vmem:[%s4332_s2 + $0xe8] sm:$0xff] }
 0x794   : > { %v1325_v23 = vadd.f32 %v3021_v28, %v1320_v8  ;;  %v1544_v8 = vld [vmem:[%s4332_s2 + $0x108] sm:$0xff] }
 0x795   : > { %v1277_v51 = vmul.f32 %v3083_v57, %v1276_v11  ;;  %1564 = vmatpush.msrb.mxu1 %v1545_v4 }
 0x796   : > { %1344 = vmatpush.msrb.mxu3 %v1325_v23  ;;  %v1604_v23 = vld [vmem:[%s4332_s2 + $0x140] sm:$0xff] }
 0x797   : > { %v1281_v10 = vsel %vm1280_vm5, %v3083_v57, %v1277_v51  ;;  %1565 = vmatpush.msrb.mxu1 %v1544_v8 }
 0x798   : > { %1345 = vmatpush.msrb.mxu3 %v1324_v9  ;;  %v1312_v7 = vmul.f32 %v1281_v10, %v3742_v17  ;;  %v1362_v17 = vld [vmem:[%s4332_s2 + $0xe0] sm:$0xff] }
 0x79a   : > { %1346 = vmatpush.msrb.mxu3 %v1323_v15  ;;  %v1317_v62 = vmul.f32 %v3020_v2, %v1312_v7  ;;  %v1510_v2 = vld [vmem:[%s4332_s2 + $0xf0] sm:$0xff] }
 0x79b   : > { %1535 = vmatpush.msra.mxu0 %v1510_v2 }
 0x79c   : > { %v1322_v12 = vadd.f32 %v3021_v28, %v1317_v62 }
 0x79d   : > { %1536 = vmatpush.msra.mxu0 %v1509_v5 }
 0x79e   : > { %1347 = vmatpush.msrb.mxu3 %v1322_v12 }
 0x79f   : > { %2903 = vmatmul.msk.f32.vlgmr.msrb.gmra.mxu3 %vm359_vm1, %v260_v16 }
 0x7a0   : > { %1414 = vmatpush.msra.mxu3 %v1362_v17 }
 0x7a2   : > { %1415 = vmatpush.msra.mxu3 %v1361_v18 }
 0x7a4   : > { %1416 = vmatpush.msra.mxu3 %v1360_v20  ;;  %v3023_v20 = vld [vmem:[%s4333_s3 + $0xb] ss:$0 sm:$0xff] }
 0x7a6   : > { %1417 = vmatpush.msra.mxu3 %v1359_v19 }
 0x7a7   : > { %2904 = vmatmul.msk.f32.gmra.mxu3 %vm359_vm1, %v261_v22 }
 0x7a8   : > { %1632 = vmatpush.msrb.mxu3 %v1604_v23  ;;  %v1608_v23 = vld [vmem:[%s4332_s2 + $0x158] sm:$0xff] }
 0x7aa   : > { %1633 = vmatpush.msrb.mxu3 %v1603_v59  ;;  %v1607_v59 = vld [vmem:[%s4332_s2 + $0x150] sm:$0xff] }
 0x822   : > { %v1349_v24 = vpop.f32.mrf.mxu3 }
 0x823   : > { %2907 = vmatmul.msk.f32.vlgmr.msra.gmra.mxu3 %vm359_vm1, %v1349_v24 }
 0x82a   : > { %v1352_v25 = vpop.f32.mrf.mxu3 }
 0x82b   : > { %1387 = vmatpush.msra.mxu2 %v1352_v25  ;;  %2908 = vmatmul.msk.f32.gmra.mxu3 %vm359_vm1, %v1352_v25 }
 0x82d   : > { %1388 = vmatpush.msra.mxu2 %v1349_v24 }
 0x82e   : > { %2905 = vmatmul.msk.f32.vlgmr.msra.gmra.mxu2 %vm1366_vm6, %v3784_v26 }
 0x82f   : > { %1443 = vmatpush.msrb.mxu2 %v1358_v13  ;;  %v3024_v13 = vld [vmem:[%s4333_s3 + $0xc] ss:$0 sm:$0xff] }
 0x831   : > { %1444 = vmatpush.msrb.mxu2 %v1357_v27 }
 0x833   : > { %1445 = vmatpush.msrb.mxu2 %v1356_v35 }
 0x835   : > { %1446 = vmatpush.msrb.mxu2 %v1355_v37 }
 0x836   : > { %2906 = vmatmul.msk.f32.gmra.mxu2 %vm1366_vm6, %v3801_v36 }
 0x8a6   : > { %v1419_v40 = vpop.f32.mrf.mxu3 }
 0x8ae   : > { %v1422_v50 = vpop.f32.mrf.mxu3 }
 0x8b1   : > { %v1390_v33 = vpop.f32.mrf.mxu2 }
 0x8b2   : > { %2909 = vmatmul.msk.f32.vlgmr.msrb.gmra.mxu2 %vm359_vm1, %v1390_v33 }
 0x8b9   : > { %v1393_v39 = vpop.f32.mrf.mxu2 }
 0x8ba   : > { %2910 = vmatmul.msk.f32.gmra.mxu2 %vm359_vm1, %v1393_v39 }
 0x935   : > { %v1448_v41 = vpop.f32.mrf.mxu2 }
 0x936   : > { %v1449_v42 = vadd.f32 %v1448_v41, %v1419_v40 }
 0x938   : > { %v1455_v21 = vadd.f32 %v3022_v58, %v1449_v42 }
 0x93a   : > { %v1457_v3 = vmax.f32 %v1455_v21, 0.0  ;;  %v1602_v21 = vld [vmem:[%s4332_s2 + $0x130] sm:$0xff] }
 0x93b   : > { %1634 = vmatpush.msrb.mxu3 %v1602_v21  ;;  %v1732_v21 = vld [vmem:[%s4332_s2 + $0x220] sm:$0xff] }
 0x93c   : > { %v1459_v44 = vsel %vm359_vm1, %v1457_v3, 0.0  ;;  %1777 = vmatpush.msra.mxu1 %v1732_v21 }
 0x93d   : > { %v1451_v34 = vpop.f32.mrf.mxu2  ;;  %1460 = vadd.xlane.f32.xlu1 %v1459_v44  ;;  %v1609_v44 = vld [vmem:[%s4332_s2 + $0x160] sm:$0xff] }
 0x93e   : > { %v1452_v45 = vadd.f32 %v1451_v34, %v1422_v50  ;;  %1664 = vmatpush.msra.mxu2 %v1609_v44  ;;  %v3025_v50 = vld [vmem:[%s4333_s3 + $0xd] ss:$0 sm:$0xff]  ;;  %v3026_v34 = vld [vmem:[%s4333_s3 + $0xe] ss:$0 sm:$0xff]  ;;  %v1730_v44 = vld [vmem:[%s4332_s2 + $0x210] sm:$0xff] }
 0x940   : > { %v1456_v46 = vadd.f32 %v3022_v58, %v1452_v45  ;;  %1665 = vmatpush.msra.mxu2 %v1608_v23 }
 0x942   : > { %v1458_v47 = vmax.f32 %v1456_v46, 0.0  ;;  %1666 = vmatpush.msra.mxu2 %v1607_v59 }
 0x944   : > { %v1462_v48 = vsel %vm359_vm1, %v1458_v47, 0.0 }
 0x945   : > { %1463 = vadd.xlane.f32.xlu2 %v1462_v48 }
 0x9b0   : > { %v1461_v52 = vpop.xlane.xlu1 %1460 }
 0x9b1   : > { %v1465_v53 = vmul.f32 %v1461_v52, %v3235_v6 }
 0x9b3   : > { %v1467_v54 = vsub.f32 %v1457_v3, %v1465_v53  ;;  %v1601_v3 = vld [vmem:[%s4332_s2 + $0x128] sm:$0xff] }
 0x9b4   : > { %1635 = vmatpush.msrb.mxu3 %v1601_v3  ;;  %v1731_v3 = vld [vmem:[%s4332_s2 + $0x218] sm:$0xff] }
 0x9b5   : > { %v1469_v31 = vmul.f32 %v1467_v54, %v1467_v54  ;;  %1778 = vmatpush.msra.mxu1 %v1731_v3 }
 0x9b7   : > { %v1471_v55 = vsel %vm359_vm1, %v1469_v31, 0.0  ;;  %1779 = vmatpush.msra.mxu1 %v1730_v44 }
 0x9b8   : > { %v1464_v56 = vpop.xlane.xlu2 %1463  ;;  %1472 = vadd.xlane.f32.xlu0 %v1471_v55 }
 0x9b9   : > { %v1466_v57 = vmul.f32 %v1464_v56, %v3235_v6 }
 0x9bb   : > { %v1468_v60 = vsub.f32 %v1458_v47, %v1466_v57 }
 0x9bd   : > { %v1470_v61 = vmul.f32 %v1468_v60, %v1468_v60 }
 0x9bf   : > { %v1474_v63 = vsel %vm359_vm1, %v1470_v61, 0.0 }
 0x9c0   : > { %1475 = vadd.xlane.f32.xlu1 %v1474_v63 }
 0xa2b   : > { %v1473_v28 = vpop.xlane.xlu0 %1472 }
 0xa2c   : > { %v1477_v14 = vmul.f32 %v1473_v28, %v3235_v6 }
 0xa2e   : > { %v1479_v11 = vadd.f32 1e-05, %v1477_v14 }
 0xa30   : > { %3084 = vrsqrt.f32 %v1479_v11  ;;  %vm1487_vm8 = vweird.f32 %v1479_v11 }
 0xa33   : > { %v1476_v51 = vpop.xlane.xlu1 %1475 }
 0xa34   : > { %v1478_v9 = vmul.f32 %v1476_v51, %v3235_v6  ;;  %v1606_v51 = vld [vmem:[%s4332_s2 + $0x148] sm:$0xff] }
 0xa35   : > { %1667 = vmatpush.msra.mxu2 %v1606_v51 }
 0xa36   : > { %v3085_v10 = vpop.eup %3084  ;;  %v1480_v15 = vadd.f32 1e-05, %v1478_v9  ;;  %v3027_v9 = vld [vmem:[%s4333_s3 + $0xf] ss:$0 sm:$0xff] }
 0xa37   : > { %v1482_v7 = vmul.f32 %v3085_v10, %v1479_v11  ;;  %vm1488_vm7 = vweird.f32 %v3085_v10 }
 0xa38   : > { %3086 = vrsqrt.f32 %v1480_v15  ;;  %vm1489_vm9 = vmor %vm1487_vm8, %vm1488_vm7  ;;  %vm1497_vm11 = vweird.f32 %v1480_v15 }
 0xa39   : > { %v1483_v62 = vmul.f32 %v3085_v10, %v1482_v7 }
 0xa3b   : > { %v1484_v12 = vmul.f32 0.5, %v1483_v62 }
 0xa3d   : > { %v1485_v16 = vsub.f32 1.5, %v1484_v12 }
 0xa3e   : > { %v3087_v22 = vpop.eup %3086 }
 0xa3f   : > { %v1486_v17 = vmul.f32 %v3085_v10, %v1485_v16  ;;  %v1492_v18 = vmul.f32 %v3087_v22, %v1480_v15  ;;  %vm1498_vm10 = vweird.f32 %v3087_v22 }
 0xa40   : > { %vm1499_vm13 = vmor %vm1497_vm11, %vm1498_vm10 }
 0xa41   : > { %v1490_v19 = vsel %vm1489_vm9, %v3085_v10, %v1486_v17  ;;  %v1493_v24 = vmul.f32 %v3087_v22, %v1492_v18 }
 0xa42   : > { %v1501_v25 = vmul.f32 %v1490_v19, %v1467_v54 }
 0xa43   : > { %v1494_v27 = vmul.f32 0.5, %v1493_v24 }
 0xa44   : > { %v1504_v35 = vmul.f32 %v3023_v20, %v1501_v25 }
 0xa45   : > { %v1495_v37 = vsub.f32 1.5, %v1494_v27 }
 0xa46   : > { %v1507_v33 = vadd.f32 %v3024_v13, %v1504_v35 }
 0xa47   : > { %v1496_v39 = vmul.f32 %v3087_v22, %v1495_v37 }
 0xa48   : > { %2911 = vmatmul.msk.f32.vlgmr.msra.gmra.mxu0 %vm359_vm1, %v1507_v33  ;;  %2913 = vmatmul.msk.f32.vlgmr.msrb.gmra.mxu1 %vm359_vm1, %v1507_v33 }
 0xa49   : > { %v1500_v40 = vsel %vm1499_vm13, %v3087_v22, %v1496_v39  ;;  %v3028_v22 = vld [vmem:[%s4333_s3 + $0x10] ss:$0 sm:$0xff] }
 0xa4a   : > { %v1502_v58 = vmul.f32 %v1500_v40, %v1468_v60 }
 0xa4c   : > { %v1505_v41 = vmul.f32 %v3023_v20, %v1502_v58 }
 0xa4e   : > { %v1508_v42 = vadd.f32 %v3024_v13, %v1505_v41 }
 0xa50   : > { %2912 = vmatmul.msk.f32.gmra.mxu0 %vm359_vm1, %v1508_v42  ;;  %2914 = vmatmul.msk.f32.gmra.mxu1 %vm359_vm1, %v1508_v42 }
 0xac5   : > { %v1538_v45 = vpop.f32.mrf.mxu0  ;;  %v1567_v46 = vpop.f32.mrf.mxu1 }
 0xac6   : > { %v1539_v47 = vadd.f32 %v3025_v50, %v1538_v45  ;;  %v1568_v48 = vadd.f32 %v3026_v34, %v1567_v46 }
 0xac8   : > { %v1575_v52 = vmul.f32 %v1539_v47, %v1539_v47  ;;  %v1573_v53 = vadd.f32 1.0, %v1568_v48  ;;  %v1579_v54 = vmul.f32 1.442695, %v1568_v48  ;;  %2915 = vmatmul.msk.f32.vlgmr.msrb.gmra.mxu3 %vm359_vm1, %v1539_v47 }
 0xaca   : > { %v1577_v31 = vsub.f32 %v1573_v53, %v1575_v52  ;;  %3088 = vpow2.f32 %v1579_v54 }
 0xacd   : > { %v1541_v55 = vpop.f32.mrf.mxu0  ;;  %v1570_v56 = vpop.f32.mrf.mxu1 }
 0xace   : > { %v1542_v57 = vadd.f32 %v3025_v50, %v1541_v55  ;;  %v1571_v60 = vadd.f32 %v3026_v34, %v1570_v56  ;;  %v1729_v50 = vld [vmem:[%s4332_s2 + $0x208] sm:$0xff] }
 0xacf   : > { %1780 = vmatpush.msra.mxu1 %v1729_v50 }
 0xad0   : > { %v3089_v61 = vpop.eup %3088  ;;  %v1581_v63 = vmul.f32 1.442695, %v1571_v60  ;;  %2916 = vmatmul.msk.f32.gmra.mxu3 %vm359_vm1, %v1542_v57  ;;  %v1576_v0 = vmul.f32 %v1542_v57, %v1542_v57  ;;  %v1574_v43 = vadd.f32 1.0, %v1571_v60 }
 0xad1   : > { %v1583_v49 = vsub.f32 %v1577_v31, %v3089_v61 }
 0xad2   : > { %3090 = vpow2.f32 %v1581_v63  ;;  %v1578_v1 = vsub.f32 %v1574_v43, %v1576_v0  ;;  %v3029_v63 = vld [vmem:[%s4333_s3 + $0x11] ss:$0 sm:$0xff] }
 0xad3   : > { %v1585_v5 = vmul.f32 -0.5, %v1583_v49 }
 0xad5   : > { %v1587_v28 = vsel %vm359_vm1, %v1585_v5, 0.0 }
 0xad8   : > { %v3091_v2 = vpop.eup %3090 }
 0xad9   : > { %v1584_v4 = vsub.f32 %v1578_v1, %v3091_v2  ;;  %v3030_v1 = vld [vmem:[%s4333_s3 + $0x12] ss:$0 sm:$0xff] }
 0xadb   : > { %v1586_v8 = vmul.f32 -0.5, %v1584_v4 }
 0xadd   : > { %v1588_v14 = vsel %vm359_vm1, %v1586_v8, 0.0 }
 0xade   : > { %v3880_v11 = vadd.f32 %v1588_v14, %v1587_v28 }
 0xb4b   : > { %v1637_v10 = vpop.f32.mrf.mxu3 }
 0xb4c   : > { %v1638_v15 = vadd.f32 %v3027_v9, %v1637_v10  ;;  %v1727_v10 = vld [vmem:[%s4332_s2 + $0x1f8] sm:$0xff] }
 0xb4e   : > { %v1643_v7 = vmax.f32 %v1638_v15, 0.0  ;;  %v1726_v15 = vld [vmem:[%s4332_s2 + $0x1f0] sm:$0xff] }
 0xb50   : > { %2917 = vmatmul.msk.f32.vlgmr.msra.gmra.mxu2 %vm359_vm1, %v1643_v7 }
 0xb53   : > { %v1640_v62 = vpop.f32.mrf.mxu3 }
 0xb54   : > { %v1641_v12 = vadd.f32 %v3027_v9, %v1640_v62  ;;  %v1728_v9 = vld [vmem:[%s4332_s2 + $0x200] sm:$0xff] }
 0xb55   : > { %1806 = vmatpush.msra.mxu3 %v1728_v9  ;;  %v271_v9 = vld [vmem:[%s4331_s1 + $0xe8] sm:$0xff] }
 0xb56   : > { %v1644_v16 = vmax.f32 %v1641_v12, 0.0  ;;  %v3031_v12 = vld [vmem:[%s4333_s3 + $0x19] ss:$0 sm:$0xff] }
 0xb57   : > { %1807 = vmatpush.msra.mxu3 %v1727_v10  ;;  %v272_v10 = vld [vmem:[%s4331_s1 + $0xf0] sm:$0xff] }
 0xb58   : > { %2918 = vmatmul.msk.f32.gmra.mxu2 %vm359_vm1, %v1644_v16 }
 0xb59   : > { %1808 = vmatpush.msra.mxu3 %v1726_v15  ;;  %v273_v15 = vld [vmem:[%s4331_s1 + $0xf8] sm:$0xff] }
 0xbd3   : > { %v1669_v17 = vpop.f32.mrf.mxu2 }
 0xbd4   : > { %v1670_v18 = vadd.f32 %v3028_v22, %v1669_v17 }
 0xbd6   : > { %v1675_v20 = vsel %vm359_vm1, %v1670_v18, 0.0 }
 0xbd7   : > { %1676 = vadd.xlane.f32.xlu0 %v1675_v20 }
 0xbdb   : > { %v1672_v19 = vpop.f32.mrf.mxu2 }
 0xbdc   : > { %v1673_v24 = vadd.f32 %v3028_v22, %v1672_v19 }
 0xbde   : > { %v1678_v25 = vsel %vm359_vm1, %v1673_v24, 0.0 }
 0xbdf   : > { %1679 = vadd.xlane.f32.xlu2 %v1678_v25 }
 0xc4a   : > { %v1677_v13 = vpop.xlane.xlu0 %1676 }
 0xc4b   : > { %v1681_v27 = vmul.f32 %v1677_v13, %v3235_v6 }
 0xc4d   : > { %v1683_v35 = vsub.f32 %v1670_v18, %v1681_v27 }
 0xc4f   : > { %v1685_v37 = vmul.f32 %v1683_v35, %v1683_v35 }
 0xc51   : > { %v1687_v33 = vsel %vm359_vm1, %v1685_v37, 0.0 }
 0xc52   : > { %1688 = vadd.xlane.f32.xlu2 %v1687_v33  ;;  %v1680_v39 = vpop.xlane.xlu2 %1679 }
 0xc53   : > { %v1682_v40 = vmul.f32 %v1680_v39, %v3235_v6 }
 0xc55   : > { %v1684_v58 = vsub.f32 %v1673_v24, %v1682_v40 }
 0xc57   : > { %v1686_v41 = vmul.f32 %v1684_v58, %v1684_v58 }
 0xc59   : > { %v1690_v42 = vsel %vm359_vm1, %v1686_v41, 0.0 }
 0xc5a   : > { %1691 = vadd.xlane.f32.xlu1 %v1690_v42 }
 0xcc5   : > { %v1689_v34 = vpop.xlane.xlu2 %1688 }
 0xcc6   : > { %v1693_v45 = vmul.f32 %v1689_v34, %v3235_v6 }
 0xcc8   : > { %v1695_v46 = vadd.f32 1e-05, %v1693_v45 }
 0xcca   : > { %3092 = vrsqrt.f32 %v1695_v46  ;;  %vm1703_vm15 = vweird.f32 %v1695_v46 }
 0xccd   : > { %v1692_v47 = vpop.xlane.xlu1 %1691 }
 0xcce   : > { %v1694_v48 = vmul.f32 %v1692_v47, %v3235_v6 }
 0xcd0   : > { %v3093_v52 = vpop.eup %3092  ;;  %v1696_v53 = vadd.f32 1e-05, %v1694_v48 }
 0xcd1   : > { %v1698_v54 = vmul.f32 %v3093_v52, %v1695_v46  ;;  %vm1704_vm14 = vweird.f32 %v3093_v52 }
 0xcd2   : > { %3094 = vrsqrt.f32 %v1696_v53  ;;  %vm1705_vm0 = vmor %vm1703_vm15, %vm1704_vm14  ;;  %vm1713_vm3 = vweird.f32 %v1696_v53 }
 0xcd3   : > { %v1699_v31 = vmul.f32 %v3093_v52, %v1698_v54 }
 0xcd5   : > { %v1700_v55 = vmul.f32 0.5, %v1699_v31 }
 0xcd7   : > { %v1701_v56 = vsub.f32 1.5, %v1700_v55 }
 0xcd8   : > { %v3095_v57 = vpop.eup %3094 }
 0xcd9   : > { %v1702_v60 = vmul.f32 %v3093_v52, %v1701_v56  ;;  %v1708_v61 = vmul.f32 %v3095_v57, %v1696_v53  ;;  %vm1714_vm2 = vweird.f32 %v3095_v57 }
 0xcda   : > { %vm1715_vm4 = vmor %vm1713_vm3, %vm1714_vm2 }
 0xcdb   : > { %v1706_v49 = vsel %vm1705_vm0, %v3093_v52, %v1702_v60  ;;  %v1709_v0 = vmul.f32 %v3095_v57, %v1708_v61 }
 0xcdc   : > { %v1717_v43 = vmul.f32 %v1706_v49, %v1683_v35 }
 0xcdd   : > { %v1710_v2 = vmul.f32 0.5, %v1709_v0 }
 0xcde   : > { %v1720_v4 = vmul.f32 %v3029_v63, %v1717_v43 }
 0xcdf   : > { %v1711_v5 = vsub.f32 1.5, %v1710_v2 }
 0xce0   : > { %v1723_v8 = vadd.f32 %v3030_v1, %v1720_v4 }
 0xce1   : > { %v1712_v28 = vmul.f32 %v3095_v57, %v1711_v5 }
 0xce2   : > { %2921 = vmatmul.msk.f32.vlgmr.msra.gmra.mxu1 %vm359_vm1, %v1723_v8 }
 0xce3   : > { %v1716_v14 = vsel %vm1715_vm4, %v3095_v57, %v1712_v28  ;;  %v3033_v28 = vld [vmem:[%s4333_s3 + $0x1b] ss:$0 sm:$0xff] }
 0xce4   : > { %v1718_v23 = vmul.f32 %v1716_v14, %v1684_v58 }
 0xce6   : > { %v1721_v59 = vmul.f32 %v3029_v63, %v1718_v23 }
 0xce8   : > { %v1724_v51 = vadd.f32 %v3030_v1, %v1721_v59  ;;  %v3032_v1 = vld [vmem:[%s4333_s3 + $0x1a] ss:$0 sm:$0xff] }
 0xcea   : > { %1750 = vmatpush.msrb.mxu0 %v1724_v51  ;;  %2922 = vmatmul.msk.f32.gmra.mxu1 %vm359_vm1, %v1724_v51  ;;  %v270_v51 = vld [vmem:[%s4331_s1 + $0xe0] sm:$0xff] }
 0xcec   : > { %1751 = vmatpush.msrb.mxu0 %v1723_v8 }
 0xced   : > { %2919 = vmatmul.msk.f32.vlgmr.msrb.gmra.mxu0 %vm1366_vm6, %v3784_v26  ;;  %v1725_v26 = vld [vmem:[%s4332_s2 + $0x1e8] sm:$0xff] }
 0xcee   : > { %1809 = vmatpush.msra.mxu3 %v1725_v26 }
 0xcf5   : > { %2920 = vmatmul.msk.f32.gmra.mxu0 %vm1366_vm6, %v3801_v36 }
 0xd5f   : > { %v1782_v62 = vpop.f32.mrf.mxu1 }
 0xd67   : > { %v1785_v19 = vpop.f32.mrf.mxu1 }
 0xd6a   : > { %v1753_v36 = vpop.f32.mrf.mxu0 }
 0xd6b   : > { %2923 = vmatmul.msk.f32.vlgmr.msra.gmra.mxu3 %vm359_vm1, %v1753_v36 }
 0xd72   : > { %v1756_v7 = vpop.f32.mrf.mxu0 }
 0xd73   : > { %2924 = vmatmul.msk.f32.gmra.mxu3 %vm359_vm1, %v1756_v7 }
 0xdee   : > { %v1811_v16 = vpop.f32.mrf.mxu3 }
 0xdef   : > { %v1812_v22 = vadd.f32 %v1811_v16, %v1782_v62  ;;  %v1919_v16 = vld [vmem:[%s4332_s2 + $0x1d8] sm:$0xff] }
 0xdf1   : > { %v1818_v17 = vadd.f32 %v3031_v12, %v1812_v22  ;;  %v1918_v22 = vld [vmem:[%s4332_s2 + $0x1d0] sm:$0xff] }
 0xdf3   : > { %v1820_v18 = vmax.f32 %v1818_v17, 0.0  ;;  %v1917_v17 = vld [vmem:[%s4332_s2 + $0x1c8] sm:$0xff] }
 0xdf5   : > { %v1822_v20 = vsel %vm359_vm1, %v1820_v18, 0.0 }
 0xdf6   : > { %1823 = vadd.xlane.f32.xlu1 %v1822_v20  ;;  %v1814_v24 = vpop.f32.mrf.mxu3  ;;  %v1914_v20 = vld [vmem:[%s4332_s2 + $0x1b0] sm:$0xff] }
 0xdf7   : > { %v1815_v25 = vadd.f32 %v1814_v24, %v1785_v19 }
 0xdf9   : > { %v1819_v13 = vadd.f32 %v3031_v12, %v1815_v25  ;;  %v1920_v12 = vld [vmem:[%s4332_s2 + $0x1e0] sm:$0xff] }
 0xdfb   : > { %v1821_v27 = vmax.f32 %v1819_v13, 0.0 }
 0xdfd   : > { %v1825_v35 = vsel %vm359_vm1, %v1821_v27, 0.0 }
 0xdfe   : > { %1826 = vadd.xlane.f32.xlu0 %v1825_v35 }
 0xe69   : > { %v1824_v37 = vpop.xlane.xlu1 %1823 }
 0xe6a   : > { %v1828_v33 = vmul.f32 %v1824_v37, %v3235_v6  ;;  %v3034_v37 = vld [vmem:[%s4333_s3 + $0x16] ss:$0 sm:$0xff] }
 0xe6c   : > { %v1830_v39 = vsub.f32 %v1820_v18, %v1828_v33  ;;  %v1915_v18 = vld [vmem:[%s4332_s2 + $0x1b8] sm:$0xff] }
 0xe6e   : > { %v1832_v40 = vmul.f32 %v1830_v39, %v1830_v39 }
 0xe70   : > { %v1834_v58 = vsel %vm359_vm1, %v1832_v40, 0.0 }
 0xe71   : > { %1835 = vadd.xlane.f32.xlu0 %v1834_v58  ;;  %v1827_v41 = vpop.xlane.xlu0 %1826 }
 0xe72   : > { %v1829_v42 = vmul.f32 %v1827_v41, %v3235_v6 }
 0xe74   : > { %v1831_v21 = vsub.f32 %v1821_v27, %v1829_v42 }
 0xe76   : > { %v1833_v3 = vmul.f32 %v1831_v21, %v1831_v21 }
 0xe78   : > { %v1837_v44 = vsel %vm359_vm1, %v1833_v3, 0.0 }
 0xe79   : > { %1838 = vadd.xlane.f32.xlu2 %v1837_v44 }
 0xee4   : > { %v1836_v50 = vpop.xlane.xlu0 %1835 }
 0xee5   : > { %v1840_v34 = vmul.f32 %v1836_v50, %v3235_v6 }
 0xee7   : > { %v1842_v45 = vadd.f32 1e-05, %v1840_v34 }
 0xee9   : > { %3096 = vrsqrt.f32 %v1842_v45  ;;  %vm1850_vm7 = vweird.f32 %v1842_v45 }
 0xeec   : > { %v1839_v46 = vpop.xlane.xlu2 %1838 }
 0xeed   : > { %v1841_v47 = vmul.f32 %v1839_v46, %v3235_v6 }
 0xeef   : > { %v3097_v48 = vpop.eup %3096  ;;  %v1843_v52 = vadd.f32 1e-05, %v1841_v47 }
 0xef0   : > { %v1845_v53 = vmul.f32 %v3097_v48, %v1842_v45  ;;  %vm1851_vm5 = vweird.f32 %v3097_v48 }
 0xef1   : > { %3098 = vrsqrt.f32 %v1843_v52  ;;  %vm1852_vm8 = vmor %vm1850_vm7, %vm1851_vm5  ;;  %vm1860_vm10 = vweird.f32 %v1843_v52 }
 0xef2   : > { %v1846_v54 = vmul.f32 %v3097_v48, %v1845_v53 }
 0xef4   : > { %v1847_v31 = vmul.f32 0.5, %v1846_v54 }
 0xef6   : > { %v1848_v55 = vsub.f32 1.5, %v1847_v31 }
 0xef7   : > { %v3099_v56 = vpop.eup %3098 }
 0xef8   : > { %v1855_v57 = vmul.f32 %v3099_v56, %v1843_v52  ;;  %v1849_v60 = vmul.f32 %v3097_v48, %v1848_v55  ;;  %vm1861_vm9 = vweird.f32 %v3099_v56 }
 0xef9   : > { %vm1862_vm11 = vmor %vm1860_vm10, %vm1861_vm9 }
 0xefa   : > { %v1856_v61 = vmul.f32 %v3099_v56, %v1855_v57  ;;  %v1853_v49 = vsel %vm1852_vm8, %v3097_v48, %v1849_v60 }
 0xefb   : > { %v1864_v2 = vmul.f32 %v1853_v49, %v1830_v39 }
 0xefc   : > { %v1857_v63 = vmul.f32 0.5, %v1856_v61 }
 0xefd   : > { %v1867_v14 = vmul.f32 %v3032_v1, %v1864_v2 }
 0xefe   : > { %v1858_v0 = vsub.f32 1.5, %v1857_v63 }
 0xeff   : > { %v1870_v59 = vadd.f32 %v3033_v28, %v1867_v14 }
 0xf00   : > { %v1859_v43 = vmul.f32 %v3099_v56, %v1858_v0 }
 0xf02   : > { %v1863_v4 = vsel %vm1862_vm11, %v3099_v56, %v1859_v43 }
 0xf03   : > { %v1865_v5 = vmul.f32 %v1863_v4, %v1831_v21 }
 0xf05   : > { %v1868_v8 = vmul.f32 %v3032_v1, %v1865_v5 }
 0xf07   : > { %v1871_v23 = vadd.f32 %v3033_v28, %v1868_v8 }
 0xf09   : > { %1898 = vmatpush.msrb.mxu2 %v1871_v23 }
 0xf0b   : > { %1899 = vmatpush.msrb.mxu2 %v1870_v59 }
 0xf0c   : > { %2925 = vmatmul.msk.f32.vlgmr.msrb.gmra.mxu2 %vm1366_vm6, %v270_v51 }
 0xf14   : > { %2926 = vmatmul.msk.f32.gmra.mxu2 %vm1366_vm6, %v271_v9 }
 0xf1c   : > { %2927 = vmatmul.msk.f32.gmra.mxu2 %vm1366_vm6, %v272_v10 }
 0xf24   : > { %2928 = vmatmul.msk.f32.gmra.mxu2 %vm1366_vm6, %v273_v15 }
 0xf8f   : > { %v1901_v26 = vpop.f32.mrf.mxu2 }
 0xf97   : > { %v1904_v36 = vpop.f32.mrf.mxu2 }
 0xf9f   : > { %v1907_v7 = vpop.f32.mrf.mxu2 }
 0xfa7   : > { %v1910_v62 = vpop.f32.mrf.mxu2 }
 0xfa8   : > { %1936 = vmatpush.msrb.mxu1 %v1910_v62 }
 0xfaa   : > { %1937 = vmatpush.msrb.mxu1 %v1907_v7 }
 0xfac   : > { %1938 = vmatpush.msrb.mxu1 %v1904_v36 }
 0xfae   : > { %1939 = vmatpush.msrb.mxu1 %v1901_v26 }
 0xfaf   : > { %2929 = vmatmul.msk.f32.vlgmr.msrb.gmra.mxu1 %vm359_vm1, %v3679_v29  ;;  %v1916_v29 = vld [vmem:[%s4332_s2 + $0x1c0] sm:$0xff] }
 0xfb0   : > { %1977 = vmatpush.msra.mxu1 %v1920_v12  ;;  %2018 = vmatpush.msrb.mxu3 %v1916_v29 }
 0xfb2   : > { %1978 = vmatpush.msra.mxu1 %v1919_v16  ;;  %2019 = vmatpush.msrb.mxu3 %v1915_v18 }
 0xfb4   : > { %1979 = vmatpush.msra.mxu1 %v1918_v22  ;;  %2020 = vmatpush.msrb.mxu3 %v1914_v20 }
 0xfb6   : > { %1980 = vmatpush.msra.mxu1 %v1917_v17 }
 0xfb7   : > { %2930 = vmatmul.msk.f32.gmra.mxu1 %vm359_vm1, %v3686_v30  ;;  %v1913_v30 = vld [vmem:[%s4332_s2 + $0x1a8] sm:$0xff] }
 0xfb8   : > { %2021 = vmatpush.msrb.mxu3 %v1913_v30 }
 0xfbf   : > { %2931 = vmatmul.msk.f32.gmra.mxu1 %vm359_vm1, %v3693_v32 }
 0xfc7   : > { %2932 = vmatmul.msk.f32.gmra.mxu1 %vm359_vm1, %v3700_v38 }
 0xfcf   : > { %2933 = vmatmul.msk.f32.vlgmr.msra.gmra.mxu1 %vm359_vm1, %v1901_v26 }
 0xfd7   : > { %2934 = vmatmul.msk.f32.gmra.mxu1 %vm359_vm1, %v1904_v36 }
 0xfdf   : > { %2935 = vmatmul.msk.f32.gmra.mxu1 %vm359_vm1, %v1907_v7 }
 0xfe7   : > { %2936 = vmatmul.msk.f32.gmra.mxu1 %vm359_vm1, %v1910_v62 }
0x102c   : > { %v1941_v32 = vpop.f32.mrf.mxu1 }
0x102d   : > { %2937 = vmatmul.msk.f32.vlgmr.msrb.gmra.mxu3 %vm359_vm1, %v1941_v32 }
0x1034   : > { %v1944_v38 = vpop.f32.mrf.mxu1 }
0x1035   : > { %2938 = vmatmul.msk.f32.gmra.mxu3 %vm359_vm1, %v1944_v38 }
0x103c   : > { %v1947_v19 = vpop.f32.mrf.mxu1 }
0x103d   : > { %2939 = vmatmul.msk.f32.gmra.mxu3 %vm359_vm1, %v1947_v19 }
0x1044   : > { %v1950_v24 = vpop.f32.mrf.mxu1 }
0x1045   : > { %2940 = vmatmul.msk.f32.gmra.mxu3 %vm359_vm1, %v1950_v24 }
0x104c   : > { %v1982_v25 = vpop.f32.mrf.mxu1 }
0x1054   : > { %v1985_v27 = vpop.f32.mrf.mxu1 }
0x105c   : > { %v1988_v58 = vpop.f32.mrf.mxu1 }
0x1064   : > { %v1991_v34 = vpop.f32.mrf.mxu1 }
0x10b0   : > { %v2023_v13 = vpop.f32.mrf.mxu3 }
0x10b1   : > { %v2024_v47 = vadd.f32 %v2023_v13, %v1982_v25 }
0x10b3   : > { %v2036_v53 = vadd.f32 %v3034_v37, %v2024_v47 }
0x10b5   : > { %v2040_v31 = vmax.f32 %v2036_v53, 0.0  ;;  %v3035_v53 = vld [vmem:[%s4333_s3 + $0x17] ss:$0 sm:$0xff] }
0x10b7   : > { %v2044_v55 = vsel %vm359_vm1, %v2040_v31, 0.0 }
0x10b8   : > { %v2026_v35 = vpop.f32.mrf.mxu3 }
0x10b9   : > { %v2027_v33 = vadd.f32 %v2026_v35, %v1985_v27 }
0x10bb   : > { %v2037_v39 = vadd.f32 %v3034_v37, %v2027_v33 }
0x10bd   : > { %v2041_v40 = vmax.f32 %v2037_v39, 0.0 }
0x10bf   : > { %v2047_v41 = vsel %vm359_vm1, %v2041_v40, 0.0 }
0x10c0   : > { %v2029_v42 = vpop.f32.mrf.mxu3  ;;  %2048 = vadd.xlane.f32.xlu0 %v2047_v41 }
0x10c1   : > { %v2030_v21 = vadd.f32 %v2029_v42, %v1988_v58 }
0x10c3   : > { %v2038_v3 = vadd.f32 %v3034_v37, %v2030_v21 }
0x10c5   : > { %v2042_v44 = vmax.f32 %v2038_v3, 0.0 }
0x10c7   : > { %v2050_v50 = vsel %vm359_vm1, %v2042_v44, 0.0 }
0x10c8   : > { %v2032_v45 = vpop.f32.mrf.mxu3  ;;  %2051 = vadd.xlane.f32.xlu2 %v2050_v50 }
0x10c9   : > { %v2033_v46 = vadd.f32 %v2032_v45, %v1991_v34 }
0x10cb   : > { %v2039_v48 = vadd.f32 %v3034_v37, %v2033_v46 }
0x10cd   : > { %v2043_v52 = vmax.f32 %v2039_v48, 0.0 }
0x10cf   : > { %v2053_v54 = vsel %vm359_vm1, %v2043_v52, 0.0 }
0x10d0   : > { %2054 = vadd.xlane.f32.xlu1 %v2053_v54 }
0x10d8   : > { %2045 = vadd.xlane.f32.xlu1 %v2044_v55 }
0x1133   : > { %v2049_v56 = vpop.xlane.xlu0 %2048 }
0x1134   : > { %v2057_v57 = vmul.f32 %v2049_v56, %v3235_v6  ;;  %v3036_v56 = vld [vmem:[%s4333_s3 + $0x18] ss:$0 sm:$0xff] }
0x1136   : > { %v4026_v60 = vsub.f32 %v2041_v40, %v2057_v57 }
0x1138   : > { %v2065_v61 = vmul.f32 %v4026_v60, %v4026_v60 }
0x113a   : > { %v2071_v63 = vsel %vm359_vm1, %v2065_v61, 0.0 }
0x113b   : > { %v2052_v49 = vpop.xlane.xlu2 %2051  ;;  %2072 = vadd.xlane.f32.xlu1 %v2071_v63 }
0x113c   : > { %v2058_v0 = vmul.f32 %v2052_v49, %v3235_v6 }
0x113e   : > { %v4032_v43 = vsub.f32 %v2042_v44, %v2058_v0 }
0x1140   : > { %v2066_v1 = vmul.f32 %v4032_v43, %v4032_v43 }
0x1142   : > { %v2074_v2 = vsel %vm359_vm1, %v2066_v1, 0.0 }
0x1143   : > { %2075 = vadd.xlane.f32.xlu0 %v2074_v2  ;;  %v2055_v4 = vpop.xlane.xlu1 %2054 }
0x1144   : > { %v2059_v5 = vmul.f32 %v2055_v4, %v3235_v6 }
0x1146   : > { %v2063_v8 = vsub.f32 %v2043_v52, %v2059_v5 }
0x1148   : > { %v2067_v28 = vmul.f32 %v2063_v8, %v2063_v8 }
0x114a   : > { %v2077_v14 = vsel %vm359_vm1, %v2067_v28, 0.0  ;;  %v263_v28 = vld [vmem:[%s4331_s1 + $0xa8] sm:$0xff] }
0x114b   : > { %2078 = vadd.xlane.f32.xlu2 %v2077_v14  ;;  %v2046_v23 = vpop.xlane.xlu1 %2045  ;;  %v264_v14 = vld [vmem:[%s4331_s1 + $0xb0] sm:$0xff] }
0x114c   : > { %v2056_v59 = vmul.f32 %v2046_v23, %v3235_v6  ;;  %v265_v23 = vld [vmem:[%s4331_s1 + $0xb8] sm:$0xff] }
0x114e   : > { %v4040_v51 = vsub.f32 %v2040_v31, %v2056_v59  ;;  %v266_v59 = vld [vmem:[%s4331_s1 + $0xc0] sm:$0xff] }
0x1150   : > { %v2064_v9 = vmul.f32 %v4040_v51, %v4040_v51 }
0x1152   : > { %v2068_v10 = vsel %vm359_vm1, %v2064_v9, 0.0  ;;  %v268_v9 = vld [vmem:[%s4331_s1 + $0xd0] sm:$0xff] }
0x1153   : > { %2069 = vadd.xlane.f32.xlu2 %v2068_v10  ;;  %v269_v10 = vld [vmem:[%s4331_s1 + $0xd8] sm:$0xff] }
0x11ae   : > { %v2073_v15 = vpop.xlane.xlu1 %2072 }
0x11af   : > { %v2081_v26 = vmul.f32 %v2073_v15, %v3235_v6  ;;  %v2214_v15 = vld [vmem:[%s4332_s2 + $0x1a0] sm:$0xff] }
0x11b0   : > { %2295 = vmatpush.msrb.mxu1 %v2214_v15 }
0x11b1   : > { %v2085_v36 = vadd.f32 1e-05, %v2081_v26  ;;  %v2213_v26 = vld [vmem:[%s4332_s2 + $0x198] sm:$0xff] }
0x11b2   : > { %2296 = vmatpush.msrb.mxu1 %v2213_v26 }
0x11b3   : > { %3100 = vrsqrt.f32 %v2085_v36  ;;  %vm2104_vm0 = vweird.f32 %v2085_v36 }
0x11b6   : > { %v2076_v7 = vpop.xlane.xlu0 %2075 }
0x11b7   : > { %v2082_v62 = vmul.f32 %v2076_v7, %v3235_v6  ;;  %v2211_v7 = vld [vmem:[%s4332_s2 + $0x188] sm:$0xff] }
0x11b9   : > { %v2086_v12 = vadd.f32 1e-05, %v2082_v62  ;;  %v3101_v16 = vpop.eup %3100 }
0x11ba   : > { %v2099_v22 = vmul.f32 %v3101_v16, %v2085_v36  ;;  %vm2105_vm13 = vweird.f32 %v3101_v16  ;;  %v2212_v36 = vld [vmem:[%s4332_s2 + $0x190] sm:$0xff] }
0x11bb   : > { %3102 = vrsqrt.f32 %v2086_v12  ;;  %vm2114_vm14 = vweird.f32 %v2086_v12  ;;  %vm2106_vm3 = vmor %vm2104_vm0, %vm2105_vm13  ;;  %2297 = vmatpush.msrb.mxu1 %v2212_v36 }
0x11bc   : > { %v2100_v30 = vmul.f32 %v3101_v16, %v2099_v22 }
0x11bd   : > { %2298 = vmatpush.msrb.mxu1 %v2211_v7 }
0x11be   : > { %v2079_v17 = vpop.xlane.xlu2 %2078  ;;  %v2101_v19 = vmul.f32 0.5, %v2100_v30  ;;  %v3124_v30 = vld [vmem:[%s4331_s1] sm:$0xff] }
0x11bf   : > { %v2083_v29 = vmul.f32 %v2079_v17, %v3235_v6 }
0x11c0   : > { %v2102_v33 = vsub.f32 1.5, %v2101_v19  ;;  %v3127_v19 = vld [vmem:[%s4331_s1 + $0x18] sm:$0xff] }
0x11c1   : > { %v3103_v18 = vpop.eup %3102  ;;  %v2087_v20 = vadd.f32 1e-05, %v2083_v29 }
0x11c2   : > { %v2109_v32 = vmul.f32 %v3103_v18, %v2086_v12  ;;  %vm2115_vm6 = vweird.f32 %v3103_v18  ;;  %v2103_v41 = vmul.f32 %v3101_v16, %v2102_v33  ;;  %v3131_v33 = vld [vmem:[%s4331_s1 + $0x38] sm:$0xff] }
0x11c3   : > { %3104 = vrsqrt.f32 %v2087_v20  ;;  %vm2116_vm15 = vmor %vm2114_vm14, %vm2115_vm6  ;;  %vm2124_vm4 = vweird.f32 %v2087_v20 }
0x11c4   : > { %v2110_v38 = vmul.f32 %v3103_v18, %v2109_v32  ;;  %v2107_v50 = vsel %vm2106_vm3, %v3101_v16, %v2103_v41  ;;  %v3125_v32 = vld [vmem:[%s4331_s1 + $0x8] sm:$0xff] }
0x11c5   : > { %v2129_v54 = vmul.f32 %v2107_v50, %v4026_v60 }
0x11c6   : > { %v2111_v24 = vmul.f32 0.5, %v2110_v38  ;;  %v2070_v25 = vpop.xlane.xlu2 %2069  ;;  %v3126_v38 = vld [vmem:[%s4331_s1 + $0x10] sm:$0xff] }
0x11c7   : > { %v2080_v13 = vmul.f32 %v2070_v25, %v3235_v6  ;;  %v2134_v49 = vmul.f32 %v3035_v53, %v2129_v54  ;;  %v2209_v25 = vld [vmem:[%s4332_s2 + $0x178] sm:$0xff] }
0x11c8   : > { %v2112_v27 = vsub.f32 1.5, %v2111_v24  ;;  %v2210_v24 = vld [vmem:[%s4332_s2 + $0x180] sm:$0xff] }
0x11c9   : > { %v3105_v35 = vpop.eup %3104  ;;  %v2084_v37 = vadd.f32 1e-05, %v2080_v13  ;;  %v2139_v2 = vadd.f32 %v3036_v56, %v2134_v49  ;;  %2360 = vmatpush.msra.mxu3 %v2210_v24  ;;  %v3128_v13 = vld [vmem:[%s4331_s1 + $0x20] sm:$0xff] }
0x11ca   : > { %v2119_v39 = vmul.f32 %v3105_v35, %v2087_v20  ;;  %v2113_v40 = vmul.f32 %v3103_v18, %v2112_v27  ;;  %vm2125_vm2 = vweird.f32 %v3105_v35  ;;  %v2208_v27 = vld [vmem:[%s4332_s2 + $0x170] sm:$0xff] }
0x11cb   : > { %3106 = vrsqrt.f32 %v2084_v37  ;;  %vm2126_vm5 = vmor %vm2124_vm4, %vm2125_vm2  ;;  %vm2094_vm8 = vweird.f32 %v2084_v37  ;;  %2361 = vmatpush.msra.mxu3 %v2209_v25 }
0x11cc   : > { %v2120_v58 = vmul.f32 %v3105_v35, %v2119_v39  ;;  %v2117_v21 = vsel %vm2116_vm15, %v3103_v18, %v2113_v40  ;;  %v2207_v39 = vld [vmem:[%s4332_s2 + $0x168] sm:$0xff] }
0x11cd   : > { %v2130_v46 = vmul.f32 %v2117_v21, %v4032_v43  ;;  %2362 = vmatpush.msra.mxu3 %v2208_v27 }
0x11ce   : > { %v2121_v42 = vmul.f32 0.5, %v2120_v58 }
0x11cf   : > { %v2135_v57 = vmul.f32 %v3035_v53, %v2130_v46  ;;  %2363 = vmatpush.msra.mxu3 %v2207_v39  ;;  %v3037_v46 = vld [vmem:[%s4333_s3 + $0x13] ss:$0 sm:$0xff] }
0x11d0   : > { %v2122_v3 = vsub.f32 1.5, %v2121_v42 }
0x11d1   : > { %v3107_v44 = vpop.eup %3106  ;;  %v2140_v43 = vadd.f32 %v3036_v56, %v2135_v57 }
0x11d2   : > { %v2123_v34 = vmul.f32 %v3105_v35, %v2122_v3  ;;  %v2089_v45 = vmul.f32 %v3107_v44, %v2084_v37  ;;  %vm2095_vm7 = vweird.f32 %v3107_v44  ;;  %v3130_v37 = vld [vmem:[%s4331_s1 + $0x30] sm:$0xff] }
0x11d3   : > { %vm2096_vm9 = vmor %vm2094_vm8, %vm2095_vm7 }
0x11d4   : > { %v2127_v47 = vsel %vm2126_vm5, %v3105_v35, %v2123_v34  ;;  %v2090_v48 = vmul.f32 %v3107_v44, %v2089_v45  ;;  %v3129_v35 = vld [vmem:[%s4331_s1 + $0x28] sm:$0xff] }
0x11d5   : > { %v2131_v52 = vmul.f32 %v2127_v47, %v2063_v8  ;;  %v262_v8 = vld [vmem:[%s4331_s1 + $0xa0] sm:$0xff] }
0x11d6   : > { %v2091_v31 = vmul.f32 0.5, %v2090_v48 }
0x11d7   : > { %v2136_v55 = vmul.f32 %v3035_v53, %v2131_v52 }
0x11d8   : > { %v2092_v61 = vsub.f32 1.5, %v2091_v31 }
0x11d9   : > { %v2141_v63 = vadd.f32 %v3036_v56, %v2136_v55 }
0x11da   : > { %v2093_v0 = vmul.f32 %v3107_v44, %v2092_v61 }
0x11db   : > { %2178 = vmatpush.msra.mxu2 %v2141_v63 }
0x11dc   : > { %v2097_v1 = vsel %vm2096_vm9, %v3107_v44, %v2093_v0 }
0x11dd   : > { %2179 = vmatpush.msra.mxu2 %v2140_v43  ;;  %v2128_v60 = vmul.f32 %v2097_v1, %v4040_v51  ;;  %v267_v51 = vld [vmem:[%s4331_s1 + $0xc8] sm:$0xff] }
0x11df   : > { %2180 = vmatpush.msra.mxu2 %v2139_v2  ;;  %v2133_v4 = vmul.f32 %v3035_v53, %v2128_v60 }
0x11e1   : > { %v2138_v5 = vadd.f32 %v3036_v56, %v2133_v4 }
0x11e3   : > { %2181 = vmatpush.msra.mxu2 %v2138_v5 }
0x11e4   : > { %2941 = vmatmul.msk.f32.vlgmr.msra.gmra.mxu2 %vm359_vm1, %v262_v8 }
0x11ec   : > { %2942 = vmatmul.msk.f32.gmra.mxu2 %vm359_vm1, %v263_v28 }
0x11f4   : > { %2943 = vmatmul.msk.f32.gmra.mxu2 %vm359_vm1, %v264_v14 }
0x11fc   : > { %2944 = vmatmul.msk.f32.gmra.mxu2 %vm359_vm1, %v265_v23 }
0x1204   : > { %2945 = vmatmul.msk.f32.gmra.mxu2 %vm359_vm1, %v266_v59 }
0x120c   : > { %2946 = vmatmul.msk.f32.gmra.mxu2 %vm359_vm1, %v267_v51 }
0x1214   : > { %2947 = vmatmul.msk.f32.gmra.mxu2 %vm359_vm1, %v268_v9 }
0x121c   : > { %2948 = vmatmul.msk.f32.gmra.mxu2 %vm359_vm1, %v269_v10 }
0x1267   : > { %v2183_v62 = vpop.f32.mrf.mxu2 }
0x1268   : > { %2957 = vmatmul.msk.f32.vlgmr.msrb.gmra.mxu1 %vm359_vm1, %v2183_v62 }
0x126f   : > { %v2186_v12 = vpop.f32.mrf.mxu2 }
0x1270   : > { %2958 = vmatmul.msk.f32.gmra.mxu1 %vm359_vm1, %v2186_v12 }
0x1277   : > { %v2189_v16 = vpop.f32.mrf.mxu2 }
0x1278   : > { %2959 = vmatmul.msk.f32.gmra.mxu1 %vm359_vm1, %v2189_v16 }
0x127f   : > { %v2192_v22 = vpop.f32.mrf.mxu2 }
0x1280   : > { %2960 = vmatmul.msk.f32.gmra.mxu1 %vm359_vm1, %v2192_v22 }
0x1287   : > { %v2195_v17 = vpop.f32.mrf.mxu2 }
0x1288   : > { %2961 = vmatmul.msk.f32.gmra.mxu1 %vm359_vm1, %v2195_v17 }
0x128f   : > { %v2198_v29 = vpop.f32.mrf.mxu2 }
0x1290   : > { %2962 = vmatmul.msk.f32.gmra.mxu1 %vm359_vm1, %v2198_v29 }
0x1297   : > { %v2201_v18 = vpop.f32.mrf.mxu2 }
0x1298   : > { %2963 = vmatmul.msk.f32.gmra.mxu1 %vm359_vm1, %v2201_v18 }
0x129f   : > { %v2204_v20 = vpop.f32.mrf.mxu2 }
0x12a0   : > { %2226 = vmatpush.msra.mxu0 %v2204_v20  ;;  %2964 = vmatmul.msk.f32.gmra.mxu1 %vm359_vm1, %v2204_v20 }
0x12a2   : > { %2227 = vmatpush.msra.mxu0 %v2201_v18 }
0x12a4   : > { %2228 = vmatpush.msra.mxu0 %v2198_v29 }
0x12a6   : > { %2229 = vmatpush.msra.mxu0 %v2195_v17 }
0x12a8   : > { %2230 = vmatpush.msra.mxu0 %v2192_v22 }
0x12aa   : > { %2231 = vmatpush.msra.mxu0 %v2189_v16 }
0x12ac   : > { %2232 = vmatpush.msra.mxu0 %v2186_v12 }
0x12ae   : > { %2233 = vmatpush.msra.mxu0 %v2183_v62 }
0x12af   : > { %2949 = vmatmul.msk.f32.vlgmr.msra.gmra.mxu0 %vm637_vm12, %v3124_v30 }
0x12b7   : > { %2950 = vmatmul.msk.f32.gmra.mxu0 %vm637_vm12, %v3125_v32 }
0x12bf   : > { %2951 = vmatmul.msk.f32.gmra.mxu0 %vm637_vm12, %v3126_v38 }
0x12c7   : > { %2952 = vmatmul.msk.f32.gmra.mxu0 %vm637_vm12, %v3127_v19 }
0x12cf   : > { %2953 = vmatmul.msk.f32.gmra.mxu0 %vm637_vm12, %v3128_v13 }
0x12d7   : > { %2954 = vmatmul.msk.f32.gmra.mxu0 %vm637_vm12, %v3129_v35 }
0x12df   : > { %2955 = vmatmul.msk.f32.gmra.mxu0 %vm637_vm12, %v3130_v37 }
0x12e5   : > { %v2300_v34 = vpop.f32.mrf.mxu1 }
0x12e7   : > { %2956 = vmatmul.msk.f32.gmra.mxu0 %vm637_vm12, %v3131_v33 }
0x12ed   : > { %v2303_v45 = vpop.f32.mrf.mxu1 }
0x12f5   : > { %v2306_v31 = vpop.f32.mrf.mxu1 }
0x12fd   : > { %v2309_v43 = vpop.f32.mrf.mxu1 }
0x1305   : > { %v2312_v28 = vpop.f32.mrf.mxu1 }
0x130d   : > { %v2315_v15 = vpop.f32.mrf.mxu1 }
0x1315   : > { %v2318_v22 = vpop.f32.mrf.mxu1 }
0x131d   : > { %v2321_v24 = vpop.f32.mrf.mxu1 }
0x132c   : > { %v2235_v40 = vpop.f32.mrf.mxu0 }
0x132d   : > { %2965 = vmatmul.msk.f32.vlgmr.msra.gmra.mxu3 %vm359_vm1, %v2235_v40 }
0x1334   : > { %v2238_v58 = vpop.f32.mrf.mxu0 }
0x1335   : > { %2966 = vmatmul.msk.f32.gmra.mxu3 %vm359_vm1, %v2238_v58 }
0x133c   : > { %v2241_v41 = vpop.f32.mrf.mxu0 }
0x133d   : > { %2967 = vmatmul.msk.f32.gmra.mxu3 %vm359_vm1, %v2241_v41 }
0x1344   : > { %v2244_v42 = vpop.f32.mrf.mxu0 }
0x1345   : > { %2968 = vmatmul.msk.f32.gmra.mxu3 %vm359_vm1, %v2244_v42 }
0x134c   : > { %v2247_v21 = vpop.f32.mrf.mxu0 }
0x134d   : > { %2969 = vmatmul.msk.f32.gmra.mxu3 %vm359_vm1, %v2247_v21 }
0x1354   : > { %v2250_v3 = vpop.f32.mrf.mxu0 }
0x1355   : > { %2970 = vmatmul.msk.f32.gmra.mxu3 %vm359_vm1, %v2250_v3 }
0x135c   : > { %v2253_v44 = vpop.f32.mrf.mxu0 }
0x135d   : > { %2971 = vmatmul.msk.f32.gmra.mxu3 %vm359_vm1, %v2253_v44 }
0x1364   : > { %v2256_v50 = vpop.f32.mrf.mxu0 }
0x1365   : > { %2972 = vmatmul.msk.f32.gmra.mxu3 %vm359_vm1, %v2256_v50 }
0x13b0   : > { %v2365_v47 = vpop.f32.mrf.mxu3 }
0x13b1   : > { %v2366_v48 = vadd.f32 %v2365_v47, %v2300_v34 }
0x13b3   : > { %v2390_v52 = vadd.f32 %v3037_v46, %v2366_v48 }
0x13b5   : > { %v2398_v53 = vmax.f32 %v2390_v52, 0.0 }
0x13b7   : > { %v2406_v54 = vsel %vm359_vm1, %v2398_v53, 0.0 }
0x13b8   : > { %2407 = vadd.xlane.f32.xlu0 %v2406_v54  ;;  %v2368_v55 = vpop.f32.mrf.mxu3 }
0x13b9   : > { %v2369_v56 = vadd.f32 %v2368_v55, %v2303_v45 }
0x13bb   : > { %v2391_v57 = vadd.f32 %v3037_v46, %v2369_v56 }
0x13bd   : > { %v2399_v61 = vmax.f32 %v2391_v57, 0.0 }
0x13bf   : > { %v2409_v63 = vsel %vm359_vm1, %v2399_v61, 0.0 }
0x13c0   : > { %2410 = vadd.xlane.f32.xlu1 %v2409_v63  ;;  %v2371_v49 = vpop.f32.mrf.mxu3 }
0x13c1   : > { %v2372_v0 = vadd.f32 %v2371_v49, %v2306_v31 }
0x13c3   : > { %v2392_v1 = vadd.f32 %v3037_v46, %v2372_v0 }
0x13c5   : > { %v2400_v2 = vmax.f32 %v2392_v1, 0.0 }
0x13c7   : > { %v2412_v60 = vsel %vm359_vm1, %v2400_v2, 0.0 }
0x13c8   : > { %2413 = vadd.xlane.f32.xlu2 %v2412_v60  ;;  %v2374_v4 = vpop.f32.mrf.mxu3 }
0x13c9   : > { %v2375_v5 = vadd.f32 %v2374_v4, %v2309_v43 }
0x13cb   : > { %v2393_v8 = vadd.f32 %v3037_v46, %v2375_v5 }
0x13cd   : > { %v2401_v14 = vmax.f32 %v2393_v8, 0.0  ;;  %v2603_v8 = vld [vmem:[%s4332_s2 + $0x240] sm:$0xff] }
0x13ce   : > { %2642 = vmatpush.msrb.mxu2 %v2603_v8 }
0x13cf   : > { %v2415_v23 = vsel %vm359_vm1, %v2401_v14, 0.0 }
0x13d0   : > { %2416 = vadd.xlane.f32.xlu0 %v2415_v23  ;;  %v2377_v59 = vpop.f32.mrf.mxu3  ;;  %v2600_v23 = vld [vmem:[%s4332_s2 + $0x228] sm:$0xff] }
0x13d1   : > { %v2378_v51 = vadd.f32 %v2377_v59, %v2312_v28  ;;  %v2602_v28 = vld [vmem:[%s4332_s2 + $0x238] sm:$0xff] }
0x13d2   : > { %2643 = vmatpush.msrb.mxu2 %v2602_v28 }
0x13d3   : > { %v2394_v9 = vadd.f32 %v3037_v46, %v2378_v51 }
0x13d5   : > { %v2402_v10 = vmax.f32 %v2394_v9, 0.0 }
0x13d7   : > { %v2418_v26 = vsel %vm359_vm1, %v2402_v10, 0.0 }
0x13d8   : > { %2419 = vadd.xlane.f32.xlu1 %v2418_v26  ;;  %v2380_v36 = vpop.f32.mrf.mxu3 }
0x13d9   : > { %v2381_v7 = vadd.f32 %v2380_v36, %v2315_v15 }
0x13db   : > { %v2395_v62 = vadd.f32 %v3037_v46, %v2381_v7 }
0x13dd   : > { %v2403_v12 = vmax.f32 %v2395_v62, 0.0 }
0x13df   : > { %v2421_v16 = vsel %vm359_vm1, %v2403_v12, 0.0 }
0x13e0   : > { %2422 = vadd.xlane.f32.xlu2 %v2421_v16  ;;  %v2383_v17 = vpop.f32.mrf.mxu3 }
0x13e1   : > { %v2384_v29 = vadd.f32 %v2383_v17, %v2318_v22 }
0x13e3   : > { %v2396_v18 = vadd.f32 %v3037_v46, %v2384_v29 }
0x13e5   : > { %v2404_v20 = vmax.f32 %v2396_v18, 0.0 }
0x13e7   : > { %v2424_v30 = vsel %vm359_vm1, %v2404_v20, 0.0 }
0x13e8   : > { %2425 = vadd.xlane.f32.xlu1 %v2424_v30  ;;  %v2386_v32 = vpop.f32.mrf.mxu3 }
0x13e9   : > { %v2387_v25 = vadd.f32 %v2386_v32, %v2321_v24 }
0x13eb   : > { %v2397_v35 = vadd.f32 %v3037_v46, %v2387_v25  ;;  %v4240_v25 = vld [vmem:[%s4333_s3 + $0x14] ss:$0 sm:$0xff] }
0x13ed   : > { %v2405_v58 = vmax.f32 %v2397_v35, 0.0 }
0x13ef   : > { %v2427_v21 = vsel %vm359_vm1, %v2405_v58, 0.0 }
0x142b   : > { %v2408_v38 = vpop.xlane.xlu0 %2407 }
0x142c   : > { %v2430_v19 = vmul.f32 %v2408_v38, %v3235_v6 }
0x142e   : > { %v4173_v13 = vsub.f32 %v2398_v53, %v2430_v19 }
0x1430   : > { %v2446_v27 = vmul.f32 %v4173_v13, %v4173_v13 }
0x1432   : > { %v2454_v37 = vsel %vm359_vm1, %v2446_v27, 0.0 }
0x1433   : > { %v2411_v33 = vpop.xlane.xlu1 %2410  ;;  %2455 = vadd.xlane.f32.xlu0 %v2454_v37  ;;  %v4245_v37 = vld [vmem:[%s4333_s3 + $0x15] ss:$0 sm:$0xff] }
0x1434   : > { %v2431_v39 = vmul.f32 %v2411_v33, %v3235_v6 }
0x1436   : > { %v4179_v40 = vsub.f32 %v2399_v61, %v2431_v39 }
0x1438   : > { %v2447_v41 = vmul.f32 %v4179_v40, %v4179_v40 }
0x143a   : > { %v2457_v42 = vsel %vm359_vm1, %v2447_v41, 0.0 }
0x143b   : > { %v2414_v3 = vpop.xlane.xlu2 %2413  ;;  %2458 = vadd.xlane.f32.xlu2 %v2457_v42  ;;  %2428 = vadd.xlane.f32.xlu0 %v2427_v21 }
0x143c   : > { %v2432_v44 = vmul.f32 %v2414_v3, %v3235_v6 }
0x143e   : > { %v4186_v50 = vsub.f32 %v2400_v2, %v2432_v44 }
0x1440   : > { %v2448_v34 = vmul.f32 %v4186_v50, %v4186_v50 }
0x1442   : > { %v2460_v45 = vsel %vm359_vm1, %v2448_v34, 0.0 }
0x1443   : > { %v2417_v46 = vpop.xlane.xlu0 %2416  ;;  %2461 = vadd.xlane.f32.xlu1 %v2460_v45 }
0x1444   : > { %v2433_v47 = vmul.f32 %v2417_v46, %v3235_v6 }
0x1446   : > { %v4192_v48 = vsub.f32 %v2401_v14, %v2433_v47  ;;  %v2601_v14 = vld [vmem:[%s4332_s2 + $0x230] sm:$0xff] }
0x1447   : > { %2644 = vmatpush.msrb.mxu2 %v2601_v14 }
0x1448   : > { %v2449_v52 = vmul.f32 %v4192_v48, %v4192_v48 }
0x1449   : > { %2645 = vmatpush.msrb.mxu2 %v2600_v23 }
0x144a   : > { %v2463_v53 = vsel %vm359_vm1, %v2449_v52, 0.0 }
0x144b   : > { %v2420_v54 = vpop.xlane.xlu1 %2419  ;;  %2464 = vadd.xlane.f32.xlu2 %v2463_v53 }
0x144c   : > { %v2434_v31 = vmul.f32 %v2420_v54, %v3235_v6 }
0x144e   : > { %v4198_v55 = vsub.f32 %v2402_v10, %v2434_v31 }
0x1450   : > { %v2450_v56 = vmul.f32 %v4198_v55, %v4198_v55 }
0x1452   : > { %v2466_v57 = vsel %vm359_vm1, %v2450_v56, 0.0 }
0x1453   : > { %v2423_v61 = vpop.xlane.xlu2 %2422  ;;  %2467 = vadd.xlane.f32.xlu0 %v2466_v57 }
0x1454   : > { %v2435_v63 = vmul.f32 %v2423_v61, %v3235_v6 }
0x1456   : > { %v4204_v49 = vsub.f32 %v2403_v12, %v2435_v63 }
0x1458   : > { %v2451_v0 = vmul.f32 %v4204_v49, %v4204_v49 }
0x145a   : > { %v2469_v43 = vsel %vm359_vm1, %v2451_v0, 0.0 }
0x145b   : > { %2470 = vadd.xlane.f32.xlu1 %v2469_v43  ;;  %v2426_v1 = vpop.xlane.xlu1 %2425 }
0x145c   : > { %v2436_v2 = vmul.f32 %v2426_v1, %v3235_v6 }
0x145e   : > { %v4210_v60 = vsub.f32 %v2404_v20, %v2436_v2 }
0x1460   : > { %v2452_v4 = vmul.f32 %v4210_v60, %v4210_v60 }
0x1462   : > { %v2472_v5 = vsel %vm359_vm1, %v2452_v4, 0.0 }
0x1463   : > { %2473 = vadd.xlane.f32.xlu2 %v2472_v5  ;;  %1590 = vadd.xlane.f32.xlu1 %v3880_v11 }
0x14a6   : > { %v2456_v11 = vpop.xlane.xlu0 %2455 }
0x14a7   : > { %v2478_v59 = vmul.f32 %v2456_v11, %v3235_v6 }
0x14a9   : > { %v2486_v51 = vadd.f32 1e-05, %v2478_v59 }
0x14ab   : > { %3108 = vrsqrt.f32 %v2486_v51  ;;  %vm2500_vm10 = vweird.f32 %v2486_v51 }
0x14ae   : > { %v2459_v9 = vpop.xlane.xlu2 %2458  ;;  %v2429_v10 = vpop.xlane.xlu0 %2428 }
0x14af   : > { %v2479_v15 = vmul.f32 %v2459_v9, %v3235_v6  ;;  %v2437_v26 = vmul.f32 %v2429_v10, %v3235_v6 }
0x14b1   : > { %v3109_v36 = vpop.eup %3108  ;;  %v2487_v7 = vadd.f32 1e-05, %v2479_v15  ;;  %v4231_v62 = vsub.f32 %v2405_v58, %v2437_v26 }
0x14b2   : > { %v2495_v12 = vmul.f32 %v3109_v36, %v2486_v51  ;;  %vm2501_vm12 = vweird.f32 %v3109_v36 }
0x14b3   : > { %3110 = vrsqrt.f32 %v2487_v7  ;;  %v2453_v16 = vmul.f32 %v4231_v62, %v4231_v62  ;;  %vm2502_vm11 = vmor %vm2500_vm10, %vm2501_vm12  ;;  %vm2510_vm13 = vweird.f32 %v2487_v7 }
0x14b4   : > { %v2496_v22 = vmul.f32 %v3109_v36, %v2495_v12 }
0x14b5   : > { %v2475_v17 = vsel %vm359_vm1, %v2453_v16, 0.0 }
0x14b6   : > { %v2497_v29 = vmul.f32 0.5, %v2496_v22  ;;  %v2462_v18 = vpop.xlane.xlu1 %2461  ;;  %2476 = vadd.xlane.f32.xlu0 %v2475_v17 }
0x14b7   : > { %v2480_v20 = vmul.f32 %v2462_v18, %v3235_v6 }
0x14b8   : > { %v2498_v30 = vsub.f32 1.5, %v2497_v29 }
0x14b9   : > { %v3111_v32 = vpop.eup %3110  ;;  %v2488_v38 = vadd.f32 1e-05, %v2480_v20 }
0x14ba   : > { %v2499_v19 = vmul.f32 %v3109_v36, %v2498_v30  ;;  %v2505_v24 = vmul.f32 %v3111_v32, %v2487_v7  ;;  %vm2511_vm6 = vweird.f32 %v3111_v32 }
0x14bb   : > { %3112 = vrsqrt.f32 %v2488_v38  ;;  %vm2512_vm14 = vmor %vm2510_vm13, %vm2511_vm6  ;;  %vm2520_vm0 = vweird.f32 %v2488_v38 }
0x14bc   : > { %v2503_v27 = vsel %vm2502_vm11, %v3109_v36, %v2499_v19  ;;  %v2506_v35 = vmul.f32 %v3111_v32, %v2505_v24 }
0x14bd   : > { %v2574_v33 = vmul.f32 %v2503_v27, %v4173_v13 }
0x14be   : > { %v2507_v39 = vmul.f32 0.5, %v2506_v35  ;;  %v2465_v58 = vpop.xlane.xlu2 %2464 }
0x14bf   : > { %v2583_v41 = vmul.f32 %v4240_v25, %v2574_v33  ;;  %v2481_v42 = vmul.f32 %v2465_v58, %v3235_v6 }
0x14c0   : > { %v2508_v21 = vsub.f32 1.5, %v2507_v39 }
0x14c1   : > { %v3113_v3 = vpop.eup %3112  ;;  %v2592_v44 = vadd.f32 %v4245_v37, %v2583_v41  ;;  %v2489_v34 = vadd.f32 1e-05, %v2481_v42 }
0x14c2   : > { %v2509_v45 = vmul.f32 %v3111_v32, %v2508_v21  ;;  %v2515_v46 = vmul.f32 %v3113_v3, %v2488_v38  ;;  %vm2521_vm15 = vweird.f32 %v3113_v3 }
0x14c3   : > { %3114 = vrsqrt.f32 %v2489_v34  ;;  %2973 = vmatmul.msk.f32.vlgmr.msrb.gmra.mxu2 %vm359_vm1, %v2592_v44  ;;  %vm2522_vm2 = vmor %vm2520_vm0, %vm2521_vm15  ;;  %vm2530_vm4 = vweird.f32 %v2489_v34 }
0x14c4   : > { %v2513_v13 = vsel %vm2512_vm14, %v3111_v32, %v2509_v45  ;;  %v2516_v47 = vmul.f32 %v3113_v3, %v2515_v46 }
0x14c5   : > { %v2575_v52 = vmul.f32 %v2513_v13, %v4179_v40 }
0x14c6   : > { %v2517_v53 = vmul.f32 0.5, %v2516_v47  ;;  %v2468_v54 = vpop.xlane.xlu0 %2467 }
0x14c7   : > { %v2482_v31 = vmul.f32 %v2468_v54, %v3235_v6  ;;  %v2584_v56 = vmul.f32 %v4240_v25, %v2575_v52 }
0x14c8   : > { %v2518_v57 = vsub.f32 1.5, %v2517_v53 }
0x14c9   : > { %v3115_v61 = vpop.eup %3114  ;;  %v2490_v63 = vadd.f32 1e-05, %v2482_v31  ;;  %v2593_v0 = vadd.f32 %v4245_v37, %v2584_v56 }
0x14ca   : > { %v2519_v43 = vmul.f32 %v3113_v3, %v2518_v57  ;;  %v2525_v1 = vmul.f32 %v3115_v61, %v2489_v34  ;;  %vm2531_vm3 = vweird.f32 %v3115_v61 }
0x14cb   : > { %3116 = vrsqrt.f32 %v2490_v63  ;;  %2974 = vmatmul.msk.f32.gmra.mxu2 %vm359_vm1, %v2593_v0  ;;  %vm2532_vm5 = vmor %vm2530_vm4, %vm2531_vm3  ;;  %vm2540_vm8 = vweird.f32 %v2490_v63  ;;  %v2682_v0 = vld [vmem:[%s4332_s2 + $0x260] sm:$0xff] }
0x14cc   : > { %v2523_v40 = vsel %vm2522_vm2, %v3113_v3, %v2519_v43  ;;  %v2526_v2 = vmul.f32 %v3115_v61, %v2525_v1  ;;  %2721 = vmatpush.msrb.mxu0 %v2682_v0  ;;  %v2680_v1 = vld [vmem:[%s4332_s2 + $0x250] sm:$0xff] }
0x14cd   : > { %v2576_v4 = vmul.f32 %v2523_v40, %v4186_v50 }
0x14ce   : > { %v2527_v5 = vmul.f32 0.5, %v2526_v2  ;;  %v2471_v8 = vpop.xlane.xlu1 %2470  ;;  %v2679_v2 = vld [vmem:[%s4332_s2 + $0x248] sm:$0xff] }
0x14cf   : > { %v2483_v28 = vmul.f32 %v2471_v8, %v3235_v6  ;;  %v2585_v14 = vmul.f32 %v4240_v25, %v2576_v4 }
0x14d0   : > { %v2528_v23 = vsub.f32 1.5, %v2527_v5 }
0x14d1   : > { %v3117_v11 = vpop.eup %3116  ;;  %v2491_v59 = vadd.f32 1e-05, %v2483_v28  ;;  %v2594_v51 = vadd.f32 %v4245_v37, %v2585_v14 }
0x14d2   : > { %v2529_v9 = vmul.f32 %v3115_v61, %v2528_v23  ;;  %v2535_v10 = vmul.f32 %v3117_v11, %v2490_v63  ;;  %vm2541_vm7 = vweird.f32 %v3117_v11 }
0x14d3   : > { %3118 = vrsqrt.f32 %v2491_v59  ;;  %2975 = vmatmul.msk.f32.gmra.mxu2 %vm359_vm1, %v2594_v51  ;;  %vm2542_vm9 = vmor %vm2540_vm8, %vm2541_vm7  ;;  %vm2550_vm10 = vweird.f32 %v2491_v59 }
0x14d4   : > { %v2533_v50 = vsel %vm2532_vm5, %v3115_v61, %v2529_v9  ;;  %v2536_v15 = vmul.f32 %v3117_v11, %v2535_v10  ;;  %v3040_v9 = vld [vmem:[%s4333_s3 + $0x1c] ss:$0 sm:$0xff] }
0x14d5   : > { %v2577_v26 = vmul.f32 %v2533_v50, %v4192_v48 }
0x14d6   : > { %v2537_v36 = vmul.f32 0.5, %v2536_v15  ;;  %v2474_v7 = vpop.xlane.xlu2 %2473  ;;  %v1591_v12 = vpop.xlane.xlu1 %1590 }
0x14d7   : > { %v2484_v16 = vmul.f32 %v2474_v7, %v3235_v6  ;;  %v1592_v22 = vrot.slane %v1591_v12, 4  ;;  %v2586_v17 = vmul.f32 %v4240_v25, %v2577_v26 }
0x14d8   : > { %v2538_v29 = vsub.f32 1.5, %v2537_v36 }
0x14d9   : > { %v3119_v18 = vpop.eup %3118  ;;  %v2492_v20 = vadd.f32 1e-05, %v2484_v16  ;;  %v1593_v30 = vadd.f32 %v1592_v22, %v1591_v12  ;;  %v2595_v32 = vadd.f32 %v4245_v37, %v2586_v17 }
0x14da   : > { %v2539_v38 = vmul.f32 %v3117_v11, %v2538_v29  ;;  %v2545_v19 = vmul.f32 %v3119_v18, %v2491_v59  ;;  %vm2551_vm12 = vweird.f32 %v3119_v18 }
0x14db   : > { %3120 = vrsqrt.f32 %v2492_v20  ;;  %v1594_v48 = vrot.slane %v1593_v30, 2  ;;  %2976 = vmatmul.msk.f32.gmra.mxu2 %vm359_vm1, %v2595_v32  ;;  %vm2552_vm11 = vmor %vm2550_vm10, %vm2551_vm12  ;;  %vm2560_vm13 = vweird.f32 %v2492_v20 }
0x14dc   : > { %v2543_v24 = vsel %vm2542_vm9, %v3117_v11, %v2539_v38  ;;  %v2546_v27 = vmul.f32 %v3119_v18, %v2545_v19 }
0x14dd   : > { %v2578_v35 = vmul.f32 %v2543_v24, %v4198_v55  ;;  %v1595_v33 = vadd.f32 %v1594_v48, %v1593_v30 }
0x14de   : > { %v2547_v39 = vmul.f32 0.5, %v2546_v27  ;;  %v3041_v27 = vld [vmem:[%s4333_s3 + $0x1d] ss:$0 sm:$0xff] }
0x14df   : > { %v1596_v58 = vrot.slane %v1595_v33, 1  ;;  %v2587_v41 = vmul.f32 %v4240_v25, %v2578_v35 }
0x14e0   : > { %v2548_v42 = vsub.f32 1.5, %v2547_v39 }
0x14e1   : > { %v3121_v21 = vpop.eup %3120  ;;  %v1597_v3 = vadd.f32 %v1596_v58, %v1595_v33  ;;  %v2596_v44 = vadd.f32 %v4245_v37, %v2587_v41 }
0x14e2   : > { %v2549_v34 = vmul.f32 %v3119_v18, %v2548_v42  ;;  %v2555_v45 = vmul.f32 %v3121_v21, %v2492_v20  ;;  %vm2561_vm6 = vweird.f32 %v3121_v21 }
0x14e3   : > { %3001 = vpush %v1597_v3  ;;  %2977 = vmatmul.msk.f32.gmra.mxu2 %vm359_vm1, %v2596_v44  ;;  %vm2562_vm14 = vmor %vm2560_vm13, %vm2561_vm6 }
0x14e4   : > { %v2553_v46 = vsel %vm2552_vm11, %v3119_v18, %v2549_v34  ;;  %v2556_v55 = vmul.f32 %v3121_v21, %v2555_v45 }
0x14e5   : > { %v2579_v13 = vmul.f32 %v2553_v46, %v4204_v49 }
0x14e6   : > { %v2557_v47 = vmul.f32 0.5, %v2556_v55 }
0x14e7   : > { %v2588_v52 = vmul.f32 %v4240_v25, %v2579_v13 }
0x14e8   : > { %v2558_v53 = vsub.f32 1.5, %v2557_v47 }
0x14e9   : > { %v2597_v54 = vadd.f32 %v4245_v37, %v2588_v52 }
0x14ea   : > { %v2559_v31 = vmul.f32 %v3121_v21, %v2558_v53 }
0x14eb   : > { %2978 = vmatmul.msk.f32.gmra.mxu2 %vm359_vm1, %v2597_v54 }
0x14ec   : > { %v2563_v56 = vsel %vm2562_vm14, %v3121_v21, %v2559_v31 }
0x14ed   : > { %v2580_v57 = vmul.f32 %v2563_v56, %v4210_v60  ;;  %v2681_v60 = vld [vmem:[%s4332_s2 + $0x258] sm:$0xff] }
0x14ee   : > { %2722 = vmatpush.msrb.mxu0 %v2681_v60 }
0x14ef   : > { %v2589_v61 = vmul.f32 %v4240_v25, %v2580_v57 }
0x14f0   : > { %2723 = vmatpush.msrb.mxu0 %v2680_v1 }
0x14f1   : > { %v2598_v63 = vadd.f32 %v4245_v37, %v2589_v61 }
0x14f2   : > { %2724 = vmatpush.msrb.mxu0 %v2679_v2 }
0x14f3   : > { %2979 = vmatmul.msk.f32.gmra.mxu2 %vm359_vm1, %v2598_v63 }
0x1514   : > { %s3002_s23 = spop %3001 }
0x1515   : > { %v1599_v49 = vstv %s3002_s23 }
0x1516   : > { %1600 = vst [vmem:[%s233_s21] sm:$0x1] %v1599_v49 }
0x1529   : > { %v2477_v43 = vpop.xlane.xlu0 %2476 }
0x152a   : > { %v2485_v40 = vmul.f32 %v2477_v43, %v3235_v6 }
0x152c   : > { %v2493_v4 = vadd.f32 1e-05, %v2485_v40 }
0x152e   : > { %3122 = vrsqrt.f32 %v2493_v4  ;;  %vm2570_vm0 = vweird.f32 %v2493_v4 }
0x1534   : > { %v3123_v5 = vpop.eup %3122 }
0x1535   : > { %v2565_v8 = vmul.f32 %v3123_v5, %v2493_v4  ;;  %vm2571_vm15 = vweird.f32 %v3123_v5 }
0x1536   : > { %vm2572_vm2 = vmor %vm2570_vm0, %vm2571_vm15 }
0x1537   : > { %v2566_v28 = vmul.f32 %v3123_v5, %v2565_v8 }
0x1539   : > { %v2567_v14 = vmul.f32 0.5, %v2566_v28 }
0x153b   : > { %v2568_v23 = vsub.f32 1.5, %v2567_v14 }
0x153d   : > { %v2569_v11 = vmul.f32 %v3123_v5, %v2568_v23 }
0x153f   : > { %v2573_v59 = vsel %vm2572_vm2, %v3123_v5, %v2569_v11 }
0x1540   : > { %v2581_v6 = vmul.f32 %v2573_v59, %v4231_v62 }
0x1542   : > { %v2590_v51 = vmul.f32 %v4240_v25, %v2581_v6 }
0x1544   : > { %v2599_v10 = vadd.f32 %v4245_v37, %v2590_v51 }
0x1546   : > { %v2647_v50 = vpop.f32.mrf.mxu2  ;;  %2980 = vmatmul.msk.f32.gmra.mxu2 %vm359_vm1, %v2599_v10 }
0x1547   : > { %v2648_v15 = vadd.f32 %v3040_v9, %v2647_v50 }
0x1549   : > { %v2671_v26 = vmax.f32 %v2648_v15, 0.0 }
0x154b   : > { %2981 = vmatmul.msk.f32.vlgmr.msrb.gmra.mxu0 %vm359_vm1, %v2671_v26 }
0x154e   : > { %v2650_v36 = vpop.f32.mrf.mxu2 }
0x154f   : > { %v2651_v7 = vadd.f32 %v3040_v9, %v2650_v36 }
0x1551   : > { %v2672_v12 = vmax.f32 %v2651_v7, 0.0 }
0x1553   : > { %2982 = vmatmul.msk.f32.gmra.mxu0 %vm359_vm1, %v2672_v12 }
0x1556   : > { %v2653_v62 = vpop.f32.mrf.mxu2 }
0x1557   : > { %v2654_v25 = vadd.f32 %v3040_v9, %v2653_v62 }
0x1559   : > { %v2673_v16 = vmax.f32 %v2654_v25, 0.0 }
0x155b   : > { %2983 = vmatmul.msk.f32.gmra.mxu0 %vm359_vm1, %v2673_v16 }
0x155e   : > { %v2656_v22 = vpop.f32.mrf.mxu2 }
0x155f   : > { %v2657_v17 = vadd.f32 %v3040_v9, %v2656_v22 }
0x1561   : > { %v2674_v37 = vmax.f32 %v2657_v17, 0.0 }
0x1563   : > { %2984 = vmatmul.msk.f32.gmra.mxu0 %vm359_vm1, %v2674_v37 }
0x1566   : > { %v2659_v29 = vpop.f32.mrf.mxu2 }
0x1567   : > { %v2660_v18 = vadd.f32 %v3040_v9, %v2659_v29 }
0x1569   : > { %v2675_v20 = vmax.f32 %v2660_v18, 0.0 }
0x156b   : > { %2985 = vmatmul.msk.f32.gmra.mxu0 %vm359_vm1, %v2675_v20 }
0x156e   : > { %v2662_v30 = vpop.f32.mrf.mxu2 }
0x156f   : > { %v2663_v32 = vadd.f32 %v3040_v9, %v2662_v30 }
0x1571   : > { %v2676_v38 = vmax.f32 %v2663_v32, 0.0 }
0x1573   : > { %2986 = vmatmul.msk.f32.gmra.mxu0 %vm359_vm1, %v2676_v38 }
0x1576   : > { %v2665_v19 = vpop.f32.mrf.mxu2 }
0x1577   : > { %v2666_v48 = vadd.f32 %v3040_v9, %v2665_v19 }
0x1579   : > { %v2677_v24 = vmax.f32 %v2666_v48, 0.0 }
0x157b   : > { %2987 = vmatmul.msk.f32.gmra.mxu0 %vm359_vm1, %v2677_v24 }
0x15c8   : > { %v2726_v35 = vpop.f32.mrf.mxu0 }
0x15c9   : > { %v2727_v33 = vadd.f32 %v3041_v27, %v2726_v35  ;;  %v2668_v39 = vpop.f32.mrf.mxu2 }
0x15ca   : > { %v2669_v58 = vadd.f32 %v3040_v9, %v2668_v39 }
0x15cb   : > { %2750 = vst.msk [vmem:[%s230_s13] sm:$0xff] %vm359_vm1, %v2727_v33 }
0x15cc   : > { %v2678_v41 = vmax.f32 %v2669_v58, 0.0 }
0x15ce   : > { %2988 = vmatmul.msk.f32.gmra.mxu0 %vm359_vm1, %v2678_v41 }
0x15d0   : > { %v2729_v42 = vpop.f32.mrf.mxu0 }
0x15d1   : > { %v2730_v21 = vadd.f32 %v3041_v27, %v2729_v42 }
0x15d3   : > { %2751 = vst.msk [vmem:[%s230_s13 + $0x8] sm:$0xff] %vm359_vm1, %v2730_v21 }
0x15d8   : > { %v2732_v3 = vpop.f32.mrf.mxu0 }
0x15d9   : > { %v2733_v44 = vadd.f32 %v3041_v27, %v2732_v3 }
0x15db   : > { %2752 = vst.msk [vmem:[%s230_s13 + $0x10] sm:$0xff] %vm359_vm1, %v2733_v44 }
0x15e0   : > { %v2735_v34 = vpop.f32.mrf.mxu0 }
0x15e1   : > { %v2736_v45 = vadd.f32 %v3041_v27, %v2735_v34 }
0x15e3   : > { %2753 = vst.msk [vmem:[%s230_s13 + $0x18] sm:$0xff] %vm359_vm1, %v2736_v45 }
0x15e8   : > { %v2738_v46 = vpop.f32.mrf.mxu0 }
0x15e9   : > { %v2739_v55 = vadd.f32 %v3041_v27, %v2738_v46 }
0x15eb   : > { %2754 = vst.msk [vmem:[%s230_s13 + $0x20] sm:$0xff] %vm359_vm1, %v2739_v55 }
0x15f0   : > { %v2741_v13 = vpop.f32.mrf.mxu0 }
0x15f1   : > { %v2742_v47 = vadd.f32 %v3041_v27, %v2741_v13 }
0x15f3   : > { %2755 = vst.msk [vmem:[%s230_s13 + $0x28] sm:$0xff] %vm359_vm1, %v2742_v47 }
0x15f8   : > { %v2744_v52 = vpop.f32.mrf.mxu0 }
0x15f9   : > { %v2745_v53 = vadd.f32 %v3041_v27, %v2744_v52 }
0x15fb   : > { %2756 = vst.msk [vmem:[%s230_s13 + $0x30] sm:$0xff] %vm359_vm1, %v2745_v53 }
0x164b   : > { %v2747_v54 = vpop.f32.mrf.mxu0 }
0x164c   : > { %v2748_v31 = vadd.f32 %v3041_v27, %v2747_v54 }
0x164e   : > { %2757 = vst.msk [vmem:[%s230_s13 + $0x38] sm:$0xff] %vm359_vm1, %v2748_v31 }
0x164f PF: > { %s16_s18 = sadd.s32 1, %s3138_s18  }
0x1650   : > { %p13_p4 = scmp.ge.s32.totalorder %s16_s18, 6  }
0x1652   :  { %15 = sbr.rel (!%p13_p4) target bundleno = 1 (0x1), region = 78 }

</bundles_post_ra>
